<compile_context>
chip_gen: v7x
topology: tpu7x:2x2x1
jax: 0.10.0
libtpu: 0.0.40
codegen_flags: <defaults>
</compile_context>

<pallas_src>
import math

import jax
import jax.numpy as jnp
from jax.experimental import pallas as pl
from jax.experimental.pallas import tpu as pltpu

# ----------------------------- configuration -----------------------------
TASK = "long_term_forecast"
SEQ_LEN = 36                        # must equal retrieval window size
PRED_LEN = 12
ENC_IN = 1
D_MODEL = 32
N_HEADS = 4
D_FF = 64
E_LAYERS = 2
PATCH_LEN = 16
STRIDE = 8
PADDING = STRIDE                    # padding = stride in the module
N_RETRIEVE = 5                      # faiss top-k
WINDOW_SIZE = SEQ_LEN * ENC_IN      # = 36, faiss index dimensionality
N_WINDOWS = 64                      # synthetic retrieval corpus size (<=128)
HEAD_DIM = D_MODEL // N_HEADS
NUM_PATCHES = (SEQ_LEN + PADDING - PATCH_LEN) // STRIDE + 1   # = 4
HEAD_NF = D_MODEL * NUM_PATCHES                               # = 128
N_VARS = N_RETRIEVE + ENC_IN        # = 6 channels fed to the patch embedding
LN_EPS = 1e-5
BN_EPS = 1e-5
NEG_INF = -1e30
LANES = 128

# aux-row lane layout produced by kernel 1:
#   [0:36]  normalized series, [36:44] replication padding, [44] mean, [45] std
MU_LANE = WINDOW_SIZE + PADDING     # 44
SD_LANE = MU_LANE + 1               # 45

# ---- big weight-slab row layout (all rows are 128 lanes, f32) -------------
DW0 = 0                                        # corpus, ReplicationPad'ed (64 rows)
EMB0 = N_WINDOWS                               # W_emb (16 rows)
L_BASE = EMB0 + PATCH_LEN                      # first encoder layer
LAYER_ROWS = 3 * D_MODEL + D_FF                # Wqkv(32) + Wo(32) + W1(32) + W2(64)
HEAD0 = L_BASE + E_LAYERS * LAYER_ROWS         # FlattenHead (4 * 32 rows)
WSLAB_ROWS = HEAD0 + NUM_PATCHES * D_MODEL     # = 528

# ---- small parameter-slab row layout ---------------------------------------
P_POS = 0                                      # pos embedding (NUM_PATCHES rows)
P_L0 = NUM_PATCHES
P_LROWS = 8                                    # bqkv, bo, b1, b2, ln1w, ln1b, ln2w, ln2b
P_BN_S = P_L0 + E_LAYERS * P_LROWS             # 20
P_BN_B = P_BN_S + 1                            # 21
P_BHEAD = P_BN_B + 1                           # 22
PSLAB_ROWS = ((P_BHEAD + 1 + 7) // 8) * 8      # 24

WTQ_ROWS = ((WINDOW_SIZE + 1 + 7) // 8) * 8    # 40 (corpus^T rows + ||w||^2 row)

_VMEM = pl.BlockSpec(memory_space=pltpu.MemorySpace.VMEM)


# ------------------------------ Pallas kernels ----------------------------
def _norm_dist_kernel(x_ref, wtq_ref, d_ref, aux_ref):
    """RevIN instance norm + squared-L2 distances vs. the retrieval corpus."""
    f32 = jnp.float32
    x = x_ref[...]                                        # (B, 36)
    B = x.shape[0]
    mu = jnp.mean(x, axis=1, keepdims=True)               # (B, 1)
    xc = x - mu
    var = jnp.mean(xc * xc, axis=1, keepdims=True)        # unbiased=False
    sd = jnp.sqrt(var + 1e-5)
    xn = xc / sd                                          # normalized series

    wtq = wtq_ref[...]                                    # (40, 128) packed
    wt = wtq[:WINDOW_SIZE, :]                             # corpus^T  (36, 128)
    wsq = wtq[WINDOW_SIZE:WINDOW_SIZE + 1, :]             # ||w||^2 (+1e30 pad cols)
    xx = jnp.sum(xn * xn, axis=1, keepdims=True)          # (B, 1)
    d_ref[...] = xx - 2.0 * jnp.dot(xn, wt, preferred_element_type=f32) + wsq

    # auxiliary output: [xn | replication pad | mu | sd | zeros]  (lane-dense)
    rep = jnp.broadcast_to(xn[:, WINDOW_SIZE - 1:WINDOW_SIZE], (B, PADDING))
    aux = jnp.concatenate(
        [xn, rep, mu, sd, jnp.zeros((B, LANES - SD_LANE - 1), f32)], axis=1)
    pad_rows = aux_ref.shape[0] - B
    if pad_rows:
        aux = jnp.concatenate([aux, jnp.zeros((pad_rows, LANES), f32)], axis=0)
    aux_ref[...] = aux


def retrieve_normalize(x_flat, wtq):
    B = x_flat.shape[0]
    aux_rows = ((B + 7) // 8) * 8
    out_shape = (
        jax.ShapeDtypeStruct((B, LANES), jnp.float32),        # distances
        jax.ShapeDtypeStruct((aux_rows, LANES), jnp.float32),  # xn|pad|mu|sd
    )
    return pl.pallas_call(
        _norm_dist_kernel,
        out_shape=out_shape,
        in_specs=[_VMEM, _VMEM],
        out_specs=(_VMEM, _VMEM),
    )(x_flat.astype(jnp.float32), wtq)


def _ln(v, w, b):
    """LayerNorm over the last (feature) dim, biased variance (PyTorch)."""
    mu = jnp.mean(v, axis=-1, keepdims=True)
    d = v - mu
    var = jnp.mean(d * d, axis=-1, keepdims=True)
    return d * jax.lax.rsqrt(var + LN_EPS) * w + b


def _encoder_head_kernel(rowidx_ref, aux_ref, wslab_ref, pslab_ref, out_ref):
    """Fused: corpus gather + patch embed -> encoder -> BN(eval) -> head."""
    f32 = jnp.float32
    scale = 1.0 / math.sqrt(HEAD_DIM)
    bn_pad = out_ref.shape[0]                 # padded (batch*var) rows, power of 2
    T = NUM_PATCHES * bn_pad                  # tokens, patch-major layout
    aux_rows = aux_ref.shape[0]

    ps = pslab_ref[...]                                        # (24, 128)

    # ---- retrieval gather + own-series placement (in-kernel one-hot matmuls)
    row_idx = rowidx_ref[...]                                  # (bn_pad, 1) int32
    widx = jax.lax.broadcasted_iota(jnp.int32, (1, N_WINDOWS), 1)
    onehot = (row_idx == widx).astype(f32)                     # (bn_pad, 64)
    series = jnp.dot(onehot, wslab_ref[DW0:DW0 + N_WINDOWS, :],
                     preferred_element_type=f32)               # (bn_pad, 128)
    bn_i = jax.lax.broadcasted_iota(jnp.int32, (bn_pad, 1), 0)
    b_i = jax.lax.broadcasted_iota(jnp.int32, (1, aux_rows), 1)
    own = (bn_i == b_i * N_VARS + (N_VARS - 1)).astype(f32)    # (bn_pad, aux_rows)
    series = series + jnp.dot(own, aux_ref[...], preferred_element_type=f32)

    # ---- patch value embedding (Linear(patch_len, d_model, no bias)) + pos
    emb = wslab_ref[EMB0:EMB0 + PATCH_LEN, :]                  # (16, 128)
    xs = []
    for p in range(NUM_PATCHES):
        sl = series[:, p * STRIDE:p * STRIDE + PATCH_LEN]      # (bn_pad, 16)
        xp = jnp.dot(sl, emb, preferred_element_type=f32)[:, :D_MODEL]
        xs.append(xp + ps[P_POS + p:P_POS + p + 1, :D_MODEL])
    x = jnp.concatenate(xs, axis=0)                            # (T, D_MODEL)

    # ---- block-diagonal additive mask: same (batch, var) tokens only.
    m = bn_pad - 1                                             # bn_pad is pow2
    t_i = jax.lax.broadcasted_iota(jnp.int32, (T, T), 0)
    t_j = jax.lax.broadcasted_iota(jnp.int32, (T, T), 1)
    bias = jnp.where((t_i & m) == (t_j & m), 0.0, NEG_INF).astype(f32)

    for l in range(E_LAYERS):
        w0 = L_BASE + l * LAYER_ROWS
        pb = P_L0 + l * P_LROWS
        # fused QKV projection for all heads: (T,32)@(32,96-in-128)
        qkv = jnp.dot(x, wslab_ref[w0:w0 + D_MODEL, :],
                      preferred_element_type=f32) + ps[pb:pb + 1, :]   # (T, 128)
        heads = []
        for h in range(N_HEADS):
            qh = qkv[:, h * HEAD_DIM:(h + 1) * HEAD_DIM]
            kh = qkv[:, D_MODEL + h * HEAD_DIM:D_MODEL + (h + 1) * HEAD_DIM]
            vh = qkv[:, 2 * D_MODEL + h * HEAD_DIM:2 * D_MODEL + (h + 1) * HEAD_DIM]
            s = jax.lax.dot_general(qh, kh, (((1,), (1,)), ((), ())),
                                    preferred_element_type=f32) * scale + bias
            s = s - jnp.max(s, axis=-1, keepdims=True)
            p_att = jnp.exp(s)
            p_att = p_att * pl.reciprocal(
                jnp.sum(p_att, axis=-1, keepdims=True), approx=True)
            heads.append(jnp.dot(p_att, vh, preferred_element_type=f32))  # (T, 8)
        o = jnp.concatenate(heads, axis=-1)                    # (T, D_MODEL)
        attn = jnp.dot(o, wslab_ref[w0 + D_MODEL:w0 + 2 * D_MODEL, :],
                       preferred_element_type=f32)[:, :D_MODEL]
        attn = attn + ps[pb + 1:pb + 2, :D_MODEL]
        x = _ln(x + attn, ps[pb + 4:pb + 5, :D_MODEL], ps[pb + 5:pb + 6, :D_MODEL])

        # conv1x1 FFN == per-token dense (channels-last); relu activation
        y = jnp.dot(x, wslab_ref[w0 + 2 * D_MODEL:w0 + 3 * D_MODEL, :],
                    preferred_element_type=f32) + ps[pb + 2:pb + 3, :]   # (T, 128)
        y = jnp.maximum(y, 0.0)[:, :D_FF]                                # (T, 64)
        y = jnp.dot(y, wslab_ref[w0 + 3 * D_MODEL:w0 + 3 * D_MODEL + D_FF, :],
                    preferred_element_type=f32)[:, :D_MODEL]
        y = y + ps[pb + 3:pb + 4, :D_MODEL]
        x = _ln(x + y, ps[pb + 6:pb + 7, :D_MODEL], ps[pb + 7:pb + 8, :D_MODEL])

    # ---- encoder final norm: BatchNorm1d(d_model) eval-mode folded affine
    x = x * ps[P_BN_S:P_BN_S + 1, :D_MODEL] + ps[P_BN_B:P_BN_B + 1, :D_MODEL]

    # ---- FlattenHead: static per-patch row slices (patch-major token layout)
    dec = None
    for p in range(NUM_PATCHES):
        xp = x[p * bn_pad:(p + 1) * bn_pad, :]                 # (bn_pad, 32)
        wh0 = HEAD0 + p * D_MODEL
        t = jnp.dot(xp, wslab_ref[wh0:wh0 + D_MODEL, :],
                    preferred_element_type=f32)                # (bn_pad, 128)
        dec = t if dec is None else dec + t
    # lane-dense (bn_pad, 128) store; lanes >= PRED_LEN stay zero.
    out_ref[...] = dec + ps[P_BHEAD:P_BHEAD + 1, :]


def encoder_head(row_idx, aux, wslab, pslab, bn_pad):
    return pl.pallas_call(
        _encoder_head_kernel,
        out_shape=jax.ShapeDtypeStruct((bn_pad, LANES), jnp.float32),
        in_specs=[_VMEM] * 4,
        out_specs=_VMEM,
    )(row_idx, aux, wslab, pslab)


# ------------------------------ parameters --------------------------------
def positional_embedding(max_len, d_model):
    pos = jnp.arange(max_len, dtype=jnp.float32)[:, None]
    div = jnp.exp(jnp.arange(0, d_model, 2, dtype=jnp.float32)
                  * -(math.log(10000.0) / d_model))
    pe = jnp.zeros((max_len, d_model), jnp.float32)
    pe = pe.at[:, 0::2].set(jnp.sin(pos * div))
    pe = pe.at[:, 1::2].set(jnp.cos(pos * div))
    return pe


def init_params(key):
    n_needed = 2 + 12 * E_LAYERS + 2
    keys = jax.random.split(key, n_needed + 4)
    ki = iter(keys)

    def nrm(shape, scale=0.1):
        return scale * jax.random.normal(next(ki), shape, jnp.float32)

    params = {}
    # retrieval corpus: per-window standardized (as StandardScaler does)
    dw = jax.random.normal(next(ki), (N_WINDOWS, WINDOW_SIZE), jnp.float32)
    dw = (dw - dw.mean(axis=1, keepdims=True)) / dw.std(axis=1, keepdims=True)
    params["data_windows"] = dw

    params["W_emb"] = nrm((PATCH_LEN, D_MODEL))      # Linear(patch_len, d), no bias
    params["pos_emb"] = positional_embedding(64, D_MODEL)

    layers = []
    for _ in range(E_LAYERS):
        layers.append(dict(
            Wq=nrm((D_MODEL, D_MODEL)), bq=nrm((D_MODEL,)),
            Wk=nrm((D_MODEL, D_MODEL)), bk=nrm((D_MODEL,)),
            Wv=nrm((D_MODEL, D_MODEL)), bv=nrm((D_MODEL,)),
            Wo=nrm((D_MODEL, D_MODEL)), bo=nrm((D_MODEL,)),
            W1=nrm((D_MODEL, D_FF)), b1=nrm((D_FF,)),
            W2=nrm((D_FF, D_MODEL)), b2=nrm((D_MODEL,)),
            ln1_w=jnp.ones((D_MODEL,), jnp.float32),
            ln1_b=jnp.zeros((D_MODEL,), jnp.float32),
            ln2_w=jnp.ones((D_MODEL,), jnp.float32),
            ln2_b=jnp.zeros((D_MODEL,), jnp.float32),
        ))
    params["layers"] = layers

    params["bn"] = dict(
        gamma=jnp.ones((D_MODEL,), jnp.float32),
        beta=jnp.zeros((D_MODEL,), jnp.float32),
        rm=jnp.zeros((D_MODEL,), jnp.float32),
        rv=jnp.ones((D_MODEL,), jnp.float32),
    )

    params["W_head"] = nrm((HEAD_NF, PRED_LEN))      # FlattenHead linear
    params["b_head"] = nrm((PRED_LEN,))
    return params


def _pad_lanes(a, lanes=LANES):
    a = jnp.asarray(a, jnp.float32)
    return jnp.pad(a, ((0, 0), (0, lanes - a.shape[1])))


def _row(v):
    return _pad_lanes(jnp.asarray(v, jnp.float32).reshape(1, -1))


def prepare_kernel_params(params):
    """Host-side (once): repack all weights into a few lane-dense slabs so
    each kernel needs only 2-4 input DMAs and no in-kernel reshapes."""
    kp = {}
    dw = params["data_windows"].astype(jnp.float32)              # (64, 36)

    # kernel 1 packed table: corpus^T rows + ||w||^2 row (pad cols -> 1e30)
    wt = _pad_lanes(dw.T)                                        # (36, 128)
    wsq = jnp.concatenate(
        [jnp.sum(dw * dw, axis=1),
         jnp.full((LANES - N_WINDOWS,), 1e30, jnp.float32)]).reshape(1, LANES)
    zpad = jnp.zeros((WTQ_ROWS - WINDOW_SIZE - 1, LANES), jnp.float32)
    kp["wtq"] = jnp.concatenate([wt, wsq, zpad], axis=0)         # (40, 128)

    # kernel 2 big weight slab (corpus w/ replication pad + all matrices)
    dw44 = jnp.concatenate([dw, jnp.tile(dw[:, -1:], (1, PADDING))], axis=1)
    blocks = [_pad_lanes(dw44), _pad_lanes(params["W_emb"])]
    for l in params["layers"]:
        wqkv = jnp.concatenate([l["Wq"], l["Wk"], l["Wv"]], axis=1)   # (32, 96)
        blocks += [_pad_lanes(wqkv), _pad_lanes(l["Wo"]),
                   _pad_lanes(l["W1"]), _pad_lanes(l["W2"])]
    # FlattenHead: nominal row index d*NUM_PATCHES + p; regroup per patch.
    wh = params["W_head"].reshape(D_MODEL, NUM_PATCHES, PRED_LEN)
    for p in range(NUM_PATCHES):
        blocks.append(_pad_lanes(wh[:, p, :]))                   # (32, 12)->(32,128)
    kp["wslab"] = jnp.concatenate(blocks, axis=0)
    assert kp["wslab"].shape == (WSLAB_ROWS, LANES)

    # kernel 2 small-parameter slab: pos, biases, LN params, BN affine, b_head
    rows = [_pad_lanes(params["pos_emb"][:NUM_PATCHES])]
    for l in params["layers"]:
        rows += [_row(jnp.concatenate([l["bq"], l["bk"], l["bv"]])),
                 _row(l["bo"]), _row(l["b1"]), _row(l["b2"]),
                 _row(l["ln1_w"]), _row(l["ln1_b"]),
                 _row(l["ln2_w"]), _row(l["ln2_b"])]
    bn = params["bn"]
    s = bn["gamma"] * jax.lax.rsqrt(bn["rv"] + BN_EPS)
    rows += [_row(s), _row(bn["beta"] - bn["rm"] * s), _row(params["b_head"])]
    pslab = jnp.concatenate(rows, axis=0)
    pad = PSLAB_ROWS - pslab.shape[0]
    if pad:
        pslab = jnp.concatenate(
            [pslab, jnp.zeros((pad, LANES), jnp.float32)], axis=0)
    kp["pslab"] = pslab
    return kp


# ------------------------------ forward pass -------------------------------
def forecast(kp, x_enc):
    B, L, C = x_enc.shape                               # (B, SEQ_LEN, ENC_IN)

    # RevIN instance-norm + retrieval L2 distances (Pallas kernel #1).
    x_flat = x_enc.reshape(B, L * C)                    # (B, 36)
    dists, aux = retrieve_normalize(x_flat, kp["wtq"])

    # faiss GpuIndexFlatL2.search(x, 5): indices of the 5 smallest distances.
    _, idx = jax.lax.top_k(-dists, N_RETRIEVE)          # (B, 5), values < 64

    # Row -> corpus-window index map for the in-kernel gather.  Row layout:
    # bn = b*N_VARS + v; v < 5 -> retrieved window idx[b, v]; v == 5 -> own
    # normalized series (sentinel -1); padded rows -> sentinel -1.
    bn = B * N_VARS
    bn_pad = max(8, pl.next_power_of_2(bn))             # power of 2 (mask trick)
    row_idx = jnp.concatenate(
        [idx.astype(jnp.int32), jnp.full((B, 1), -1, jnp.int32)], axis=1)
    row_idx = row_idx.reshape(bn)
    row_idx = jnp.pad(row_idx, (0, bn_pad - bn), constant_values=-1)[:, None]

    # Fused gather + patch-embed + encoder + BatchNorm + FlattenHead (#2).
    dec_full = encoder_head(row_idx, aux, kp["wslab"], kp["pslab"], bn_pad)

    dec = dec_full[:bn, :PRED_LEN].reshape(B, N_VARS, PRED_LEN)
    dec = jnp.transpose(dec[:, -1:, :], (0, 2, 1))      # keep original variable

    # de-normalize with the mean/std packed by kernel 1
    mu = aux[:B, MU_LANE:MU_LANE + 1]                   # (B, 1)
    sd = aux[:B, SD_LANE:SD_LANE + 1]                   # (B, 1)
    dec = dec * sd[:, None, :] + mu[:, None, :]
    return dec                                          # (B, pred_len, 1)


def model_forward(kp, x_enc, x_mark_enc, x_dec, x_mark_dec, mask=None):
    if TASK in ("long_term_forecast", "short_term_forecast"):
        dec_out = forecast(kp, x_enc)
        return dec_out[:, -PRED_LEN:, :]
    return None


# --------------------------------- main ------------------------------------
if __name__ == "__main__":
    key = jax.random.PRNGKey(0)
    k_par, k_x, k_xd = jax.random.split(key, 3)
    params = init_params(k_par)
    kparams = prepare_kernel_params(params)      # host-side repack, done once

    B = 2
    x_enc = jax.random.normal(k_x, (B, SEQ_LEN, ENC_IN), jnp.float32)
    x_mark_enc = jnp.zeros((B, SEQ_LEN, 4), jnp.float32)   # unused in forecast
    x_dec = jax.random.normal(k_xd, (B, PRED_LEN, ENC_IN), jnp.float32)
    x_mark_dec = jnp.zeros((B, PRED_LEN, 4), jnp.float32)

    out = jax.jit(model_forward)(kparams, x_enc, x_mark_enc, x_dec, x_mark_dec)
    out = jax.block_until_ready(out)
    assert out.shape == (B, PRED_LEN, ENC_IN), out.shape
    assert bool(jnp.all(jnp.isfinite(out)))
    print("KERNEL_OK")
</pallas_src>

<mosaic_0001>
module attributes {stable_mosaic.version = 11 : i64} {
  func.func @_norm_dist_kernel(%arg0: memref<2x36xf32, #tpu.memory_space<vmem>>, %arg1: memref<40x128xf32, #tpu.memory_space<vmem>>, %arg2: memref<2x128xf32, #tpu.memory_space<vmem>>, %arg3: memref<8x128xf32, #tpu.memory_space<vmem>>) attributes {dimension_semantics = [], scalar_prefetch = 0 : i64, scratch_operands = 0 : i64, tpu.core_type = #tpu.core_type<tc>} {
    %c0 = arith.constant 0 : index
    %c0_0 = arith.constant 0 : index
    %0 = vector.load %arg0[%c0, %c0_0] : memref<2x36xf32, #tpu.memory_space<vmem>>, vector<2x36xf32>
    %cst = arith.constant dense<0.000000e+00> : vector<2xf32>
    %1 = vector.multi_reduction <add>, %0, %cst [1] : vector<2x36xf32> to vector<2xf32>
    %2 = vector.shape_cast %1 : vector<2xf32> to vector<2x1xf32>
    %cst_1 = arith.constant 3.600000e+01 : f32
    %3 = vector.broadcast %cst_1 : f32 to vector<2x1xf32>
    %4 = arith.divf %2, %3 : vector<2x1xf32>
    %5 = vector.broadcast %4 : vector<2x1xf32> to vector<2x36xf32>
    %6 = arith.subf %0, %5 : vector<2x36xf32>
    %7 = arith.mulf %6, %6 : vector<2x36xf32>
    %cst_2 = arith.constant dense<0.000000e+00> : vector<2xf32>
    %8 = vector.multi_reduction <add>, %7, %cst_2 [1] : vector<2x36xf32> to vector<2xf32>
    %9 = vector.shape_cast %8 : vector<2xf32> to vector<2x1xf32>
    %cst_3 = arith.constant 3.600000e+01 : f32
    %10 = vector.broadcast %cst_3 : f32 to vector<2x1xf32>
    %11 = arith.divf %9, %10 : vector<2x1xf32>
    %cst_4 = arith.constant 9.99999974E-6 : f32
    %12 = vector.broadcast %cst_4 : f32 to vector<2x1xf32>
    %13 = arith.addf %11, %12 : vector<2x1xf32>
    %14 = math.sqrt %13 : vector<2x1xf32>
    %15 = vector.broadcast %14 : vector<2x1xf32> to vector<2x36xf32>
    %16 = arith.divf %6, %15 : vector<2x36xf32>
    %c0_5 = arith.constant 0 : index
    %c0_6 = arith.constant 0 : index
    %17 = vector.load %arg1[%c0_5, %c0_6] : memref<40x128xf32, #tpu.memory_space<vmem>>, vector<40x128xf32>
    %18 = vector.extract_strided_slice %17 {offsets = [0, 0], sizes = [36, 128], strides = [1, 1]} : vector<40x128xf32> to vector<36x128xf32>
    %19 = vector.extract_strided_slice %17 {offsets = [36, 0], sizes = [1, 128], strides = [1, 1]} : vector<40x128xf32> to vector<1x128xf32>
    %20 = arith.mulf %16, %16 : vector<2x36xf32>
    %cst_7 = arith.constant dense<0.000000e+00> : vector<2xf32>
    %21 = vector.multi_reduction <add>, %20, %cst_7 [1] : vector<2x36xf32> to vector<2xf32>
    %22 = vector.shape_cast %21 : vector<2xf32> to vector<2x1xf32>
    %cst_8 = arith.constant dense<0.000000e+00> : vector<2x128xf32>
    %23 = tpu.matmul %16, %18, %cst_8 {dimension_numbers = #tpu.dot_dimension_numbers<[1], [0], [0], [1], [0, 0, 1, 1], [], []>} : vector<2x36xf32>, vector<36x128xf32>, vector<2x128xf32> -> vector<2x128xf32>
    %cst_9 = arith.constant 2.000000e+00 : f32
    %24 = vector.broadcast %cst_9 : f32 to vector<2x128xf32>
    %25 = arith.mulf %24, %23 : vector<2x128xf32>
    %26 = vector.broadcast %22 : vector<2x1xf32> to vector<2x128xf32>
    %27 = arith.subf %26, %25 : vector<2x128xf32>
    %28 = vector.broadcast %19 : vector<1x128xf32> to vector<2x128xf32>
    %29 = arith.addf %27, %28 : vector<2x128xf32>
    %c0_10 = arith.constant 0 : index
    %c0_11 = arith.constant 0 : index
    %30 = vector.load %arg2[%c0_10, %c0_11] : memref<2x128xf32, #tpu.memory_space<vmem>>, vector<2x128xf32>
    tpu.vector_store %arg2[%c0_10, %c0_11], %29 {strides = array<i32>} : memref<2x128xf32, #tpu.memory_space<vmem>>, vector<2x128xf32>,
    %31 = vector.extract_strided_slice %16 {offsets = [0, 35], sizes = [2, 1], strides = [1, 1]} : vector<2x36xf32> to vector<2x1xf32>
    %32 = vector.shape_cast %31 : vector<2x1xf32> to vector<2x1xf32>
    %33 = vector.broadcast %32 : vector<2x1xf32> to vector<2x8xf32>
    %cst_12 = arith.constant 0.000000e+00 : f32
    %34 = vector.broadcast %cst_12 : f32 to vector<2x82xf32>
    %35 = tpu.concatenate %16, %33, %4, %14, %34 in 1 : vector<2x36xf32>, vector<2x8xf32>, vector<2x1xf32>, vector<2x1xf32>, vector<2x82xf32> -> vector<2x128xf32>
    %cst_13 = arith.constant 0.000000e+00 : f32
    %36 = vector.broadcast %cst_13 : f32 to vector<6x128xf32>
    %37 = tpu.concatenate %35, %36 in 0 : vector<2x128xf32>, vector<6x128xf32> -> vector<8x128xf32>
    %c0_14 = arith.constant 0 : index
    %c0_15 = arith.constant 0 : index
    %38 = vector.load %arg3[%c0_14, %c0_15] : memref<8x128xf32, #tpu.memory_space<vmem>>, vector<8x128xf32>
    tpu.vector_store %arg3[%c0_14, %c0_15], %37 {strides = array<i32>} : memref<8x128xf32, #tpu.memory_space<vmem>>, vector<8x128xf32>,
    return
  }
}

module attributes {stable_mosaic.version = 11 : i64} {
  func.func @_encoder_head_kernel(%arg0: memref<16x1xi32, #tpu.memory_space<vmem>>, %arg1: memref<8x128xf32, #tpu.memory_space<vmem>>, %arg2: memref<528x128xf32, #tpu.memory_space<vmem>>, %arg3: memref<24x128xf32, #tpu.memory_space<vmem>>, %arg4: memref<16x128xf32, #tpu.memory_space<vmem>>) attributes {dimension_semantics = [], scalar_prefetch = 0 : i64, scratch_operands = 0 : i64, tpu.core_type = #tpu.core_type<tc>} {
    %c0 = arith.constant 0 : index
    %c0_0 = arith.constant 0 : index
    %0 = vector.load %arg3[%c0, %c0_0] : memref<24x128xf32, #tpu.memory_space<vmem>>, vector<24x128xf32>
    %c0_1 = arith.constant 0 : index
    %c0_2 = arith.constant 0 : index
    %1 = vector.load %arg0[%c0_1, %c0_2] : memref<16x1xi32, #tpu.memory_space<vmem>>, vector<16x1xi32>
    %2 = tpu.iota {dimensions = array<i32: 1>} : vector<1x64xi32>
    %3 = vector.broadcast %1 : vector<16x1xi32> to vector<16x64xi32>
    %4 = vector.broadcast %2 : vector<1x64xi32> to vector<16x64xi32>
    %5 = arith.cmpi eq, %3, %4 : vector<16x64xi32>
    %6 = arith.extui %5 : vector<16x64xi1> to vector<16x64xi32>
    %7 = arith.sitofp %6 : vector<16x64xi32> to vector<16x64xf32>
    %c0_3 = arith.constant 0 : index
    %c0_4 = arith.constant 0 : index
    %8 = vector.load %arg2[%c0_3, %c0_4] : memref<528x128xf32, #tpu.memory_space<vmem>>, vector<64x128xf32>
    %cst = arith.constant dense<0.000000e+00> : vector<16x128xf32>
    %9 = tpu.matmul %7, %8, %cst {dimension_numbers = #tpu.dot_dimension_numbers<[1], [0], [0], [1], [0, 0, 1, 1], [], []>} : vector<16x64xf32>, vector<64x128xf32>, vector<16x128xf32> -> vector<16x128xf32>
    %10 = tpu.iota {dimensions = array<i32: 0>} : vector<16x1xi32>
    %11 = tpu.iota {dimensions = array<i32: 1>} : vector<1x8xi32>
    %c6_i32 = arith.constant 6 : i32
    %12 = vector.broadcast %c6_i32 : i32 to vector<1x8xi32>
    %13 = arith.muli %11, %12 : vector<1x8xi32>
    %c5_i32 = arith.constant 5 : i32
    %14 = vector.broadcast %c5_i32 : i32 to vector<1x8xi32>
    %15 = arith.addi %13, %14 : vector<1x8xi32>
    %16 = vector.broadcast %10 : vector<16x1xi32> to vector<16x8xi32>
    %17 = vector.broadcast %15 : vector<1x8xi32> to vector<16x8xi32>
    %18 = arith.cmpi eq, %16, %17 : vector<16x8xi32>
    %19 = arith.extui %18 : vector<16x8xi1> to vector<16x8xi32>
    %20 = arith.sitofp %19 : vector<16x8xi32> to vector<16x8xf32>
    %c0_5 = arith.constant 0 : index
    %c0_6 = arith.constant 0 : index
    %21 = vector.load %arg1[%c0_5, %c0_6] : memref<8x128xf32, #tpu.memory_space<vmem>>, vector<8x128xf32>
    %cst_7 = arith.constant dense<0.000000e+00> : vector<16x128xf32>
    %22 = tpu.matmul %20, %21, %cst_7 {dimension_numbers = #tpu.dot_dimension_numbers<[1], [0], [0], [1], [0, 0, 1, 1], [], []>} : vector<16x8xf32>, vector<8x128xf32>, vector<16x128xf32> -> vector<16x128xf32>
    %23 = arith.addf %9, %22 : vector<16x128xf32>
    %c64 = arith.constant 64 : index
    %c0_8 = arith.constant 0 : index
    %24 = vector.load %arg2[%c64, %c0_8] : memref<528x128xf32, #tpu.memory_space<vmem>>, vector<16x128xf32>
    %25 = vector.extract_strided_slice %23 {offsets = [0, 0], sizes = [16, 16], strides = [1, 1]} : vector<16x128xf32> to vector<16x16xf32>
    %cst_9 = arith.constant dense<0.000000e+00> : vector<16x128xf32>
    %26 = tpu.matmul %25, %24, %cst_9 {dimension_numbers = #tpu.dot_dimension_numbers<[1], [0], [0], [1], [0, 0, 1, 1], [], []>} : vector<16x16xf32>, vector<16x128xf32>, vector<16x128xf32> -> vector<16x128xf32>
    %27 = vector.extract_strided_slice %26 {offsets = [0, 0], sizes = [16, 32], strides = [1, 1]} : vector<16x128xf32> to vector<16x32xf32>
    %28 = vector.extract_strided_slice %0 {offsets = [0, 0], sizes = [1, 32], strides = [1, 1]} : vector<24x128xf32> to vector<1x32xf32>
    %29 = vector.broadcast %28 : vector<1x32xf32> to vector<16x32xf32>
    %30 = arith.addf %27, %29 : vector<16x32xf32>
    %31 = vector.extract_strided_slice %23 {offsets = [0, 8], sizes = [16, 16], strides = [1, 1]} : vector<16x128xf32> to vector<16x16xf32>
    %cst_10 = arith.constant dense<0.000000e+00> : vector<16x128xf32>
    %32 = tpu.matmul %31, %24, %cst_10 {dimension_numbers = #tpu.dot_dimension_numbers<[1], [0], [0], [1], [0, 0, 1, 1], [], []>} : vector<16x16xf32>, vector<16x128xf32>, vector<16x128xf32> -> vector<16x128xf32>
    %33 = vector.extract_strided_slice %32 {offsets = [0, 0], sizes = [16, 32], strides = [1, 1]} : vector<16x128xf32> to vector<16x32xf32>
    %34 = vector.extract_strided_slice %0 {offsets = [1, 0], sizes = [1, 32], strides = [1, 1]} : vector<24x128xf32> to vector<1x32xf32>
    %35 = vector.broadcast %34 : vector<1x32xf32> to vector<16x32xf32>
    %36 = arith.addf %33, %35 : vector<16x32xf32>
    %37 = vector.extract_strided_slice %23 {offsets = [0, 16], sizes = [16, 16], strides = [1, 1]} : vector<16x128xf32> to vector<16x16xf32>
    %cst_11 = arith.constant dense<0.000000e+00> : vector<16x128xf32>
    %38 = tpu.matmul %37, %24, %cst_11 {dimension_numbers = #tpu.dot_dimension_numbers<[1], [0], [0], [1], [0, 0, 1, 1], [], []>} : vector<16x16xf32>, vector<16x128xf32>, vector<16x128xf32> -> vector<16x128xf32>
    %39 = vector.extract_strided_slice %38 {offsets = [0, 0], sizes = [16, 32], strides = [1, 1]} : vector<16x128xf32> to vector<16x32xf32>
    %40 = vector.extract_strided_slice %0 {offsets = [2, 0], sizes = [1, 32], strides = [1, 1]} : vector<24x128xf32> to vector<1x32xf32>
    %41 = vector.broadcast %40 : vector<1x32xf32> to vector<16x32xf32>
    %42 = arith.addf %39, %41 : vector<16x32xf32>
    %43 = vector.extract_strided_slice %23 {offsets = [0, 24], sizes = [16, 16], strides = [1, 1]} : vector<16x128xf32> to vector<16x16xf32>
    %cst_12 = arith.constant dense<0.000000e+00> : vector<16x128xf32>
    %44 = tpu.matmul %43, %24, %cst_12 {dimension_numbers = #tpu.dot_dimension_numbers<[1], [0], [0], [1], [0, 0, 1, 1], [], []>} : vector<16x16xf32>, vector<16x128xf32>, vector<16x128xf32> -> vector<16x128xf32>
    %45 = vector.extract_strided_slice %44 {offsets = [0, 0], sizes = [16, 32], strides = [1, 1]} : vector<16x128xf32> to vector<16x32xf32>
    %46 = vector.extract_strided_slice %0 {offsets = [3, 0], sizes = [1, 32], strides = [1, 1]} : vector<24x128xf32> to vector<1x32xf32>
    %47 = vector.broadcast %46 : vector<1x32xf32> to vector<16x32xf32>
    %48 = arith.addf %45, %47 : vector<16x32xf32>
    %49 = tpu.concatenate %30, %36, %42, %48 in 0 : vector<16x32xf32>, vector<16x32xf32>, vector<16x32xf32>, vector<16x32xf32> -> vector<64x32xf32>
    %50 = tpu.iota {dimensions = array<i32: 0>} : vector<64x64xi32>
    %51 = tpu.iota {dimensions = array<i32: 1>} : vector<64x64xi32>
    %c15_i32 = arith.constant 15 : i32
    %52 = vector.broadcast %c15_i32 : i32 to vector<64x64xi32>
    %53 = arith.andi %50, %52 : vector<64x64xi32>
    %c15_i32_13 = arith.constant 15 : i32
    %54 = vector.broadcast %c15_i32_13 : i32 to vector<64x64xi32>
    %55 = arith.andi %51, %54 : vector<64x64xi32>
    %56 = arith.cmpi eq, %53, %55 : vector<64x64xi32>
    %cst_14 = arith.constant 0.000000e+00 : f32
    %cst_15 = arith.constant -1.000000e+30 : f32
    %57 = vector.broadcast %cst_14 : f32 to vector<64x64xf32>
    %58 = vector.broadcast %cst_15 : f32 to vector<64x64xf32>
    %59 = arith.select %56, %57, %58 : vector<64x64xi1>, vector<64x64xf32>
    %c80 = arith.constant 80 : index
    %c0_16 = arith.constant 0 : index
    %60 = vector.load %arg2[%c80, %c0_16] : memref<528x128xf32, #tpu.memory_space<vmem>>, vector<32x128xf32>
    %cst_17 = arith.constant dense<0.000000e+00> : vector<64x128xf32>
    %61 = tpu.matmul %49, %60, %cst_17 {dimension_numbers = #tpu.dot_dimension_numbers<[1], [0], [0], [1], [0, 0, 1, 1], [], []>} : vector<64x32xf32>, vector<32x128xf32>, vector<64x128xf32> -> vector<64x128xf32>
    %62 = vector.extract_strided_slice %0 {offsets = [4, 0], sizes = [1, 128], strides = [1, 1]} : vector<24x128xf32> to vector<1x128xf32>
    %63 = vector.broadcast %62 : vector<1x128xf32> to vector<64x128xf32>
    %64 = arith.addf %61, %63 : vector<64x128xf32>
    %65 = vector.extract_strided_slice %64 {offsets = [0, 0], sizes = [64, 8], strides = [1, 1]} : vector<64x128xf32> to vector<64x8xf32>
    %66 = vector.extract_strided_slice %64 {offsets = [0, 32], sizes = [64, 8], strides = [1, 1]} : vector<64x128xf32> to vector<64x8xf32>
    %67 = vector.extract_strided_slice %64 {offsets = [0, 64], sizes = [64, 8], strides = [1, 1]} : vector<64x128xf32> to vector<64x8xf32>
    %cst_18 = arith.constant dense<0.000000e+00> : vector<64x64xf32>
    %68 = tpu.matmul %65, %66, %cst_18 {dimension_numbers = #tpu.dot_dimension_numbers<[1], [1], [0], [0], [0, 0, 1, 0], [], []>} : vector<64x8xf32>, vector<64x8xf32>, vector<64x64xf32> -> vector<64x64xf32>
    %cst_19 = arith.constant 0.353553385 : f32
    %69 = vector.broadcast %cst_19 : f32 to vector<64x64xf32>
    %70 = arith.mulf %68, %69 : vector<64x64xf32>
    %71 = arith.addf %70, %59 : vector<64x64xf32>
    %cst_20 = arith.constant dense<0xFF800000> : vector<64xf32>
    %72 = vector.multi_reduction <maximumf>, %71, %cst_20 [1] : vector<64x64xf32> to vector<64xf32>
    %73 = vector.shape_cast %72 : vector<64xf32> to vector<64x1xf32>
    %74 = vector.broadcast %73 : vector<64x1xf32> to vector<64x64xf32>
    %75 = arith.subf %71, %74 : vector<64x64xf32>
    %76 = math.exp %75 : vector<64x64xf32>
    %cst_21 = arith.constant dense<0.000000e+00> : vector<64xf32>
    %77 = vector.multi_reduction <add>, %76, %cst_21 [1] : vector<64x64xf32> to vector<64xf32>
    %78 = vector.shape_cast %77 : vector<64xf32> to vector<64x1xf32>
    %79 = tpu.reciprocal %78 {approx = true} : vector<64x1xf32> -> vector<64x1xf32>
    %80 = vector.broadcast %79 : vector<64x1xf32> to vector<64x64xf32>
    %81 = arith.mulf %76, %80 : vector<64x64xf32>
    %cst_22 = arith.constant dense<0.000000e+00> : vector<64x8xf32>
    %82 = tpu.matmul %81, %67, %cst_22 {dimension_numbers = #tpu.dot_dimension_numbers<[1], [0], [0], [1], [0, 0, 1, 1], [], []>} : vector<64x64xf32>, vector<64x8xf32>, vector<64x8xf32> -> vector<64x8xf32>
    %83 = vector.extract_strided_slice %64 {offsets = [0, 8], sizes = [64, 8], strides = [1, 1]} : vector<64x128xf32> to vector<64x8xf32>
    %84 = vector.extract_strided_slice %64 {offsets = [0, 40], sizes = [64, 8], strides = [1, 1]} : vector<64x128xf32> to vector<64x8xf32>
    %85 = vector.extract_strided_slice %64 {offsets = [0, 72], sizes = [64, 8], strides = [1, 1]} : vector<64x128xf32> to vector<64x8xf32>
    %cst_23 = arith.constant dense<0.000000e+00> : vector<64x64xf32>
    %86 = tpu.matmul %83, %84, %cst_23 {dimension_numbers = #tpu.dot_dimension_numbers<[1], [1], [0], [0], [0, 0, 1, 0], [], []>} : vector<64x8xf32>, vector<64x8xf32>, vector<64x64xf32> -> vector<64x64xf32>
    %cst_24 = arith.constant 0.353553385 : f32
    %87 = vector.broadcast %cst_24 : f32 to vector<64x64xf32>
    %88 = arith.mulf %86, %87 : vector<64x64xf32>
    %89 = arith.addf %88, %59 : vector<64x64xf32>
    %cst_25 = arith.constant dense<0xFF800000> : vector<64xf32>
    %90 = vector.multi_reduction <maximumf>, %89, %cst_25 [1] : vector<64x64xf32> to vector<64xf32>
    %91 = vector.shape_cast %90 : vector<64xf32> to vector<64x1xf32>
    %92 = vector.broadcast %91 : vector<64x1xf32> to vector<64x64xf32>
    %93 = arith.subf %89, %92 : vector<64x64xf32>
    %94 = math.exp %93 : vector<64x64xf32>
    %cst_26 = arith.constant dense<0.000000e+00> : vector<64xf32>
    %95 = vector.multi_reduction <add>, %94, %cst_26 [1] : vector<64x64xf32> to vector<64xf32>
    %96 = vector.shape_cast %95 : vector<64xf32> to vector<64x1xf32>
    %97 = tpu.reciprocal %96 {approx = true} : vector<64x1xf32> -> vector<64x1xf32>
    %98 = vector.broadcast %97 : vector<64x1xf32> to vector<64x64xf32>
    %99 = arith.mulf %94, %98 : vector<64x64xf32>
    %cst_27 = arith.constant dense<0.000000e+00> : vector<64x8xf32>
    %100 = tpu.matmul %99, %85, %cst_27 {dimension_numbers = #tpu.dot_dimension_numbers<[1], [0], [0], [1], [0, 0, 1, 1], [], []>} : vector<64x64xf32>, vector<64x8xf32>, vector<64x8xf32> -> vector<64x8xf32>
    %101 = vector.extract_strided_slice %64 {offsets = [0, 16], sizes = [64, 8], strides = [1, 1]} : vector<64x128xf32> to vector<64x8xf32>
    %102 = vector.extract_strided_slice %64 {offsets = [0, 48], sizes = [64, 8], strides = [1, 1]} : vector<64x128xf32> to vector<64x8xf32>
    %103 = vector.extract_strided_slice %64 {offsets = [0, 80], sizes = [64, 8], strides = [1, 1]} : vector<64x128xf32> to vector<64x8xf32>
    %cst_28 = arith.constant dense<0.000000e+00> : vector<64x64xf32>
    %104 = tpu.matmul %101, %102, %cst_28 {dimension_numbers = #tpu.dot_dimension_numbers<[1], [1], [0], [0], [0, 0, 1, 0], [], []>} : vector<64x8xf32>, vector<64x8xf32>, vector<64x64xf32> -> vector<64x64xf32>
    %cst_29 = arith.constant 0.353553385 : f32
    %105 = vector.broadcast %cst_29 : f32 to vector<64x64xf32>
    %106 = arith.mulf %104, %105 : vector<64x64xf32>
    %107 = arith.addf %106, %59 : vector<64x64xf32>
    %cst_30 = arith.constant dense<0xFF800000> : vector<64xf32>
    %108 = vector.multi_reduction <maximumf>, %107, %cst_30 [1] : vector<64x64xf32> to vector<64xf32>
    %109 = vector.shape_cast %108 : vector<64xf32> to vector<64x1xf32>
    %110 = vector.broadcast %109 : vector<64x1xf32> to vector<64x64xf32>
    %111 = arith.subf %107, %110 : vector<64x64xf32>
    %112 = math.exp %111 : vector<64x64xf32>
    %cst_31 = arith.constant dense<0.000000e+00> : vector<64xf32>
    %113 = vector.multi_reduction <add>, %112, %cst_31 [1] : vector<64x64xf32> to vector<64xf32>
    %114 = vector.shape_cast %113 : vector<64xf32> to vector<64x1xf32>
    %115 = tpu.reciprocal %114 {approx = true} : vector<64x1xf32> -> vector<64x1xf32>
    %116 = vector.broadcast %115 : vector<64x1xf32> to vector<64x64xf32>
    %117 = arith.mulf %112, %116 : vector<64x64xf32>
    %cst_32 = arith.constant dense<0.000000e+00> : vector<64x8xf32>
    %118 = tpu.matmul %117, %103, %cst_32 {dimension_numbers = #tpu.dot_dimension_numbers<[1], [0], [0], [1], [0, 0, 1, 1], [], []>} : vector<64x64xf32>, vector<64x8xf32>, vector<64x8xf32> -> vector<64x8xf32>
    %119 = vector.extract_strided_slice %64 {offsets = [0, 24], sizes = [64, 8], strides = [1, 1]} : vector<64x128xf32> to vector<64x8xf32>
    %120 = vector.extract_strided_slice %64 {offsets = [0, 56], sizes = [64, 8], strides = [1, 1]} : vector<64x128xf32> to vector<64x8xf32>
    %121 = vector.extract_strided_slice %64 {offsets = [0, 88], sizes = [64, 8], strides = [1, 1]} : vector<64x128xf32> to vector<64x8xf32>
    %cst_33 = arith.constant dense<0.000000e+00> : vector<64x64xf32>
    %122 = tpu.matmul %119, %120, %cst_33 {dimension_numbers = #tpu.dot_dimension_numbers<[1], [1], [0], [0], [0, 0, 1, 0], [], []>} : vector<64x8xf32>, vector<64x8xf32>, vector<64x64xf32> -> vector<64x64xf32>
    %cst_34 = arith.constant 0.353553385 : f32
    %123 = vector.broadcast %cst_34 : f32 to vector<64x64xf32>
    %124 = arith.mulf %122, %123 : vector<64x64xf32>
    %125 = arith.addf %124, %59 : vector<64x64xf32>
    %cst_35 = arith.constant dense<0xFF800000> : vector<64xf32>
    %126 = vector.multi_reduction <maximumf>, %125, %cst_35 [1] : vector<64x64xf32> to vector<64xf32>
    %127 = vector.shape_cast %126 : vector<64xf32> to vector<64x1xf32>
    %128 = vector.broadcast %127 : vector<64x1xf32> to vector<64x64xf32>
    %129 = arith.subf %125, %128 : vector<64x64xf32>
    %130 = math.exp %129 : vector<64x64xf32>
    %cst_36 = arith.constant dense<0.000000e+00> : vector<64xf32>
    %131 = vector.multi_reduction <add>, %130, %cst_36 [1] : vector<64x64xf32> to vector<64xf32>
    %132 = vector.shape_cast %131 : vector<64xf32> to vector<64x1xf32>
    %133 = tpu.reciprocal %132 {approx = true} : vector<64x1xf32> -> vector<64x1xf32>
    %134 = vector.broadcast %133 : vector<64x1xf32> to vector<64x64xf32>
    %135 = arith.mulf %130, %134 : vector<64x64xf32>
    %cst_37 = arith.constant dense<0.000000e+00> : vector<64x8xf32>
    %136 = tpu.matmul %135, %121, %cst_37 {dimension_numbers = #tpu.dot_dimension_numbers<[1], [0], [0], [1], [0, 0, 1, 1], [], []>} : vector<64x64xf32>, vector<64x8xf32>, vector<64x8xf32> -> vector<64x8xf32>
    %137 = tpu.concatenate %82, %100, %118, %136 in 1 : vector<64x8xf32>, vector<64x8xf32>, vector<64x8xf32>, vector<64x8xf32> -> vector<64x32xf32>
    %c112 = arith.constant 112 : index
    %c0_38 = arith.constant 0 : index
    %138 = vector.load %arg2[%c112, %c0_38] : memref<528x128xf32, #tpu.memory_space<vmem>>, vector<32x128xf32>
    %cst_39 = arith.constant dense<0.000000e+00> : vector<64x128xf32>
    %139 = tpu.matmul %137, %138, %cst_39 {dimension_numbers = #tpu.dot_dimension_numbers<[1], [0], [0], [1], [0, 0, 1, 1], [], []>} : vector<64x32xf32>, vector<32x128xf32>, vector<64x128xf32> -> vector<64x128xf32>
    %140 = vector.extract_strided_slice %139 {offsets = [0, 0], sizes = [64, 32], strides = [1, 1]} : vector<64x128xf32> to vector<64x32xf32>
    %141 = vector.extract_strided_slice %0 {offsets = [5, 0], sizes = [1, 32], strides = [1, 1]} : vector<24x128xf32> to vector<1x32xf32>
    %142 = vector.broadcast %141 : vector<1x32xf32> to vector<64x32xf32>
    %143 = arith.addf %140, %142 : vector<64x32xf32>
    %144 = arith.addf %49, %143 : vector<64x32xf32>
    %145 = vector.extract_strided_slice %0 {offsets = [8, 0], sizes = [1, 32], strides = [1, 1]} : vector<24x128xf32> to vector<1x32xf32>
    %146 = vector.extract_strided_slice %0 {offsets = [9, 0], sizes = [1, 32], strides = [1, 1]} : vector<24x128xf32> to vector<1x32xf32>
    %cst_40 = arith.constant dense<0.000000e+00> : vector<64xf32>
    %147 = vector.multi_reduction <add>, %144, %cst_40 [1] : vector<64x32xf32> to vector<64xf32>
    %148 = vector.shape_cast %147 : vector<64xf32> to vector<64x1xf32>
    %cst_41 = arith.constant 3.200000e+01 : f32
    %149 = vector.broadcast %cst_41 : f32 to vector<64x1xf32>
    %150 = arith.divf %148, %149 : vector<64x1xf32>
    %151 = vector.broadcast %150 : vector<64x1xf32> to vector<64x32xf32>
    %152 = arith.subf %144, %151 : vector<64x32xf32>
    %153 = arith.mulf %152, %152 : vector<64x32xf32>
    %cst_42 = arith.constant dense<0.000000e+00> : vector<64xf32>
    %154 = vector.multi_reduction <add>, %153, %cst_42 [1] : vector<64x32xf32> to vector<64xf32>
    %155 = vector.shape_cast %154 : vector<64xf32> to vector<64x1xf32>
    %cst_43 = arith.constant 3.200000e+01 : f32
    %156 = vector.broadcast %cst_43 : f32 to vector<64x1xf32>
    %157 = arith.divf %155, %156 : vector<64x1xf32>
    %cst_44 = arith.constant 9.99999974E-6 : f32
    %158 = vector.broadcast %cst_44 : f32 to vector<64x1xf32>
    %159 = arith.addf %157, %158 : vector<64x1xf32>
    %160 = math.rsqrt %159 : vector<64x1xf32>
    %161 = vector.broadcast %160 : vector<64x1xf32> to vector<64x32xf32>
    %162 = arith.mulf %152, %161 : vector<64x32xf32>
    %163 = vector.broadcast %145 : vector<1x32xf32> to vector<64x32xf32>
    %164 = arith.mulf %162, %163 : vector<64x32xf32>
    %165 = vector.broadcast %146 : vector<1x32xf32> to vector<64x32xf32>
    %166 = arith.addf %164, %165 : vector<64x32xf32>
    %c144 = arith.constant 144 : index
    %c0_45 = arith.constant 0 : index
    %167 = vector.load %arg2[%c144, %c0_45] : memref<528x128xf32, #tpu.memory_space<vmem>>, vector<32x128xf32>
    %cst_46 = arith.constant dense<0.000000e+00> : vector<64x128xf32>
    %168 = tpu.matmul %166, %167, %cst_46 {dimension_numbers = #tpu.dot_dimension_numbers<[1], [0], [0], [1], [0, 0, 1, 1], [], []>} : vector<64x32xf32>, vector<32x128xf32>, vector<64x128xf32> -> vector<64x128xf32>
    %169 = vector.extract_strided_slice %0 {offsets = [6, 0], sizes = [1, 128], strides = [1, 1]} : vector<24x128xf32> to vector<1x128xf32>
    %170 = vector.broadcast %169 : vector<1x128xf32> to vector<64x128xf32>
    %171 = arith.addf %168, %170 : vector<64x128xf32>
    %cst_47 = arith.constant 0.000000e+00 : f32
    %172 = vector.broadcast %cst_47 : f32 to vector<64x128xf32>
    %173 = arith.maximumf %171, %172 : vector<64x128xf32>
    %174 = vector.extract_strided_slice %173 {offsets = [0, 0], sizes = [64, 64], strides = [1, 1]} : vector<64x128xf32> to vector<64x64xf32>
    %c176 = arith.constant 176 : index
    %c0_48 = arith.constant 0 : index
    %175 = vector.load %arg2[%c176, %c0_48] : memref<528x128xf32, #tpu.memory_space<vmem>>, vector<64x128xf32>
    %cst_49 = arith.constant dense<0.000000e+00> : vector<64x128xf32>
    %176 = tpu.matmul %174, %175, %cst_49 {dimension_numbers = #tpu.dot_dimension_numbers<[1], [0], [0], [1], [0, 0, 1, 1], [], []>} : vector<64x64xf32>, vector<64x128xf32>, vector<64x128xf32> -> vector<64x128xf32>
    %177 = vector.extract_strided_slice %176 {offsets = [0, 0], sizes = [64, 32], strides = [1, 1]} : vector<64x128xf32> to vector<64x32xf32>
    %178 = vector.extract_strided_slice %0 {offsets = [7, 0], sizes = [1, 32], strides = [1, 1]} : vector<24x128xf32> to vector<1x32xf32>
    %179 = vector.broadcast %178 : vector<1x32xf32> to vector<64x32xf32>
    %180 = arith.addf %177, %179 : vector<64x32xf32>
    %181 = arith.addf %166, %180 : vector<64x32xf32>
    %182 = vector.extract_strided_slice %0 {offsets = [10, 0], sizes = [1, 32], strides = [1, 1]} : vector<24x128xf32> to vector<1x32xf32>
    %183 = vector.extract_strided_slice %0 {offsets = [11, 0], sizes = [1, 32], strides = [1, 1]} : vector<24x128xf32> to vector<1x32xf32>
    %cst_50 = arith.constant dense<0.000000e+00> : vector<64xf32>
    %184 = vector.multi_reduction <add>, %181, %cst_50 [1] : vector<64x32xf32> to vector<64xf32>
    %185 = vector.shape_cast %184 : vector<64xf32> to vector<64x1xf32>
    %cst_51 = arith.constant 3.200000e+01 : f32
    %186 = vector.broadcast %cst_51 : f32 to vector<64x1xf32>
    %187 = arith.divf %185, %186 : vector<64x1xf32>
    %188 = vector.broadcast %187 : vector<64x1xf32> to vector<64x32xf32>
    %189 = arith.subf %181, %188 : vector<64x32xf32>
    %190 = arith.mulf %189, %189 : vector<64x32xf32>
    %cst_52 = arith.constant dense<0.000000e+00> : vector<64xf32>
    %191 = vector.multi_reduction <add>, %190, %cst_52 [1] : vector<64x32xf32> to vector<64xf32>
    %192 = vector.shape_cast %191 : vector<64xf32> to vector<64x1xf32>
    %cst_53 = arith.constant 3.200000e+01 : f32
    %193 = vector.broadcast %cst_53 : f32 to vector<64x1xf32>
    %194 = arith.divf %192, %193 : vector<64x1xf32>
    %cst_54 = arith.constant 9.99999974E-6 : f32
    %195 = vector.broadcast %cst_54 : f32 to vector<64x1xf32>
    %196 = arith.addf %194, %195 : vector<64x1xf32>
    %197 = math.rsqrt %196 : vector<64x1xf32>
    %198 = vector.broadcast %197 : vector<64x1xf32> to vector<64x32xf32>
    %199 = arith.mulf %189, %198 : vector<64x32xf32>
    %200 = vector.broadcast %182 : vector<1x32xf32> to vector<64x32xf32>
    %201 = arith.mulf %199, %200 : vector<64x32xf32>
    %202 = vector.broadcast %183 : vector<1x32xf32> to vector<64x32xf32>
    %203 = arith.addf %201, %202 : vector<64x32xf32>
    %c240 = arith.constant 240 : index
    %c0_55 = arith.constant 0 : index
    %204 = vector.load %arg2[%c240, %c0_55] : memref<528x128xf32, #tpu.memory_space<vmem>>, vector<32x128xf32>
    %cst_56 = arith.constant dense<0.000000e+00> : vector<64x128xf32>
    %205 = tpu.matmul %203, %204, %cst_56 {dimension_numbers = #tpu.dot_dimension_numbers<[1], [0], [0], [1], [0, 0, 1, 1], [], []>} : vector<64x32xf32>, vector<32x128xf32>, vector<64x128xf32> -> vector<64x128xf32>
    %206 = vector.extract_strided_slice %0 {offsets = [12, 0], sizes = [1, 128], strides = [1, 1]} : vector<24x128xf32> to vector<1x128xf32>
    %207 = vector.broadcast %206 : vector<1x128xf32> to vector<64x128xf32>
    %208 = arith.addf %205, %207 : vector<64x128xf32>
    %209 = vector.extract_strided_slice %208 {offsets = [0, 0], sizes = [64, 8], strides = [1, 1]} : vector<64x128xf32> to vector<64x8xf32>
    %210 = vector.extract_strided_slice %208 {offsets = [0, 32], sizes = [64, 8], strides = [1, 1]} : vector<64x128xf32> to vector<64x8xf32>
    %211 = vector.extract_strided_slice %208 {offsets = [0, 64], sizes = [64, 8], strides = [1, 1]} : vector<64x128xf32> to vector<64x8xf32>
    %cst_57 = arith.constant dense<0.000000e+00> : vector<64x64xf32>
    %212 = tpu.matmul %209, %210, %cst_57 {dimension_numbers = #tpu.dot_dimension_numbers<[1], [1], [0], [0], [0, 0, 1, 0], [], []>} : vector<64x8xf32>, vector<64x8xf32>, vector<64x64xf32> -> vector<64x64xf32>
    %cst_58 = arith.constant 0.353553385 : f32
    %213 = vector.broadcast %cst_58 : f32 to vector<64x64xf32>
    %214 = arith.mulf %212, %213 : vector<64x64xf32>
    %215 = arith.addf %214, %59 : vector<64x64xf32>
    %cst_59 = arith.constant dense<0xFF800000> : vector<64xf32>
    %216 = vector.multi_reduction <maximumf>, %215, %cst_59 [1] : vector<64x64xf32> to vector<64xf32>
    %217 = vector.shape_cast %216 : vector<64xf32> to vector<64x1xf32>
    %218 = vector.broadcast %217 : vector<64x1xf32> to vector<64x64xf32>
    %219 = arith.subf %215, %218 : vector<64x64xf32>
    %220 = math.exp %219 : vector<64x64xf32>
    %cst_60 = arith.constant dense<0.000000e+00> : vector<64xf32>
    %221 = vector.multi_reduction <add>, %220, %cst_60 [1] : vector<64x64xf32> to vector<64xf32>
    %222 = vector.shape_cast %221 : vector<64xf32> to vector<64x1xf32>
    %223 = tpu.reciprocal %222 {approx = true} : vector<64x1xf32> -> vector<64x1xf32>
    %224 = vector.broadcast %223 : vector<64x1xf32> to vector<64x64xf32>
    %225 = arith.mulf %220, %224 : vector<64x64xf32>
    %cst_61 = arith.constant dense<0.000000e+00> : vector<64x8xf32>
    %226 = tpu.matmul %225, %211, %cst_61 {dimension_numbers = #tpu.dot_dimension_numbers<[1], [0], [0], [1], [0, 0, 1, 1], [], []>} : vector<64x64xf32>, vector<64x8xf32>, vector<64x8xf32> -> vector<64x8xf32>
    %227 = vector.extract_strided_slice %208 {offsets = [0, 8], sizes = [64, 8], strides = [1, 1]} : vector<64x128xf32> to vector<64x8xf32>
    %228 = vector.extract_strided_slice %208 {offsets = [0, 40], sizes = [64, 8], strides = [1, 1]} : vector<64x128xf32> to vector<64x8xf32>
    %229 = vector.extract_strided_slice %208 {offsets = [0, 72], sizes = [64, 8], strides = [1, 1]} : vector<64x128xf32> to vector<64x8xf32>
    %cst_62 = arith.constant dense<0.000000e+00> : vector<64x64xf32>
    %230 = tpu.matmul %227, %228, %cst_62 {dimension_numbers = #tpu.dot_dimension_numbers<[1], [1], [0], [0], [0, 0, 1, 0], [], []>} : vector<64x8xf32>, vector<64x8xf32>, vector<64x64xf32> -> vector<64x64xf32>
    %cst_63 = arith.constant 0.353553385 : f32
    %231 = vector.broadcast %cst_63 : f32 to vector<64x64xf32>
    %232 = arith.mulf %230, %231 : vector<64x64xf32>
    %233 = arith.addf %232, %59 : vector<64x64xf32>
    %cst_64 = arith.constant dense<0xFF800000> : vector<64xf32>
    %234 = vector.multi_reduction <maximumf>, %233, %cst_64 [1] : vector<64x64xf32> to vector<64xf32>
    %235 = vector.shape_cast %234 : vector<64xf32> to vector<64x1xf32>
    %236 = vector.broadcast %235 : vector<64x1xf32> to vector<64x64xf32>
    %237 = arith.subf %233, %236 : vector<64x64xf32>
    %238 = math.exp %237 : vector<64x64xf32>
    %cst_65 = arith.constant dense<0.000000e+00> : vector<64xf32>
    %239 = vector.multi_reduction <add>, %238, %cst_65 [1] : vector<64x64xf32> to vector<64xf32>
    %240 = vector.shape_cast %239 : vector<64xf32> to vector<64x1xf32>
    %241 = tpu.reciprocal %240 {approx = true} : vector<64x1xf32> -> vector<64x1xf32>
    %242 = vector.broadcast %241 : vector<64x1xf32> to vector<64x64xf32>
    %243 = arith.mulf %238, %242 : vector<64x64xf32>
    %cst_66 = arith.constant dense<0.000000e+00> : vector<64x8xf32>
    %244 = tpu.matmul %243, %229, %cst_66 {dimension_numbers = #tpu.dot_dimension_numbers<[1], [0], [0], [1], [0, 0, 1, 1], [], []>} : vector<64x64xf32>, vector<64x8xf32>, vector<64x8xf32> -> vector<64x8xf32>
    %245 = vector.extract_strided_slice %208 {offsets = [0, 16], sizes = [64, 8], strides = [1, 1]} : vector<64x128xf32> to vector<64x8xf32>
    %246 = vector.extract_strided_slice %208 {offsets = [0, 48], sizes = [64, 8], strides = [1, 1]} : vector<64x128xf32> to vector<64x8xf32>
    %247 = vector.extract_strided_slice %208 {offsets = [0, 80], sizes = [64, 8], strides = [1, 1]} : vector<64x128xf32> to vector<64x8xf32>
    %cst_67 = arith.constant dense<0.000000e+00> : vector<64x64xf32>
    %248 = tpu.matmul %245, %246, %cst_67 {dimension_numbers = #tpu.dot_dimension_numbers<[1], [1], [0], [0], [0, 0, 1, 0], [], []>} : vector<64x8xf32>, vector<64x8xf32>, vector<64x64xf32> -> vector<64x64xf32>
    %cst_68 = arith.constant 0.353553385 : f32
    %249 = vector.broadcast %cst_68 : f32 to vector<64x64xf32>
    %250 = arith.mulf %248, %249 : vector<64x64xf32>
    %251 = arith.addf %250, %59 : vector<64x64xf32>
    %cst_69 = arith.constant dense<0xFF800000> : vector<64xf32>
    %252 = vector.multi_reduction <maximumf>, %251, %cst_69 [1] : vector<64x64xf32> to vector<64xf32>
    %253 = vector.shape_cast %252 : vector<64xf32> to vector<64x1xf32>
    %254 = vector.broadcast %253 : vector<64x1xf32> to vector<64x64xf32>
    %255 = arith.subf %251, %254 : vector<64x64xf32>
    %256 = math.exp %255 : vector<64x64xf32>
    %cst_70 = arith.constant dense<0.000000e+00> : vector<64xf32>
    %257 = vector.multi_reduction <add>, %256, %cst_70 [1] : vector<64x64xf32> to vector<64xf32>
    %258 = vector.shape_cast %257 : vector<64xf32> to vector<64x1xf32>
    %259 = tpu.reciprocal %258 {approx = true} : vector<64x1xf32> -> vector<64x1xf32>
    %260 = vector.broadcast %259 : vector<64x1xf32> to vector<64x64xf32>
    %261 = arith.mulf %256, %260 : vector<64x64xf32>
    %cst_71 = arith.constant dense<0.000000e+00> : vector<64x8xf32>
    %262 = tpu.matmul %261, %247, %cst_71 {dimension_numbers = #tpu.dot_dimension_numbers<[1], [0], [0], [1], [0, 0, 1, 1], [], []>} : vector<64x64xf32>, vector<64x8xf32>, vector<64x8xf32> -> vector<64x8xf32>
    %263 = vector.extract_strided_slice %208 {offsets = [0, 24], sizes = [64, 8], strides = [1, 1]} : vector<64x128xf32> to vector<64x8xf32>
    %264 = vector.extract_strided_slice %208 {offsets = [0, 56], sizes = [64, 8], strides = [1, 1]} : vector<64x128xf32> to vector<64x8xf32>
    %265 = vector.extract_strided_slice %208 {offsets = [0, 88], sizes = [64, 8], strides = [1, 1]} : vector<64x128xf32> to vector<64x8xf32>
    %cst_72 = arith.constant dense<0.000000e+00> : vector<64x64xf32>
    %266 = tpu.matmul %263, %264, %cst_72 {dimension_numbers = #tpu.dot_dimension_numbers<[1], [1], [0], [0], [0, 0, 1, 0], [], []>} : vector<64x8xf32>, vector<64x8xf32>, vector<64x64xf32> -> vector<64x64xf32>
    %cst_73 = arith.constant 0.353553385 : f32
    %267 = vector.broadcast %cst_73 : f32 to vector<64x64xf32>
    %268 = arith.mulf %266, %267 : vector<64x64xf32>
    %269 = arith.addf %268, %59 : vector<64x64xf32>
    %cst_74 = arith.constant dense<0xFF800000> : vector<64xf32>
    %270 = vector.multi_reduction <maximumf>, %269, %cst_74 [1] : vector<64x64xf32> to vector<64xf32>
    %271 = vector.shape_cast %270 : vector<64xf32> to vector<64x1xf32>
    %272 = vector.broadcast %271 : vector<64x1xf32> to vector<64x64xf32>
    %273 = arith.subf %269, %272 : vector<64x64xf32>
    %274 = math.exp %273 : vector<64x64xf32>
    %cst_75 = arith.constant dense<0.000000e+00> : vector<64xf32>
    %275 = vector.multi_reduction <add>, %274, %cst_75 [1] : vector<64x64xf32> to vector<64xf32>
    %276 = vector.shape_cast %275 : vector<64xf32> to vector<64x1xf32>
    %277 = tpu.reciprocal %276 {approx = true} : vector<64x1xf32> -> vector<64x1xf32>
    %278 = vector.broadcast %277 : vector<64x1xf32> to vector<64x64xf32>
    %279 = arith.mulf %274, %278 : vector<64x64xf32>
    %cst_76 = arith.constant dense<0.000000e+00> : vector<64x8xf32>
    %280 = tpu.matmul %279, %265, %cst_76 {dimension_numbers = #tpu.dot_dimension_numbers<[1], [0], [0], [1], [0, 0, 1, 1], [], []>} : vector<64x64xf32>, vector<64x8xf32>, vector<64x8xf32> -> vector<64x8xf32>
    %281 = tpu.concatenate %226, %244, %262, %280 in 1 : vector<64x8xf32>, vector<64x8xf32>, vector<64x8xf32>, vector<64x8xf32> -> vector<64x32xf32>
    %c272 = arith.constant 272 : index
    %c0_77 = arith.constant 0 : index
    %282 = vector.load %arg2[%c272, %c0_77] : memref<528x128xf32, #tpu.memory_space<vmem>>, vector<32x128xf32>
    %cst_78 = arith.constant dense<0.000000e+00> : vector<64x128xf32>
    %283 = tpu.matmul %281, %282, %cst_78 {dimension_numbers = #tpu.dot_dimension_numbers<[1], [0], [0], [1], [0, 0, 1, 1], [], []>} : vector<64x32xf32>, vector<32x128xf32>, vector<64x128xf32> -> vector<64x128xf32>
    %284 = vector.extract_strided_slice %283 {offsets = [0, 0], sizes = [64, 32], strides = [1, 1]} : vector<64x128xf32> to vector<64x32xf32>
    %285 = vector.extract_strided_slice %0 {offsets = [13, 0], sizes = [1, 32], strides = [1, 1]} : vector<24x128xf32> to vector<1x32xf32>
    %286 = vector.broadcast %285 : vector<1x32xf32> to vector<64x32xf32>
    %287 = arith.addf %284, %286 : vector<64x32xf32>
    %288 = arith.addf %203, %287 : vector<64x32xf32>
    %289 = vector.extract_strided_slice %0 {offsets = [16, 0], sizes = [1, 32], strides = [1, 1]} : vector<24x128xf32> to vector<1x32xf32>
    %290 = vector.extract_strided_slice %0 {offsets = [17, 0], sizes = [1, 32], strides = [1, 1]} : vector<24x128xf32> to vector<1x32xf32>
    %cst_79 = arith.constant dense<0.000000e+00> : vector<64xf32>
    %291 = vector.multi_reduction <add>, %288, %cst_79 [1] : vector<64x32xf32> to vector<64xf32>
    %292 = vector.shape_cast %291 : vector<64xf32> to vector<64x1xf32>
    %cst_80 = arith.constant 3.200000e+01 : f32
    %293 = vector.broadcast %cst_80 : f32 to vector<64x1xf32>
    %294 = arith.divf %292, %293 : vector<64x1xf32>
    %295 = vector.broadcast %294 : vector<64x1xf32> to vector<64x32xf32>
    %296 = arith.subf %288, %295 : vector<64x32xf32>
    %297 = arith.mulf %296, %296 : vector<64x32xf32>
    %cst_81 = arith.constant dense<0.000000e+00> : vector<64xf32>
    %298 = vector.multi_reduction <add>, %297, %cst_81 [1] : vector<64x32xf32> to vector<64xf32>
    %299 = vector.shape_cast %298 : vector<64xf32> to vector<64x1xf32>
    %cst_82 = arith.constant 3.200000e+01 : f32
    %300 = vector.broadcast %cst_82 : f32 to vector<64x1xf32>
    %301 = arith.divf %299, %300 : vector<64x1xf32>
    %cst_83 = arith.constant 9.99999974E-6 : f32
    %302 = vector.broadcast %cst_83 : f32 to vector<64x1xf32>
    %303 = arith.addf %301, %302 : vector<64x1xf32>
    %304 = math.rsqrt %303 : vector<64x1xf32>
    %305 = vector.broadcast %304 : vector<64x1xf32> to vector<64x32xf32>
    %306 = arith.mulf %296, %305 : vector<64x32xf32>
    %307 = vector.broadcast %289 : vector<1x32xf32> to vector<64x32xf32>
    %308 = arith.mulf %306, %307 : vector<64x32xf32>
    %309 = vector.broadcast %290 : vector<1x32xf32> to vector<64x32xf32>
    %310 = arith.addf %308, %309 : vector<64x32xf32>
    %c304 = arith.constant 304 : index
    %c0_84 = arith.constant 0 : index
    %311 = vector.load %arg2[%c304, %c0_84] : memref<528x128xf32, #tpu.memory_space<vmem>>, vector<32x128xf32>
    %cst_85 = arith.constant dense<0.000000e+00> : vector<64x128xf32>
    %312 = tpu.matmul %310, %311, %cst_85 {dimension_numbers = #tpu.dot_dimension_numbers<[1], [0], [0], [1], [0, 0, 1, 1], [], []>} : vector<64x32xf32>, vector<32x128xf32>, vector<64x128xf32> -> vector<64x128xf32>
    %313 = vector.extract_strided_slice %0 {offsets = [14, 0], sizes = [1, 128], strides = [1, 1]} : vector<24x128xf32> to vector<1x128xf32>
    %314 = vector.broadcast %313 : vector<1x128xf32> to vector<64x128xf32>
    %315 = arith.addf %312, %314 : vector<64x128xf32>
    %cst_86 = arith.constant 0.000000e+00 : f32
    %316 = vector.broadcast %cst_86 : f32 to vector<64x128xf32>
    %317 = arith.maximumf %315, %316 : vector<64x128xf32>
    %318 = vector.extract_strided_slice %317 {offsets = [0, 0], sizes = [64, 64], strides = [1, 1]} : vector<64x128xf32> to vector<64x64xf32>
    %c336 = arith.constant 336 : index
    %c0_87 = arith.constant 0 : index
    %319 = vector.load %arg2[%c336, %c0_87] : memref<528x128xf32, #tpu.memory_space<vmem>>, vector<64x128xf32>
    %cst_88 = arith.constant dense<0.000000e+00> : vector<64x128xf32>
    %320 = tpu.matmul %318, %319, %cst_88 {dimension_numbers = #tpu.dot_dimension_numbers<[1], [0], [0], [1], [0, 0, 1, 1], [], []>} : vector<64x64xf32>, vector<64x128xf32>, vector<64x128xf32> -> vector<64x128xf32>
    %321 = vector.extract_strided_slice %320 {offsets = [0, 0], sizes = [64, 32], strides = [1, 1]} : vector<64x128xf32> to vector<64x32xf32>
    %322 = vector.extract_strided_slice %0 {offsets = [15, 0], sizes = [1, 32], strides = [1, 1]} : vector<24x128xf32> to vector<1x32xf32>
    %323 = vector.broadcast %322 : vector<1x32xf32> to vector<64x32xf32>
    %324 = arith.addf %321, %323 : vector<64x32xf32>
    %325 = arith.addf %310, %324 : vector<64x32xf32>
    %326 = vector.extract_strided_slice %0 {offsets = [18, 0], sizes = [1, 32], strides = [1, 1]} : vector<24x128xf32> to vector<1x32xf32>
    %327 = vector.extract_strided_slice %0 {offsets = [19, 0], sizes = [1, 32], strides = [1, 1]} : vector<24x128xf32> to vector<1x32xf32>
    %cst_89 = arith.constant dense<0.000000e+00> : vector<64xf32>
    %328 = vector.multi_reduction <add>, %325, %cst_89 [1] : vector<64x32xf32> to vector<64xf32>
    %329 = vector.shape_cast %328 : vector<64xf32> to vector<64x1xf32>
    %cst_90 = arith.constant 3.200000e+01 : f32
    %330 = vector.broadcast %cst_90 : f32 to vector<64x1xf32>
    %331 = arith.divf %329, %330 : vector<64x1xf32>
    %332 = vector.broadcast %331 : vector<64x1xf32> to vector<64x32xf32>
    %333 = arith.subf %325, %332 : vector<64x32xf32>
    %334 = arith.mulf %333, %333 : vector<64x32xf32>
    %cst_91 = arith.constant dense<0.000000e+00> : vector<64xf32>
    %335 = vector.multi_reduction <add>, %334, %cst_91 [1] : vector<64x32xf32> to vector<64xf32>
    %336 = vector.shape_cast %335 : vector<64xf32> to vector<64x1xf32>
    %cst_92 = arith.constant 3.200000e+01 : f32
    %337 = vector.broadcast %cst_92 : f32 to vector<64x1xf32>
    %338 = arith.divf %336, %337 : vector<64x1xf32>
    %cst_93 = arith.constant 9.99999974E-6 : f32
    %339 = vector.broadcast %cst_93 : f32 to vector<64x1xf32>
    %340 = arith.addf %338, %339 : vector<64x1xf32>
    %341 = math.rsqrt %340 : vector<64x1xf32>
    %342 = vector.broadcast %341 : vector<64x1xf32> to vector<64x32xf32>
    %343 = arith.mulf %333, %342 : vector<64x32xf32>
    %344 = vector.broadcast %326 : vector<1x32xf32> to vector<64x32xf32>
    %345 = arith.mulf %343, %344 : vector<64x32xf32>
    %346 = vector.broadcast %327 : vector<1x32xf32> to vector<64x32xf32>
    %347 = arith.addf %345, %346 : vector<64x32xf32>
    %348 = vector.extract_strided_slice %0 {offsets = [20, 0], sizes = [1, 32], strides = [1, 1]} : vector<24x128xf32> to vector<1x32xf32>
    %349 = vector.broadcast %348 : vector<1x32xf32> to vector<64x32xf32>
    %350 = arith.mulf %347, %349 : vector<64x32xf32>
    %351 = vector.extract_strided_slice %0 {offsets = [21, 0], sizes = [1, 32], strides = [1, 1]} : vector<24x128xf32> to vector<1x32xf32>
    %352 = vector.broadcast %351 : vector<1x32xf32> to vector<64x32xf32>
    %353 = arith.addf %350, %352 : vector<64x32xf32>
    %354 = vector.extract_strided_slice %353 {offsets = [0, 0], sizes = [16, 32], strides = [1, 1]} : vector<64x32xf32> to vector<16x32xf32>
    %c400 = arith.constant 400 : index
    %c0_94 = arith.constant 0 : index
    %355 = vector.load %arg2[%c400, %c0_94] : memref<528x128xf32, #tpu.memory_space<vmem>>, vector<32x128xf32>
    %cst_95 = arith.constant dense<0.000000e+00> : vector<16x128xf32>
    %356 = tpu.matmul %354, %355, %cst_95 {dimension_numbers = #tpu.dot_dimension_numbers<[1], [0], [0], [1], [0, 0, 1, 1], [], []>} : vector<16x32xf32>, vector<32x128xf32>, vector<16x128xf32> -> vector<16x128xf32>
    %357 = vector.extract_strided_slice %353 {offsets = [16, 0], sizes = [16, 32], strides = [1, 1]} : vector<64x32xf32> to vector<16x32xf32>
    %c432 = arith.constant 432 : index
    %c0_96 = arith.constant 0 : index
    %358 = vector.load %arg2[%c432, %c0_96] : memref<528x128xf32, #tpu.memory_space<vmem>>, vector<32x128xf32>
    %cst_97 = arith.constant dense<0.000000e+00> : vector<16x128xf32>
    %359 = tpu.matmul %357, %358, %cst_97 {dimension_numbers = #tpu.dot_dimension_numbers<[1], [0], [0], [1], [0, 0, 1, 1], [], []>} : vector<16x32xf32>, vector<32x128xf32>, vector<16x128xf32> -> vector<16x128xf32>
    %360 = arith.addf %356, %359 : vector<16x128xf32>
    %361 = vector.extract_strided_slice %353 {offsets = [32, 0], sizes = [16, 32], strides = [1, 1]} : vector<64x32xf32> to vector<16x32xf32>
    %c464 = arith.constant 464 : index
    %c0_98 = arith.constant 0 : index
    %362 = vector.load %arg2[%c464, %c0_98] : memref<528x128xf32, #tpu.memory_space<vmem>>, vector<32x128xf32>
    %cst_99 = arith.constant dense<0.000000e+00> : vector<16x128xf32>
    %363 = tpu.matmul %361, %362, %cst_99 {dimension_numbers = #tpu.dot_dimension_numbers<[1], [0], [0], [1], [0, 0, 1, 1], [], []>} : vector<16x32xf32>, vector<32x128xf32>, vector<16x128xf32> -> vector<16x128xf32>
    %364 = arith.addf %360, %363 : vector<16x128xf32>
    %365 = vector.extract_strided_slice %353 {offsets = [48, 0], sizes = [16, 32], strides = [1, 1]} : vector<64x32xf32> to vector<16x32xf32>
    %c496 = arith.constant 496 : index
    %c0_100 = arith.constant 0 : index
    %366 = vector.load %arg2[%c496, %c0_100] : memref<528x128xf32, #tpu.memory_space<vmem>>, vector<32x128xf32>
    %cst_101 = arith.constant dense<0.000000e+00> : vector<16x128xf32>
    %367 = tpu.matmul %365, %366, %cst_101 {dimension_numbers = #tpu.dot_dimension_numbers<[1], [0], [0], [1], [0, 0, 1, 1], [], []>} : vector<16x32xf32>, vector<32x128xf32>, vector<16x128xf32> -> vector<16x128xf32>
    %368 = arith.addf %364, %367 : vector<16x128xf32>
    %369 = vector.extract_strided_slice %0 {offsets = [22, 0], sizes = [1, 128], strides = [1, 1]} : vector<24x128xf32> to vector<1x128xf32>
    %370 = vector.broadcast %369 : vector<1x128xf32> to vector<16x128xf32>
    %371 = arith.addf %368, %370 : vector<16x128xf32>
    %c0_102 = arith.constant 0 : index
    %c0_103 = arith.constant 0 : index
    %372 = vector.load %arg4[%c0_102, %c0_103] : memref<16x128xf32, #tpu.memory_space<vmem>>, vector<16x128xf32>
    tpu.vector_store %arg4[%c0_102, %c0_103], %371 {strides = array<i32>} : memref<16x128xf32, #tpu.memory_space<vmem>>, vector<16x128xf32>,
    return
  }
}

</mosaic_0001>

<bundles_post_ra>
// kernel: neg.1
= control target key start
LH: loop header
LB: loop body
LE: loop exit
PB: predicated region body
PF: predicated region fallthrough
CT: control target
= control target key end

     0   :  { %s24_s0 = inlined_call_operand.vmem [shape: f32[2,128], index: 0, kind: input, shape index: {}]   ;;  %s25_s1 = inlined_call_operand.vmem [shape: f32[2,128], index: 1, kind: output, shape index: {}]  }
   0x1   :  { %v2_v0 = vld [vmem:[%s24_s0] sm:$0x3] }
   0x2   :  { %v5_v1 = vxor.u32 2147483648, %v2_v0 }
   0x4   :  { %7 = vst [vmem:[%s25_s1] sm:$0x3] %v5_v1 }

// kernel: model_forward.2
= control target key start
LH: loop header
LB: loop body
LE: loop exit
PB: predicated region body
PF: predicated region fallthrough
CT: control target
= control target key end

     0   :  { %9 = vsyncpa [#allocation3], 0  ;;  %s232_s12 = smov [#allocation2]   ;;  %s283_s0 = inlined_call_operand.vmem [shape: f32[2,36], index: 0, kind: input, shape index: {}]   ;;  %s284_s1 = inlined_call_operand.hbm [shape: f32[40,128], index: 1, kind: input, shape index: {}]   ;;  %s285_s2 = inlined_call_operand.vmem [shape: f32[2,128], index: 2, kind: output, shape index: {0}]   ;;  %s286_s3 = inlined_call_operand.vmem [shape: f32[8,128], index: 3, kind: output, shape index: {1}]  }
   0x1   :  { %s17_s13 = sshll.u32 %s232_s12, 4  ;;  %s208_s16 = scalar_lea.hbm %s284_s1, 640  ;;  %s18_s13 = int_to_ptr.vmem [resolvable:$true] %s17_s13 }
   0x2   :  { %p209_p0 = scmp.ne.s32.totalorder %s284_s1, %s208_s16  ;;  %p212_p1 = scmp.lt.u32.totalorder %s208_s16, %s284_s1 }
   0x4   :  { %p214_p2 = pnand %p212_p1, %p209_p0 }
   0x6   :  { %217 = shalt.err (!%p214_p2)
}
   0x7   :  { %s218_s21 = scalar_lea.vmem %s18_s13, 640  ;;  %p223_p4 = scmp.lt.s32.totalorder %s18_s13, %s18_s13 }
   0x8   :  { %p219_p3 = scmp.ne.s32.totalorder %s18_s13, %s218_s21  ;;  %p224_p5 = scmp.lt.s32.totalorder %s218_s21, %s218_s21 }
   0xa   :  { %p225_p6 = por %p224_p5, %p223_p4 }
   0xc   :  { %p226_p7 = pnand %p225_p6, %p219_p3 }
   0xe   :  { %229 = shalt.err (!%p226_p7)
}
   0xf   :  { %s233_s22 = smov 128   ;;  %s234_s23 = smov 8  }
  0x10   :  { %23 = dma.hbm_to_vmem [thread:$0]  %s284_s1, 640, %s18_s13, [#allocation3], %s233_s22, %s233_s22, %s234_s23  }
  0x11   :  { %230 = dma.done.wait [#allocation3], 640  }
  0x12   :  { %231 = vsyncadd [#allocation3], 4294966656  ;;  %vm28_vm0 = vcmask 287744   ;;  %v27_v0 = vld [vmem:[%s283_s0] sm:$0x3]  ;;  %v51_v8 = vld [vmem:[#allocation2 + $0x8] sm:$0xff]  ;;  %v139_v36 = vlaneseq }
  0x13   :  { %v29_v1 = vsel %vm28_vm0, %v27_v0, 0.0  ;;  %v50_v7 = vld [vmem:[#allocation2] sm:$0xff]  ;;  %v52_v9 = vld [vmem:[#allocation2 + $0x10] sm:$0xff]  ;;  %v235_v10 = vmov 0.0|0.0   ;;  %v53_v12 = vld [vmem:[#allocation2 + $0x18] sm:$0xff]  ;;  %vm236_vm1 = vmmov 0  }
  0x14   :  { %30 = vadd.xlane.f32.xlu0 %v29_v1  ;;  %189 = vmatprep.subr.bf16.mxu0 %v235_v10  ;;  %v190_v11 = vpack.c.bf16 %v51_v8, %v50_v7  ;;  %v237_v13 = vmov 0.0   ;;  %v193_v14 = vpack.c.bf16 %v53_v12, %v52_v9  ;;  %v54_v15 = vld [vmem:[#allocation2 + $0x20] sm:$0xff]  ;;  %vm63_vm2 = vcmask 1043456  }
  0x15   :  { %186 = vmatprep.mubr.msk.f32.mxu0 %vm236_vm1, %v237_v13  ;;  %v238_v16 = vmov 35   ;;  %vm59_vm5 = vcmask 293888   ;;  %vm150_vm6 = vcmask 359424   ;;  %vm152_vm7 = vcmask 367616  }
  0x16   :  { %191 = vmatpush3.bf16.msra.mxu0 %v190_v11  ;;  %202 = vset.pattern.permute.xlu1 %v238_v16  ;;  %vm154_vm8 = vcmask 375808   ;;  %vm156_vm9 = vcmask 1041408   ;;  %v140_v37 = vshrl.u32 %v139_v36, 7 }
  0x17   :  { %192 = vmatprep.subr.bf16.mxu0 %v235_v10  ;;  %203 = vset.pattern.permute.xlu0 %v238_v16 }
  0x18   :  { %v141_v38 = vsub.s32 4, %v140_v37 }
  0x1a   :  { %194 = vmatpush3.bf16.msra.mxu0 %v193_v14  ;;  %v142_v40 = vrot.slane %v54_v15, %v141_v38 }
  0x1b   :  { %184 = vmatprep.subr.mxu0 %v237_v13 }
  0x1e   :  { %185 = vmatpush3.msk.msra.mxu0 %vm63_vm2, %v54_v15 }
  0xa1   :  { %v31_v2 = vpop.xlane.xlu0 %30 }
  0xa2   :  { %v33_v3 = vmul.f32 0.027777778, %v31_v2 }
  0xa4   :  { %v34_v4 = vsub.f32 %v27_v0, %v33_v3 }
  0xa6   :  { %v35_v5 = vmul.f32 %v34_v4, %v34_v4 }
  0xa8   :  { %v36_v6 = vsel %vm28_vm0, %v35_v5, 0.0 }
  0xa9   :  { %37 = vadd.xlane.f32.xlu0 %v36_v6 }
 0x136   :  { %v38_v17 = vpop.xlane.xlu0 %37 }
 0x137   :  { %v39_v18 = vmul.f32 0.027777778, %v38_v17 }
 0x139   :  { %v40_v19 = vadd.f32 1e-05, %v39_v18 }
 0x13b   :  { %204 = vrsqrt.f32 %v40_v19  ;;  %vm43_vm3 = vcmp.eq.f32.partialorder %v40_v19, inf  ;;  %v46_v22 = vand.u32 2147483648, %v40_v19  ;;  %vm45_vm4 = vcmp.eq.f32.partialorder %v40_v19, 0.0 }
 0x145   :  { %v205_v20 = vpop.eup %204 }
 0x146   :  { %v42_v21 = vmul.f32 %v205_v20, %v40_v19 }
 0x148   :  { %v44_v23 = vsel %vm43_vm3, %v40_v19, %v42_v21 }
 0x149   :  { %v47_v24 = vsel %vm45_vm4, %v46_v22, %v44_v23 }
 0x14a   :  { %206 = vrcp.f32 %v47_v24 }
 0x154   :  { %v207_v25 = vpop.eup %206 }
 0x155   :  { %v49_v26 = vmul.f32 %v207_v25, %v34_v4 }
 0x157   :  { %187 = vmatmul.mubr.msk.f32.vlgmr.msra.gmra.mrb[0].mxu0 %vm59_vm5, %v49_v26  ;;  %v55_v27 = vmul.f32 %v49_v26, %v49_v26 }
 0x159   :  { %v56_v28 = vsel %vm28_vm0, %v55_v27, 0.0 }
 0x15a   :  { %57 = vadd.xlane.f32.xlu1 %v56_v28 }
 0x16b   :  { %146 = vperm.xlu1 %202, %v49_v26  }
 0x1e7   :  { %v58_v29 = vpop.xlane.xlu1 %57 }
 0x1eb   :  { %v147_v30 = vpop.permute.xlu1 %146 }
 0x1ec   :  { %v149_v31 = vsel %vm59_vm5, %v49_v26, %v147_v30 }
 0x1ed   :  { %v151_v32 = vsel %vm150_vm6, %v149_v31, %v33_v3 }
 0x1ee   :  { %v153_v33 = vsel %vm152_vm7, %v151_v32, %v47_v24 }
 0x1ef   :  { %v155_v34 = vsel %vm154_vm8, %v153_v33, 0.0 }
 0x1f0   :  { %v157_v35 = vsel %vm156_vm9, %v155_v34, 0.0 }
 0x1f1   :  { %158 = vst [vmem:[%s286_s3] sm:$0xff] %v157_v35 }
 0x22a   :  { %v133_v39 = vpop.f32.mrb[0].mxu0 }
 0x22b   :  { %v137_v41 = vmul.f32 2.0, %v133_v39  ;;  %v188_v42 = vpop.f32.mrb[1].mxu0 }
 0x22d   :  { %v138_v43 = vsub.f32 %v58_v29, %v137_v41 }
 0x22f   :  { %v143_v44 = vadd.f32 %v142_v40, %v138_v43 }
 0x231   :  { %144 = vst [vmem:[%s285_s2] sm:$0x3] %v143_v44 }
 0x232   :  { %167 = vsyncpa [#allocation3], 1 }

// kernel: model_forward.3
= control target key start
LH: loop header
LB: loop body
LE: loop exit
PB: predicated region body
PF: predicated region fallthrough
CT: control target
= control target key end

     0   :  { %9 = vsyncpa [#allocation3], 0  ;;  %s8905_s15 = smov [#allocation2]   ;;  %s10896_s0 = inlined_call_operand.vmem [shape: s32[16,1], index: 0, kind: input, shape index: {}]   ;;  %s10897_s1 = inlined_call_operand.vmem [shape: f32[8,128], index: 1, kind: input, shape index: {}]   ;;  %s10898_s2 = inlined_call_operand.hbm [shape: f32[528,128], index: 2, kind: input, shape index: {}]   ;;  %s10899_s3 = inlined_call_operand.vmem [shape: f32[24,128], index: 3, kind: input, shape index: {}]   ;;  %s10900_s4 = inlined_call_operand.vmem [shape: f32[16,128], index: 4, kind: output, shape index: {}]  }
   0x1   :  { %s19_s16 = sshll.u32 %s8905_s15, 4  ;;  %s8881_s19 = scalar_lea.hbm %s10898_s2, 8448  ;;  %s20_s16 = int_to_ptr.vmem [resolvable:$true] %s19_s16 }
   0x2   :  { %p8882_p0 = scmp.ne.s32.totalorder %s10898_s2, %s8881_s19  ;;  %p8885_p1 = scmp.lt.u32.totalorder %s8881_s19, %s10898_s2 }
   0x4   :  { %p8887_p2 = pnand %p8885_p1, %p8882_p0 }
   0x6   :  { %8890 = shalt.err (!%p8887_p2)
}
   0x7   :  { %s8891_s24 = scalar_lea.vmem %s20_s16, 8448  ;;  %p8896_p4 = scmp.lt.s32.totalorder %s20_s16, %s20_s16 }
   0x8   :  { %p8892_p3 = scmp.ne.s32.totalorder %s20_s16, %s8891_s24  ;;  %p8897_p5 = scmp.lt.s32.totalorder %s8891_s24, %s8891_s24 }
   0xa   :  { %p8898_p6 = por %p8897_p5, %p8896_p4 }
   0xc   :  { %p8899_p7 = pnand %p8898_p6, %p8892_p3 }
   0xe   :  { %8902 = shalt.err (!%p8899_p7)
}
   0xf   :  { %s8906_s25 = smov 128   ;;  %s8907_s26 = smov 8  }
  0x10   :  { %25 = dma.hbm_to_vmem [thread:$0]  %s10898_s2, 8448, %s20_s16, [#allocation3], %s8906_s25, %s8906_s25, %s8907_s26  }
  0x11   :  { %8903 = dma.done.wait [#allocation3], 8448  }
  0x12   :  { %8904 = vsyncadd [#allocation3], 4294958848  ;;  %v36_v0 = vlaneseq  ;;  %v8908_v1 = vmov 0   ;;  %v34_v7 = vld [vmem:[%s10896_s0] sm:$0xff]  ;;  %vm70_vm0 = vcmask 64512   ;;  %v51_v10 = vld [vmem:[#allocation2 + $0x8] sm:$0xff] }
  0x13   :  { %8238 = vset.pattern.permute.xlu0 %v8908_v1  ;;  %v69_v8 = vld [vmem:[%s10897_s1] sm:$0xff]  ;;  %v52_v11 = vld [vmem:[#allocation2 + $0x10] sm:$0xff]  ;;  %v35_v12 = vld [vmem:[%s10896_s0 + $0x8] sm:$0xff]  ;;  %v8909_v13 = vmov 0.0   ;;  %vm152_vm3 = vcmask 523264   ;;  %vm236_vm6 = vcmask 130048  }
  0x14   :  { %v8962_v2 = vand.u32 127, %v36_v0  ;;  %v8964_v3 = vshrl.u32 %v36_v0, 7  ;;  %39 = vperm.xlu0 %8238, %v34_v7   ;;  %7027 = vmatprep.subr.mxu0 %v69_v8  ;;  %v50_v9 = vld [vmem:[#allocation2] sm:$0xff]  ;;  %v53_v17 = vld [vmem:[#allocation2 + $0x18] sm:$0xff]  ;;  %v55_v20 = vld [vmem:[#allocation2 + $0x28] sm:$0xff]  ;;  %s8910_s0 = smov 112  }
  0x15   :  { %7028 = vmatpush3.msra.mxu0 %v69_v8  ;;  %v7747_v15 = vpack.c.bf16 %v51_v10, %v50_v9  ;;  %v7751_v18 = vpack.c.bf16 %v53_v17, %v52_v11  ;;  %v54_v19 = vld [vmem:[#allocation2 + $0x20] sm:$0xff]  ;;  %v56_v22 = vld [vmem:[#allocation2 + $0x30] sm:$0xff]  ;;  %v57_v23 = vld [vmem:[#allocation2 + $0x38] sm:$0xff]  ;;  %s8911_s1 = smov 120   ;;  %s8912_s8 = smov 104   ;;  %vm630_vm7 = vcmask 261120  }
  0x16   :  { %10927 = vst [vmem:[#allocation5_spill] sm:$0xff] %v8964_v3  ;;  %v61_v4 = vmul.u32 6, %v8962_v2  ;;  %v8968_v5 = vadd.s32 8, %v8964_v3  ;;  %v7755_v21 = vpack.c.bf16 %v55_v20, %v54_v19  ;;  %v234_v24 = vld [vmem:[#allocation2 + $0x40] sm:$0xff]  ;;  %v235_v25 = vld [vmem:[#allocation2 + $0x48] sm:$0xff]  ;;  %v7759_v27 = vpack.c.bf16 %v57_v23, %v56_v22  ;;  %v622_v34 = vld [vmem:[#allocation2 + $0x50] sm:$0xff] }
  0x17   :  { %7748 = vmatprep.subr.bf16.mxu0 %v7747_v15  ;;  %v7763_v26 = vpack.c.bf16 %v235_v25, %v234_v24  ;;  %v623_v35 = vld [vmem:[#allocation2 + $0x58] sm:$0xff]  ;;  %v624_v37 = vld [vmem:[#allocation2 + $0x60] sm:$0xff]  ;;  %v625_v38 = vld [vmem:[#allocation2 + $0x68] sm:$0xff]  ;;  %v9002_v46 = vsub.s32 0, %v8964_v3  ;;  %v9017_v53 = vsub.s32 1, %v8964_v3  ;;  %v9021_v55 = vsub.s32 2, %v8964_v3 }
  0x18   :  { %v62_v6 = vadd.s32 5, %v61_v4  ;;  %42 = vperm.xlu0 %8238, %v35_v12   ;;  %v7779_v36 = vpack.c.bf16 %v623_v35, %v622_v34  ;;  %v7783_v39 = vpack.c.bf16 %v625_v38, %v624_v37  ;;  %v31_v47 = vld [vmem:[%s10899_s3] sm:$0xff]  ;;  %v9027_v60 = vsub.s32 3, %v8964_v3  ;;  %s8913_s11 = smov 96   ;;  %vm9080_vm8 = vmpackc.low %vm70_vm0, %vm70_vm0  ;;  %s8915_s12 = smov 64  }
  0x19   :  { %7764 = vmatprep.subr.bf16.mxu1 %v7763_v26  ;;  %10928 = vst [vmem:[#allocation6_spill] sm:$0xff] %v9002_v46  ;;  %v321_v48 = vrot.slane %v31_v47, %v9002_v46  ;;  %10929 = vst [vmem:[#allocation7_spill] sm:$0xff] %v9017_v53  ;;  %v410_v54 = vrot.slane %v31_v47, %v9017_v53  ;;  %v499_v59 = vrot.slane %v31_v47, %v9021_v55  ;;  %s8916_s13 = smov 88   ;;  %s8917_s14 = smov 56  }
  0x1a   :  { %vm63_vm1 = vcmp.eq.s32.totalorder %v8964_v3, %v62_v6  ;;  %vm64_vm2 = vcmp.eq.s32.totalorder %v8968_v5, %v62_v6  ;;  %7766 = vmatpush3.bf16.msra.mxu1 %v7763_v26  ;;  %10930 = vst [vmem:[#allocation8_spill] sm:$0xff] %v9021_v55  ;;  %10932 = vst [vmem:[#allocation10_spill] sm:$0xff] %v9027_v60  ;;  %v588_v1 = vrot.slane %v31_v47, %v9027_v60  ;;  %s8918_s15 = smov 80   ;;  %s8919_s16 = smov 48  }
  0x1b   :  { %v6336_v14 = vsel %vm63_vm1, 1.0, %v8909_v13  ;;  %v6337_v16 = vsel %vm64_vm2, 1.0, %v8909_v13  ;;  %7768 = vmatprep.subr.bf16.mxu1 %v7763_v26  ;;  %v9053_v10 = vsub.s32 4, %v8964_v3  ;;  %s8920_s17 = smov 72   ;;  %s8921_s18 = smov 40   ;;  %vm2568_vm2 = vcmask 195584  }
  0x1c   :  { %7029 = vmatprep.mubr.msk.f32.mxu0 %vm70_vm0, %v6336_v14  ;;  %s8922_s19 = smov 16   ;;  %s8923_s20 = smov 24  }
  0x1d   :  { %7030 = vmatmul.mubr.msk.f32.vlgmr.msra.gmra.mrb[0].mxu0 %vm70_vm0, %v6337_v16  ;;  %10938 = vst [vmem:[#allocation16_spill] sm:$0xff] %v9053_v10  ;;  %v629_v11 = vrot.slane %v31_v47, %v9053_v10 }
  0x1e   :  { %7750 = vmatpush3.bf16.msra.mxu0 %v7747_v15 }
  0x1f   :  { %7752 = vmatprep.subr.bf16.mxu0 %v7751_v18 }
  0x22   :  { %7754 = vmatpush3.bf16.msra.mxu0 %v7751_v18 }
  0x23   :  { %7756 = vmatprep.subr.bf16.mxu0 %v7755_v21 }
  0x26   :  { %7758 = vmatpush3.bf16.msra.mxu0 %v7755_v21 }
  0x27   :  { %7760 = vmatprep.subr.bf16.mxu0 %v7759_v27 }
  0x2a   :  { %7762 = vmatpush3.bf16.msra.mxu0 %v7759_v27 }
  0x2b   :  { %7780 = vmatprep.subr.bf16.mxu0 %v7779_v36 }
  0x93   :  { %v40_v28 = vpop.permute.xlu0 %39 }
  0x94   :  { %vm44_vm4 = vcmp.eq.s32.totalorder %v40_v28, %v8962_v2 }
  0x95   :  { %v6334_v29 = vsel %vm44_vm4, 1.0, %v8909_v13 }
  0x96   :  { %7048 = vmatprep.mubr.msk.f32.mxu0 %vm152_vm3, %v6334_v29 }
  0x97   :  { %v43_v30 = vpop.permute.xlu0 %42 }
  0x98   :  { %vm45_vm5 = vcmp.eq.s32.totalorder %v43_v30, %v8962_v2 }
  0x99   :  { %v6335_v31 = vsel %vm45_vm5, 1.0, %v8909_v13 }
  0x9a   :  { %7049 = vmatmul.mubr.msk.f32.vlgmr.msra.gmra.mrb[0].mxu0 %vm152_vm3, %v6335_v31 }
  0x9b   :  { %7782 = vmatpush3.bf16.msra.mxu0 %v7779_v36 }
  0x9c   :  { %7784 = vmatprep.subr.bf16.mxu0 %v7783_v39 }
  0x9f   :  { %7786 = vmatpush3.bf16.msra.mxu0 %v7783_v39 }
 0x16d   :  { %v7050_v32 = vpop.f32.mrb[0].mxu0 }
 0x16e   :  { %v225_v33 = vpop.f32.mrb[1].mxu0 }
 0x16f   :  { %413 = vrot.lane.b32.xlu0 %v225_v33, %s8910_s0  ;;  %324 = vrot.lane.b32.xlu1 %v225_v33, %s8911_s1 }
 0x170   :  { %7055 = vmatprep.mubr.msk.f32.mxu1 %vm236_vm6, %v225_v33 }
 0x171   :  { %7056 = vmatmul.mubr.msk.f32.vlgmr.msra.gmra.mrb[0].mxu1 %vm236_vm6, %v7050_v32 }
 0x172   :  { %7770 = vmatpush3.bf16.msra.mxu1 %v7763_v26 }
 0x173   :  { %502 = vrot.lane.b32.xlu0 %v225_v33, %s8912_s8  ;;  %326 = vrot.lane.b32.xlu1 %v7050_v32, %s8911_s1 }
 0x174   :  { %7772 = vmatprep.subr.bf16.mxu1 %v7763_v26 }
 0x177   :  { %415 = vrot.lane.b32.xlu1 %v7050_v32, %s8910_s0 }
 0x17b   :  { %504 = vrot.lane.b32.xlu1 %v7050_v32, %s8912_s8 }
 0x1e1   :  { %v325_v40 = vpop.permute.xlu1 %324  ;;  %v414_v41 = vpop.permute.xlu0 %413 }
 0x1e2   :  { %7062 = vmatprep.mubr.msk.f32.mxu1 %vm236_vm6, %v325_v40 }
 0x1e5   :  { %v327_v42 = vpop.permute.xlu1 %326  ;;  %v503_v44 = vpop.permute.xlu0 %502 }
 0x1e6   :  { %7063 = vmatmul.mubr.msk.f32.vlgmr.msra.gmra.mrb[2].mxu1 %vm236_vm6, %v327_v42 }
 0x1e7   :  { %7774 = vmatpush3.bf16.msra.mxu1 %v7763_v26  ;;  %7069 = vmatprep.mubr.msk.f32.mxu1 %vm236_vm6, %v414_v41 }
 0x1e8   :  { %7776 = vmatprep.subr.bf16.mxu1 %v7763_v26 }
 0x1e9   :  { %v416_v43 = vpop.permute.xlu1 %415 }
 0x1ea   :  { %7070 = vmatmul.mubr.msk.f32.vlgmr.msra.gmra.mrb[4].mxu1 %vm236_vm6, %v416_v43 }
 0x1eb   :  { %7778 = vmatpush3.bf16.msra.mxu1 %v7763_v26  ;;  %7076 = vmatprep.mubr.msk.f32.mxu1 %vm236_vm6, %v503_v44 }
 0x1ed   :  { %v505_v45 = vpop.permute.xlu1 %504 }
 0x1ee   :  { %7077 = vmatmul.mubr.msk.f32.vlgmr.msra.gmra.mrb[6].mxu1 %vm236_vm6, %v505_v45 }
 0x244   :  { %v7057_v49 = vpop.f32.mrb[0].mxu1 }
 0x245   :  { %v309_v50 = vpop.f32.mrb[1].mxu1  ;;  %v9010_v52 = vadd.f32 %v7057_v49, %v321_v48 }
 0x246   :  { %v9008_v51 = vadd.f32 %v321_v48, %v309_v50  ;;  %v592_v50 = vadd.s32 24, %v8964_v3 }
 0x248   :  { %7087 = vmatprep.mubr.msk.f32.mxu0 %vm630_vm7, %v9008_v51 }
 0x249   :  { %7088 = vmatmul.mubr.msk.f32.vlgmr.msra.gmra.mrb[2].mxu0 %vm630_vm7, %v9010_v52 }
 0x2b9   :  { %v7064_v56 = vpop.f32.mrb[2].mxu1 }
 0x2ba   :  { %v398_v57 = vpop.f32.mrb[3].mxu1  ;;  %v9029_v61 = vadd.f32 %v7064_v56, %v410_v54  ;;  %v598_v56 = vand.u32 15, %v8968_v5 }
 0x2bb   :  { %v9023_v58 = vadd.f32 %v410_v54, %v398_v57  ;;  %v9136_v54 = vand.u32 15, %v8962_v2  ;;  %v597_v57 = vand.u32 15, %v8964_v3 }
 0x2bc   :  { %10933 = vst [vmem:[#allocation11_spill] sm:$0xff] %v9029_v61 }
 0x2bd   :  { %10931 = vst [vmem:[#allocation9_spill] sm:$0xff] %v9023_v58  ;;  %v7071_v62 = vpop.f32.mrb[4].mxu1  ;;  %7090 = vmatprep.mubr.msk.f32.mxu0 %vm630_vm7, %v9023_v58  ;;  %vm607_vm9 = vcmp.eq.s32.totalorder %v598_v56, %v9136_v54  ;;  %vm606_vm10 = vcmp.eq.s32.totalorder %v597_v57, %v9136_v54 }
 0x2be   :  { %v487_v63 = vpop.f32.mrb[5].mxu1  ;;  %7091 = vmatmul.mubr.msk.f32.gmra.mrb[4].mxu0 %vm630_vm7, %v9029_v61  ;;  %v9038_v4 = vadd.f32 %v7071_v62, %v499_v59  ;;  %v591_v62 = vadd.s32 16, %v8964_v3 }
 0x2bf   :  { %v9035_v0 = vadd.f32 %v499_v59, %v487_v63  ;;  %v600_v59 = vand.u32 15, %v592_v50  ;;  %v8914_v63 = vmov -1e+30  }
 0x2c0   :  { %10935 = vst [vmem:[#allocation13_spill] sm:$0xff] %v9038_v4  ;;  %v599_v2 = vand.u32 15, %v591_v62 }
 0x2c1   :  { %10934 = vst [vmem:[#allocation12_spill] sm:$0xff] %v9035_v0  ;;  %v7078_v6 = vpop.f32.mrb[6].mxu1  ;;  %7093 = vmatprep.mubr.msk.f32.mxu0 %vm630_vm7, %v9035_v0  ;;  %vm609_vm11 = vcmp.eq.s32.totalorder %v600_v59, %v9136_v54 }
 0x2c2   :  { %v576_v7 = vpop.f32.mrb[7].mxu1  ;;  %7094 = vmatmul.mubr.msk.f32.gmra.mrb[6].mxu0 %vm630_vm7, %v9038_v4  ;;  %v9046_v9 = vadd.f32 %v7078_v6, %v588_v1  ;;  %vm608_vm12 = vcmp.eq.s32.totalorder %v599_v2, %v9136_v54 }
 0x2c3   :  { %v9044_v8 = vadd.f32 %v588_v1, %v576_v7  ;;  %v9144_v1 = vsel %vm607_vm9, 0.0, %v8914_v63  ;;  %v594_v7 = vadd.s32 40, %v8964_v3 }
 0x2c4   :  { %10937 = vst [vmem:[#allocation15_spill] sm:$0xff] %v9046_v9 }
 0x2c5   :  { %10936 = vst [vmem:[#allocation14_spill] sm:$0xff] %v9044_v8  ;;  %7096 = vmatprep.mubr.msk.f32.mxu0 %vm630_vm7, %v9044_v8 }
 0x2c6   :  { %7097 = vmatmul.mubr.msk.f32.gmra.mrb[8].mxu0 %vm630_vm7, %v9046_v9 }
 0x31c   :  { %v7089_v12 = vpop.f32.mrb[2].mxu0 }
 0x31d   :  { %v9056_v13 = vadd.f32 %v7089_v12, %v629_v11  ;;  %v721_v14 = vpop.f32.mrb[3].mxu0  ;;  %v9149_v12 = vsel %vm606_vm10, 0.0, %v8914_v63 }
 0x31e   :  { %v9058_v15 = vadd.f32 %v721_v14, %v629_v11 }
 0x320   :  { %7115 = vmatprep.mubr.msk.f32.mxu0 %vm70_vm0, %v9058_v15  ;;  %v9064_v16 = vpack.i.bf16 %v9056_v13, %v9058_v15 }
 0x322   :  { %8240 = vrot.lane.b32.xlu0 %v9064_v16, %s8913_s11 }
 0x391   :  { %v7092_v17 = vpop.f32.mrb[4].mxu0 }
 0x392   :  { %v9068_v18 = vadd.f32 %v7092_v17, %v629_v11  ;;  %v731_v19 = vpop.f32.mrb[5].mxu0 }
 0x393   :  { %v9070_v20 = vadd.f32 %v731_v19, %v629_v11  ;;  %v9155_v19 = vsel %vm609_vm11, 0.0, %v8914_v63 }
 0x394   :  { %v8241_v21 = vpop.permute.xlu0 %8240 }
 0x395   :  { %v8243_v22 = vunpack.i.h.bf16 %v8241_v21  ;;  %v8242_v23 = vunpack.i.l.bf16 %v8241_v21  ;;  %v7095_v24 = vpop.f32.mrb[6].mxu0  ;;  %v9074_v25 = vpack.i.bf16 %v9068_v18, %v9070_v20 }
 0x396   :  { %v9076_v26 = vadd.f32 %v7095_v24, %v629_v11  ;;  %v741_v27 = vpop.f32.mrb[7].mxu0  ;;  %v596_v24 = vadd.s32 56, %v8964_v3 }
 0x397   :  { %v7787_v29 = vpack.c.bf16 %v8243_v22, %v8242_v23  ;;  %v9084_v30 = vadd.f32 %v741_v27, %v629_v11  ;;  %8245 = vrot.lane.b32.xlu1 %v9074_v25, %s8913_s11  ;;  %v602_v23 = vand.u32 15, %v594_v7  ;;  %v593_v7 = vadd.s32 32, %v8964_v3 }
 0x399   :  { %7789 = vmatprep.subr.msk.bf16.mxu0 %vm9080_vm8, %v7787_v29  ;;  %v7098_v31 = vpop.f32.mrb[8].mxu0  ;;  %v9092_v32 = vpack.i.bf16 %v9076_v26, %v9084_v30  ;;  %vm611_vm13 = vcmp.eq.s32.totalorder %v602_v23, %v9136_v54 }
 0x39a   :  { %v9094_v33 = vadd.f32 %v7098_v31, %v629_v11  ;;  %7792 = vmatpush3.bf16.xpose.msk.msra.mxu0 %vm9080_vm8, %v7787_v29  ;;  %v751_v34 = vpop.f32.mrb[9].mxu0 }
 0x39b   :  { %v9098_v35 = vadd.f32 %v751_v34, %v629_v11  ;;  %8250 = vrot.lane.b32.xlu0 %v9092_v32, %s8913_s11 }
 0x39d   :  { %v9104_v36 = vpack.i.bf16 %v9094_v33, %v9098_v35 }
 0x39f   :  { %8255 = vrot.lane.b32.xlu1 %v9104_v36, %s8913_s11 }
 0x409   :  { %v8246_v37 = vpop.permute.xlu1 %8245 }
 0x40a   :  { %v8248_v38 = vunpack.i.h.bf16 %v8246_v37  ;;  %v8247_v39 = vunpack.i.l.bf16 %v8246_v37 }
 0x40c   :  { %v7793_v40 = vpack.c.bf16 %v8248_v38, %v8247_v39  ;;  %v9167_v39 = vsel %vm608_vm12, 0.0, %v8914_v63 }
 0x40d   :  { %v8251_v41 = vpop.permute.xlu0 %8250 }
 0x40e   :  { %v8253_v42 = vunpack.i.h.bf16 %v8251_v41  ;;  %v8252_v43 = vunpack.i.l.bf16 %v8251_v41  ;;  %7795 = vmatprep.subr.msk.bf16.mxu0 %vm9080_vm8, %v7793_v40  ;;  %v604_v41 = vand.u32 15, %v596_v24  ;;  %v595_v24 = vadd.s32 48, %v8964_v3 }
 0x40f   :  { %7798 = vmatpush3.bf16.xpose.msk.msra.mxu0 %vm9080_vm8, %v7793_v40 }
 0x410   :  { %v7799_v44 = vpack.c.bf16 %v8253_v42, %v8252_v43  ;;  %vm613_vm14 = vcmp.eq.s32.totalorder %v604_v41, %v9136_v54 }
 0x411   :  { %v8256_v45 = vpop.permute.xlu1 %8255  ;;  %v9180_v59 = vsel %vm613_vm14, 0.0, %v8914_v63 }
 0x412   :  { %v8258_v47 = vunpack.i.h.bf16 %v8256_v45  ;;  %v8257_v48 = vunpack.i.l.bf16 %v8256_v45  ;;  %7801 = vmatprep.subr.msk.bf16.mxu0 %vm9080_vm8, %v7799_v44 }
 0x414   :  { %v7805_v49 = vpack.c.bf16 %v8258_v47, %v8257_v48  ;;  %v9174_v47 = vsel %vm611_vm13, 0.0, %v8914_v63 }
 0x417   :  { %7804 = vmatpush3.bf16.xpose.msk.msra.mxu0 %vm9080_vm8, %v7799_v44 }
 0x418   :  { %7807 = vmatprep.subr.msk.bf16.mxu0 %vm9080_vm8, %v7805_v49 }
 0x41f   :  { %7810 = vmatpush3.bf16.xpose.msk.msra.mxu0 %vm9080_vm8, %v7805_v49 }
 0x426   :  { %7116 = vmatmul.mubr.msk.f32.vlgmr.msra.gmra.mrb[10].mxu0 %vm70_vm0, %v9056_v13 }
 0x427   :  { %7118 = vmatprep.mubr.msk.f32.mxu0 %vm70_vm0, %v9070_v20 }
 0x42a   :  { %7119 = vmatmul.mubr.msk.f32.gmra.mrb[12].mxu0 %vm70_vm0, %v9068_v18 }
 0x42b   :  { %7121 = vmatprep.mubr.msk.f32.mxu0 %vm70_vm0, %v9084_v30 }
 0x42e   :  { %7122 = vmatmul.mubr.msk.f32.gmra.mrb[14].mxu0 %vm70_vm0, %v9076_v26 }
 0x42f   :  { %7124 = vmatprep.mubr.msk.f32.mxu0 %vm70_vm0, %v9098_v35 }
 0x432   :  { %7125 = vmatmul.mubr.msk.f32.gmra.mrb[16].mxu0 %vm70_vm0, %v9094_v33 }
 0x4f9   :  { %v7117_v6 = vpop.f32.mrb[10].mxu0 }
 0x4fa   :  { %v922_v5 = vmul.f32 0.35355338, %v7117_v6  ;;  %v882_v11 = vpop.f32.mrb[11].mxu0 }
 0x4fb   :  { %v921_v14 = vmul.f32 0.35355338, %v882_v11 }
 0x4fc   :  { %v9152_v17 = vadd.f32 %v922_v5, %v9144_v1  ;;  %v601_v5 = vand.u32 15, %v593_v7 }
 0x4fd   :  { %v7120_v21 = vpop.f32.mrb[12].mxu0  ;;  %v929_v22 = vadd.f32 %v921_v14, %v9149_v12 }
 0x4fe   :  { %v924_v27 = vmul.f32 0.35355338, %v7120_v21  ;;  %v892_v29 = vpop.f32.mrb[13].mxu0  ;;  %v940_v31 = vsel %vm152_vm3, %v9152_v17, -inf  ;;  %vm610_vm15 = vcmp.eq.s32.totalorder %v601_v5, %v9136_v54 }
 0x4ff   :  { %v923_v34 = vmul.f32 0.35355338, %v892_v29  ;;  %941 = vmax.xlane.f32.xlu1 %v940_v31  ;;  %v937_v37 = vsel %vm152_vm3, %v929_v22, -inf  ;;  %v9195_v14 = vsel %vm610_vm15, 0.0, %v8914_v63 }
 0x500   :  { %938 = vmax.xlane.f32.xlu0 %v937_v37  ;;  %v9164_v38 = vadd.f32 %v924_v27, %v9155_v19  ;;  %v603_v27 = vand.u32 15, %v595_v24 }
 0x501   :  { %v7123_v40 = vpop.f32.mrb[14].mxu0  ;;  %v931_v45 = vadd.f32 %v923_v34, %v9167_v39 }
 0x502   :  { %v902_v42 = vpop.f32.mrb[15].mxu0  ;;  %v946_v43 = vsel %vm152_vm3, %v9164_v38, -inf  ;;  %v926_v44 = vmul.f32 0.35355338, %v7123_v40  ;;  %vm612_vm1 = vcmp.eq.s32.totalorder %v603_v27, %v9136_v54 }
 0x503   :  { %v943_v56 = vsel %vm152_vm3, %v931_v45, -inf  ;;  %v925_v11 = vmul.f32 0.35355338, %v902_v42  ;;  %v9207_v31 = vsel %vm612_vm1, 0.0, %v8914_v63 }
 0x504   :  { %947 = vmax.xlane.f32.xlu0 %v946_v43  ;;  %v934_v57 = vadd.f32 %v926_v44, %v9174_v47 }
 0x505   :  { %v7126_v48 = vpop.f32.mrb[16].mxu0  ;;  %v9198_v21 = vadd.f32 %v925_v11, %v9195_v14 }
 0x506   :  { %v912_v49 = vpop.f32.mrb[17].mxu0  ;;  %v928_v50 = vmul.f32 0.35355338, %v7126_v48  ;;  %v952_v62 = vsel %vm152_vm3, %v934_v57, -inf }
 0x507   :  { %v949_v23 = vsel %vm152_vm3, %v9198_v21, -inf  ;;  %v927_v29 = vmul.f32 0.35355338, %v912_v49 }
 0x508   :  { %944 = vmax.xlane.f32.xlu0 %v943_v56  ;;  %v9184_v6 = vadd.f32 %v928_v50, %v9180_v59 }
 0x509   :  { %v9210_v34 = vadd.f32 %v927_v29, %v9207_v31 }
 0x50a   :  { %v958_v2 = vsel %vm152_vm3, %v9184_v6, -inf }
 0x50b   :  { %v955_v37 = vsel %vm152_vm3, %v9210_v34, -inf }
 0x50c   :  { %953 = vmax.xlane.f32.xlu0 %v952_v62 }
 0x510   :  { %8260 = vrot.lane.b32.xlu1 %v9064_v16, %s8915_s12  ;;  %959 = vmax.xlane.f32.xlu0 %v958_v2 }
 0x526   :  { %8265 = vrot.lane.b32.xlu0 %v9074_v25, %s8915_s12 }
 0x534   :  { %950 = vmax.xlane.f32.xlu1 %v949_v23 }
 0x545   :  { %8270 = vrot.lane.b32.xlu1 %v9092_v32, %s8915_s12 }
 0x569   :  { %956 = vmax.xlane.f32.xlu1 %v955_v37 }
 0x57a   :  { %8275 = vrot.lane.b32.xlu1 %v9104_v36, %s8915_s12 }
 0x58c   :  { %v942_v40 = vpop.xlane.xlu1 %941 }
 0x58d   :  { %v962_v41 = vsub.f32 %v9152_v17, %v942_v40  ;;  %v939_v42 = vpop.xlane.xlu0 %938 }
 0x58e   :  { %v961_v43 = vsub.f32 %v929_v22, %v939_v42 }
 0x58f   :  { %v971_v54 = vmul.f32 1.442695, %v962_v41 }
 0x590   :  { %v969_v44 = vmul.f32 1.442695, %v961_v43  ;;  %v8261_v48 = vpop.permute.xlu1 %8260 }
 0x591   :  { %8559 = vpow2.f32 %v971_v54  ;;  %v8263_v63 = vunpack.i.h.bf16 %v8261_v48  ;;  %v8262_v49 = vunpack.i.l.bf16 %v8261_v48  ;;  %v948_v50 = vpop.xlane.xlu0 %947 }
 0x592   :  { %8561 = vpow2.f32 %v969_v44  ;;  %v964_v44 = vsub.f32 %v9164_v38, %v948_v50 }
 0x593   :  { %v7811_v56 = vpack.c.bf16 %v8263_v63, %v8262_v49 }
 0x594   :  { %v975_v63 = vmul.f32 1.442695, %v964_v44 }
 0x595   :  { %7812 = vmatprep.subr.bf16.mxu1 %v7811_v56  ;;  %v945_v62 = vpop.xlane.xlu0 %944 }
 0x596   :  { %v963_v2 = vsub.f32 %v931_v45, %v945_v62  ;;  %7814 = vmatpush3.bf16.msra.mxu1 %v7811_v56 }
 0x598   :  { %v973_v7 = vmul.f32 1.442695, %v963_v2 }
 0x599   :  { %v954_v5 = vpop.xlane.xlu0 %953 }
 0x59a   :  { %8563 = vpow2.f32 %v973_v7  ;;  %v966_v11 = vsub.f32 %v934_v57, %v954_v5 }
 0x59b   :  { %v9217_v17 = vpop.eup %8559 }
 0x59c   :  { %v9219_v22 = vpop.eup %8561  ;;  %v979_v23 = vmul.f32 1.442695, %v966_v11  ;;  %v988_v24 = vsel %vm152_vm3, %v9217_v17, 0.0 }
 0x59d   :  { %989 = vadd.xlane.f32.xlu0 %v988_v24  ;;  %v960_v27 = vpop.xlane.xlu0 %959  ;;  %v985_v29 = vsel %vm152_vm3, %v9219_v22, 0.0 }
 0x59e   :  { %8565 = vpow2.f32 %v979_v23  ;;  %986 = vadd.xlane.f32.xlu1 %v985_v29  ;;  %v968_v48 = vsub.f32 %v9184_v6, %v960_v27 }
 0x59f   :  { %8567 = vpow2.f32 %v975_v63 }
 0x5a0   :  { %v983_v62 = vmul.f32 1.442695, %v968_v48 }
 0x5a1   :  { %v8266_v45 = vpop.permute.xlu0 %8265 }
 0x5a2   :  { %v8268_v37 = vunpack.i.h.bf16 %v8266_v45  ;;  %v8267_v40 = vunpack.i.l.bf16 %v8266_v45 }
 0x5a4   :  { %v9225_v41 = vpop.eup %8563  ;;  %v7815_v57 = vpack.c.bf16 %v8268_v37, %v8267_v40 }
 0x5a5   :  { %v991_v42 = vsel %vm152_vm3, %v9225_v41, 0.0 }
 0x5a6   :  { %992 = vadd.xlane.f32.xlu0 %v991_v42  ;;  %7816 = vmatprep.subr.bf16.mxu1 %v7815_v57 }
 0x5a7   :  { %7818 = vmatpush3.bf16.msra.mxu1 %v7815_v57 }
 0x5a8   :  { %v9229_v43 = vpop.eup %8565 }
 0x5a9   :  { %v1000_v54 = vsel %vm152_vm3, %v9229_v43, 0.0  ;;  %v8568_v24 = vpop.eup %8567 }
 0x5aa   :  { %1001 = vadd.xlane.f32.xlu0 %v1000_v54 }
 0x5af   :  { %8280 = vrot.lane.b32.xlu1 %v9064_v16, %s8916_s13 }
 0x5c1   :  { %v951_v49 = vpop.xlane.xlu1 %950 }
 0x5c2   :  { %v965_v56 = vsub.f32 %v9198_v21, %v951_v49  ;;  %v994_v21 = vsel %vm152_vm3, %v8568_v24, 0.0 }
 0x5c4   :  { %v977_v2 = vmul.f32 1.442695, %v965_v56 }
 0x5c5   :  { %v8271_v7 = vpop.permute.xlu1 %8270 }
 0x5c6   :  { %8569 = vpow2.f32 %v977_v2  ;;  %v8273_v5 = vunpack.i.h.bf16 %v8271_v7  ;;  %v8272_v11 = vunpack.i.l.bf16 %v8271_v7 }
 0x5c7   :  { %8571 = vpow2.f32 %v983_v62 }
 0x5c8   :  { %v7819_v23 = vpack.c.bf16 %v8273_v5, %v8272_v11 }
 0x5ca   :  { %7820 = vmatprep.subr.bf16.mxu1 %v7819_v23 }
 0x5cb   :  { %7822 = vmatpush3.bf16.msra.mxu1 %v7819_v23 }
 0x5d0   :  { %v9238_v29 = vpop.eup %8569 }
 0x5d1   :  { %v997_v38 = vsel %vm152_vm3, %v9238_v29, 0.0  ;;  %v9242_v6 = vpop.eup %8571 }
 0x5d2   :  { %998 = vadd.xlane.f32.xlu0 %v997_v38  ;;  %v1006_v50 = vsel %vm152_vm3, %v9242_v6, 0.0 }
 0x5d3   :  { %995 = vadd.xlane.f32.xlu1 %v994_v21 }
 0x5d6   :  { %1007 = vadd.xlane.f32.xlu0 %v1006_v50 }
 0x5e4   :  { %8290 = vrot.lane.b32.xlu1 %v9092_v32, %s8916_s13 }
 0x5e8   :  { %8295 = vrot.lane.b32.xlu1 %v9104_v36, %s8916_s13 }
 0x5ec   :  { %1178 = vrot.lane.b32.xlu1 %v9058_v15, %s8911_s1 }
 0x5f0   :  { %1180 = vrot.lane.b32.xlu1 %v9056_v13, %s8911_s1 }
 0x5f4   :  { %1184 = vrot.lane.b32.xlu1 %v9068_v18, %s8911_s1 }
 0x5f6   :  { %v957_v27 = vpop.xlane.xlu1 %956 }
 0x5f7   :  { %v967_v45 = vsub.f32 %v9210_v34, %v957_v27 }
 0x5f8   :  { %1188 = vrot.lane.b32.xlu1 %v9076_v26, %s8911_s1 }
 0x5f9   :  { %v981_v37 = vmul.f32 1.442695, %v967_v45 }
 0x5fa   :  { %v8276_v40 = vpop.permute.xlu1 %8275 }
 0x5fb   :  { %8573 = vpow2.f32 %v981_v37  ;;  %v8278_v57 = vunpack.i.h.bf16 %v8276_v40  ;;  %v8277_v42 = vunpack.i.l.bf16 %v8276_v40 }
 0x5fc   :  { %1192 = vrot.lane.b32.xlu1 %v9094_v33, %s8911_s1 }
 0x5fd   :  { %v7823_v54 = vpack.c.bf16 %v8278_v57, %v8277_v42 }
 0x5ff   :  { %7824 = vmatprep.subr.bf16.mxu1 %v7823_v54 }
 0x600   :  { %7826 = vmatpush3.bf16.msra.mxu1 %v7823_v54 }
 0x605   :  { %v8574_v44 = vpop.eup %8573 }
 0x606   :  { %v1003_v48 = vsel %vm152_vm3, %v8574_v44, 0.0 }
 0x607   :  { %1004 = vadd.xlane.f32.xlu0 %v1003_v48 }
 0x61d   :  { %8285 = vrot.lane.b32.xlu0 %v9074_v25, %s8916_s13 }
 0x621   :  { %1182 = vrot.lane.b32.xlu0 %v9070_v20, %s8911_s1 }
 0x625   :  { %1186 = vrot.lane.b32.xlu0 %v9084_v30, %s8911_s1 }
 0x629   :  { %1190 = vrot.lane.b32.xlu0 %v9098_v35, %s8911_s1 }
 0x62a   :  { %v990_v34 = vpop.xlane.xlu0 %989 }
 0x62b   :  { %8575 = vrcp.f32 %v990_v34  ;;  %v987_v63 = vpop.xlane.xlu1 %986 }
 0x62c   :  { %8577 = vrcp.f32 %v987_v63 }
 0x62f   :  { %v8281_v49 = vpop.permute.xlu1 %8280 }
 0x630   :  { %v8283_v56 = vunpack.i.h.bf16 %v8281_v49  ;;  %v8282_v62 = vunpack.i.l.bf16 %v8281_v49 }
 0x632   :  { %v7827_v2 = vpack.c.bf16 %v8283_v56, %v8282_v62 }
 0x633   :  { %v993_v7 = vpop.xlane.xlu0 %992 }
 0x634   :  { %8579 = vrcp.f32 %v993_v7  ;;  %7829 = vmatprep.subr.msk.bf16.mxu1 %vm9080_vm8, %v7827_v2 }
 0x635   :  { %v8576_v5 = vpop.eup %8575 }
 0x636   :  { %v8578_v11 = vpop.eup %8577  ;;  %v1018_v38 = vmul.f32 %v8576_v5, %v9217_v17 }
 0x637   :  { %v1017_v23 = vmul.f32 %v8578_v11, %v9219_v22  ;;  %v1002_v27 = vpop.xlane.xlu0 %1001 }
 0x639   :  { %7143 = vmatprep.mubr.msk.f32.mxu1 %vm152_vm3, %v1017_v23 }
 0x63a   :  { %7144 = vmatmul.mubr.msk.f32.vlgmr.msra.gmra.mrb[8].mxu1 %vm152_vm3, %v1018_v38 }
 0x63b   :  { %7832 = vmatpush3.bf16.xpose.msk.msra.mxu1 %vm9080_vm8, %v7827_v2 }
 0x63e   :  { %v8580_v21 = vpop.eup %8579 }
 0x63f   :  { %v1019_v50 = vmul.f32 %v8580_v21, %v9225_v41 }
 0x641   :  { %7146 = vmatprep.mubr.msk.f32.mxu1 %vm152_vm3, %v1019_v50 }
 0x65f   :  { %v999_v45 = vpop.xlane.xlu0 %998 }
 0x660   :  { %8581 = vrcp.f32 %v999_v45  ;;  %v996_v37 = vpop.xlane.xlu1 %995 }
 0x661   :  { %8583 = vrcp.f32 %v996_v37 }
 0x662   :  { %8585 = vrcp.f32 %v1002_v27 }
 0x663   :  { %v1008_v54 = vpop.xlane.xlu0 %1007 }
 0x664   :  { %8587 = vrcp.f32 %v1008_v54  ;;  %v8291_v34 = vpop.permute.xlu1 %8290 }
 0x665   :  { %v8293_v49 = vunpack.i.h.bf16 %v8291_v34  ;;  %v8292_v56 = vunpack.i.l.bf16 %v8291_v34 }
 0x668   :  { %v8296_v7 = vpop.permute.xlu1 %8295 }
 0x669   :  { %v8298_v23 = vunpack.i.h.bf16 %v8296_v7  ;;  %v8297_v38 = vunpack.i.l.bf16 %v8296_v7 }
 0x66a   :  { %v8582_v22 = vpop.eup %8581 }
 0x66b   :  { %v8584_v17 = vpop.eup %8583  ;;  %v1021_v42 = vmul.f32 %v8582_v22, %v9238_v29  ;;  %v7839_v29 = vpack.c.bf16 %v8293_v49, %v8292_v56  ;;  %v7845_v27 = vpack.c.bf16 %v8298_v23, %v8297_v38 }
 0x66c   :  { %v1020_v40 = vmul.f32 %v8584_v17, %v8568_v24  ;;  %v8586_v57 = vpop.eup %8585  ;;  %v1179_v50 = vpop.permute.xlu1 %1178 }
 0x66d   :  { %v1022_v41 = vmul.f32 %v8586_v57, %v9229_v43 }
 0x66e   :  { %7147 = vmatmul.mubr.msk.f32.gmra.mrb[10].mxu1 %vm152_vm3, %v1020_v40  ;;  %v8588_v5 = vpop.eup %8587 }
 0x66f   :  { %7149 = vmatprep.mubr.msk.f32.mxu1 %vm152_vm3, %v1021_v42  ;;  %v1024_v21 = vmul.f32 %v8588_v5, %v9242_v6 }
 0x670   :  { %v1181_v45 = vpop.permute.xlu1 %1180 }
 0x672   :  { %7150 = vmatmul.mubr.msk.f32.gmra.mrb[12].mxu1 %vm152_vm3, %v1022_v41 }
 0x674   :  { %v1185_v6 = vpop.permute.xlu1 %1184 }
 0x678   :  { %v1189_v22 = vpop.permute.xlu1 %1188 }
 0x67c   :  { %v1193_v40 = vpop.permute.xlu1 %1192 }
 0x694   :  { %v1005_v48 = vpop.xlane.xlu0 %1004 }
 0x695   :  { %8589 = vrcp.f32 %v1005_v48 }
 0x698   :  { %v8286_v63 = vpop.permute.xlu0 %8285 }
 0x699   :  { %v8288_v24 = vunpack.i.h.bf16 %v8286_v63  ;;  %v8287_v62 = vunpack.i.l.bf16 %v8286_v63 }
 0x69b   :  { %v7833_v2 = vpack.c.bf16 %v8288_v24, %v8287_v62 }
 0x69d   :  { %7835 = vmatprep.subr.msk.bf16.mxu1 %vm9080_vm8, %v7833_v2 }
 0x69e   :  { %7838 = vmatpush3.bf16.xpose.msk.msra.mxu1 %vm9080_vm8, %v7833_v2 }
 0x69f   :  { %v8590_v43 = vpop.eup %8589  ;;  %7841 = vmatprep.subr.msk.bf16.mxu1 %vm9080_vm8, %v7839_v29 }
 0x6a0   :  { %v1023_v11 = vmul.f32 %v8590_v43, %v8574_v44  ;;  %v1183_v44 = vpop.permute.xlu0 %1182 }
 0x6a2   :  { %7152 = vmatprep.mubr.msk.f32.mxu1 %vm152_vm3, %v1023_v11 }
 0x6a3   :  { %7153 = vmatmul.mubr.msk.f32.gmra.mrb[14].mxu1 %vm152_vm3, %v1024_v21 }
 0x6a4   :  { %7171 = vmatprep.mubr.msk.f32.mxu1 %vm70_vm0, %v1179_v50  ;;  %v1187_v37 = vpop.permute.xlu0 %1186 }
 0x6a6   :  { %7844 = vmatpush3.bf16.xpose.msk.msra.mxu1 %vm9080_vm8, %v7839_v29 }
 0x6a7   :  { %7847 = vmatprep.subr.msk.bf16.mxu1 %vm9080_vm8, %v7845_v27 }
 0x6a8   :  { %v1191_v17 = vpop.permute.xlu0 %1190 }
 0x6ae   :  { %7850 = vmatpush3.bf16.xpose.msk.msra.mxu1 %vm9080_vm8, %v7845_v27 }
 0x6b5   :  { %7172 = vmatmul.mubr.msk.f32.vlgmr.msra.gmra.mrb[16].mxu1 %vm70_vm0, %v1181_v45 }
 0x6b6   :  { %7174 = vmatprep.mubr.msk.f32.mxu1 %vm70_vm0, %v1183_v44 }
 0x6b9   :  { %7175 = vmatmul.mubr.msk.f32.gmra.mrb[18].mxu1 %vm70_vm0, %v1185_v6 }
 0x6ba   :  { %7177 = vmatprep.mubr.msk.f32.mxu1 %vm70_vm0, %v1187_v37 }
 0x6bd   :  { %7178 = vmatmul.mubr.msk.f32.gmra.mrb[20].mxu1 %vm70_vm0, %v1189_v22 }
 0x6be   :  { %7180 = vmatprep.mubr.msk.f32.mxu1 %vm70_vm0, %v1191_v17 }
 0x6c1   :  { %7181 = vmatmul.mubr.msk.f32.gmra.mrb[22].mxu1 %vm70_vm0, %v1193_v40 }
 0x70d   :  { %v9309_v57 = vpop.f32.mrb[8].mxu1 }
 0x70e   :  { %v9311_v42 = vpop.f32.mrb[9].mxu1 }
 0x741   :  { %v9313_v41 = vpop.f32.mrb[10].mxu1 }
 0x742   :  { %v9315_v54 = vpop.f32.mrb[11].mxu1 }
 0x745   :  { %v9317_v48 = vpop.f32.mrb[12].mxu1 }
 0x746   :  { %v9319_v34 = vpop.f32.mrb[13].mxu1 }
 0x776   :  { %v9321_v63 = vpop.f32.mrb[14].mxu1 }
 0x777   :  { %v9323_v49 = vpop.f32.mrb[15].mxu1 }
 0x788   :  { %v7173_v56 = vpop.f32.mrb[16].mxu1 }
 0x789   :  { %v1348_v24 = vmul.f32 0.35355338, %v7173_v56  ;;  %v1308_v62 = vpop.f32.mrb[17].mxu1 }
 0x78a   :  { %v1347_v2 = vmul.f32 0.35355338, %v1308_v62 }
 0x78b   :  { %v1356_v29 = vadd.f32 %v1348_v24, %v9144_v1 }
 0x78c   :  { %v7176_v7 = vpop.f32.mrb[18].mxu1  ;;  %v1355_v5 = vadd.f32 %v1347_v2, %v9149_v12 }
 0x78d   :  { %v1350_v43 = vmul.f32 0.35355338, %v7176_v7  ;;  %v1318_v11 = vpop.f32.mrb[19].mxu1  ;;  %v1366_v23 = vsel %vm152_vm3, %v1356_v29, -inf }
 0x78e   :  { %v1349_v38 = vmul.f32 0.35355338, %v1318_v11  ;;  %1367 = vmax.xlane.f32.xlu1 %v1366_v23  ;;  %v1363_v21 = vsel %vm152_vm3, %v1355_v5, -inf }
 0x78f   :  { %1364 = vmax.xlane.f32.xlu0 %v1363_v21  ;;  %v9330_v50 = vadd.f32 %v1350_v43, %v9155_v19 }
 0x790   :  { %v7179_v27 = vpop.f32.mrb[20].mxu1  ;;  %v1357_v37 = vadd.f32 %v1349_v38, %v9167_v39 }
 0x791   :  { %v1328_v45 = vpop.f32.mrb[21].mxu1  ;;  %v1372_v44 = vsel %vm152_vm3, %v9330_v50, -inf  ;;  %v1352_v6 = vmul.f32 0.35355338, %v7179_v27 }
 0x792   :  { %v1369_v56 = vsel %vm152_vm3, %v1357_v37, -inf  ;;  %v1351_v43 = vmul.f32 0.35355338, %v1328_v45 }
 0x793   :  { %1373 = vmax.xlane.f32.xlu0 %v1372_v44  ;;  %v1360_v24 = vadd.f32 %v1352_v6, %v9174_v47 }
 0x794   :  { %v7182_v22 = vpop.f32.mrb[22].mxu1  ;;  %v1359_v11 = vadd.f32 %v1351_v43, %v9195_v14 }
 0x795   :  { %v1338_v17 = vpop.f32.mrb[23].mxu1  ;;  %v1354_v40 = vmul.f32 0.35355338, %v7182_v22  ;;  %v1378_v62 = vsel %vm152_vm3, %v1360_v24, -inf }
 0x796   :  { %v1375_v23 = vsel %vm152_vm3, %v1359_v11, -inf  ;;  %v1353_v38 = vmul.f32 0.35355338, %v1338_v17 }
 0x797   :  { %1370 = vmax.xlane.f32.xlu0 %v1369_v56  ;;  %v9339_v2 = vadd.f32 %v1354_v40, %v9180_v59 }
 0x798   :  { %v9352_v21 = vadd.f32 %v1353_v38, %v9207_v31 }
 0x799   :  { %v1384_v7 = vsel %vm152_vm3, %v9339_v2, -inf }
 0x79a   :  { %v1381_v27 = vsel %vm152_vm3, %v9352_v21, -inf }
 0x79b   :  { %1379 = vmax.xlane.f32.xlu0 %v1378_v62 }
 0x79f   :  { %8300 = vrot.lane.b32.xlu1 %v9064_v16, %s8917_s14  ;;  %1385 = vmax.xlane.f32.xlu0 %v1384_v7 }
 0x7b5   :  { %8305 = vrot.lane.b32.xlu0 %v9074_v25, %s8917_s14 }
 0x7c3   :  { %1376 = vmax.xlane.f32.xlu1 %v1375_v23 }
 0x7d4   :  { %8310 = vrot.lane.b32.xlu1 %v9092_v32, %s8917_s14 }
 0x7f8   :  { %1382 = vmax.xlane.f32.xlu1 %v1381_v27 }
 0x809   :  { %8315 = vrot.lane.b32.xlu1 %v9104_v36, %s8917_s14 }
 0x81b   :  { %v1368_v45 = vpop.xlane.xlu1 %1367 }
 0x81c   :  { %v1388_v44 = vsub.f32 %v1356_v29, %v1368_v45  ;;  %v1365_v6 = vpop.xlane.xlu0 %1364 }
 0x81d   :  { %v1387_v22 = vsub.f32 %v1355_v5, %v1365_v6 }
 0x81e   :  { %v1397_v40 = vmul.f32 1.442695, %v1388_v44 }
 0x81f   :  { %v1395_v56 = vmul.f32 1.442695, %v1387_v22  ;;  %v8301_v62 = vpop.permute.xlu1 %8300 }
 0x820   :  { %8591 = vpow2.f32 %v1397_v40  ;;  %v8303_v7 = vunpack.i.h.bf16 %v8301_v62  ;;  %v8302_v17 = vunpack.i.l.bf16 %v8301_v62  ;;  %v1374_v43 = vpop.xlane.xlu0 %1373 }
 0x821   :  { %8593 = vpow2.f32 %v1395_v56 }
 0x822   :  { %v7851_v23 = vpack.c.bf16 %v8303_v7, %v8302_v17  ;;  %v1390_v7 = vsub.f32 %v9330_v50, %v1374_v43 }
 0x824   :  { %7852 = vmatprep.subr.bf16.mxu0 %v7851_v23  ;;  %v1371_v38 = vpop.xlane.xlu0 %1370 }
 0x825   :  { %v1389_v10 = vsub.f32 %v1357_v37, %v1371_v38  ;;  %7854 = vmatpush3.bf16.msra.mxu0 %v7851_v23  ;;  %v1401_v23 = vmul.f32 1.442695, %v1390_v7 }
 0x827   :  { %v1399_v27 = vmul.f32 1.442695, %v1389_v10 }
 0x828   :  { %v1380_v60 = vpop.xlane.xlu0 %1379 }
 0x829   :  { %8595 = vpow2.f32 %v1399_v27  ;;  %v1392_v55 = vsub.f32 %v1360_v24, %v1380_v60 }
 0x82a   :  { %v9358_v29 = vpop.eup %8591 }
 0x82b   :  { %v9360_v5 = vpop.eup %8593  ;;  %v1405_v45 = vmul.f32 1.442695, %v1392_v55  ;;  %v1414_v44 = vsel %vm152_vm3, %v9358_v29, 0.0 }
 0x82c   :  { %1415 = vadd.xlane.f32.xlu0 %v1414_v44  ;;  %v1386_v6 = vpop.xlane.xlu0 %1385  ;;  %v1411_v22 = vsel %vm152_vm3, %v9360_v5, 0.0 }
 0x82d   :  { %8597 = vpow2.f32 %v1405_v45  ;;  %1412 = vadd.xlane.f32.xlu1 %v1411_v22  ;;  %v1394_v17 = vsub.f32 %v9339_v2, %v1386_v6 }
 0x82e   :  { %8599 = vpow2.f32 %v1401_v23 }
 0x82f   :  { %v1409_v45 = vmul.f32 1.442695, %v1394_v17 }
 0x830   :  { %v8306_v37 = vpop.permute.xlu0 %8305 }
 0x831   :  { %v8308_v10 = vunpack.i.h.bf16 %v8306_v37  ;;  %v8307_v40 = vunpack.i.l.bf16 %v8306_v37 }
 0x833   :  { %v9366_v56 = vpop.eup %8595  ;;  %v7855_v60 = vpack.c.bf16 %v8308_v10, %v8307_v40 }
 0x834   :  { %v1417_v24 = vsel %vm152_vm3, %v9366_v56, 0.0 }
 0x835   :  { %1418 = vadd.xlane.f32.xlu0 %v1417_v24  ;;  %7856 = vmatprep.subr.bf16.mxu0 %v7855_v60 }
 0x836   :  { %7858 = vmatpush3.bf16.msra.mxu0 %v7855_v60 }
 0x837   :  { %v9370_v55 = vpop.eup %8597 }
 0x838   :  { %v1426_v62 = vsel %vm152_vm3, %v9370_v55, 0.0  ;;  %v8600_v60 = vpop.eup %8599 }
 0x839   :  { %1427 = vadd.xlane.f32.xlu0 %v1426_v62 }
 0x83e   :  { %8320 = vrot.lane.b32.xlu1 %v9064_v16, %s8918_s15 }
 0x850   :  { %v1377_v38 = vpop.xlane.xlu1 %1376 }
 0x851   :  { %v1391_v27 = vsub.f32 %v1359_v11, %v1377_v38  ;;  %v1420_v11 = vsel %vm152_vm3, %v8600_v60, 0.0 }
 0x853   :  { %v1403_v44 = vmul.f32 1.442695, %v1391_v27 }
 0x854   :  { %v8311_v22 = vpop.permute.xlu1 %8310 }
 0x855   :  { %8601 = vpow2.f32 %v1403_v44  ;;  %v8313_v37 = vunpack.i.h.bf16 %v8311_v22  ;;  %v8312_v10 = vunpack.i.l.bf16 %v8311_v22 }
 0x856   :  { %8603 = vpow2.f32 %v1409_v45 }
 0x857   :  { %v7859_v40 = vpack.c.bf16 %v8313_v37, %v8312_v10 }
 0x859   :  { %7860 = vmatprep.subr.bf16.mxu0 %v7859_v40 }
 0x85a   :  { %7862 = vmatpush3.bf16.msra.mxu0 %v7859_v40 }
 0x85f   :  { %v9378_v24 = vpop.eup %8601 }
 0x860   :  { %v1423_v50 = vsel %vm152_vm3, %v9378_v24, 0.0  ;;  %v9382_v2 = vpop.eup %8603 }
 0x861   :  { %1424 = vadd.xlane.f32.xlu0 %v1423_v50  ;;  %v1432_v43 = vsel %vm152_vm3, %v9382_v2, 0.0 }
 0x862   :  { %1421 = vadd.xlane.f32.xlu1 %v1420_v11 }
 0x865   :  { %1433 = vadd.xlane.f32.xlu0 %v1432_v43 }
 0x873   :  { %8330 = vrot.lane.b32.xlu1 %v9092_v32, %s8918_s15 }
 0x877   :  { %8335 = vrot.lane.b32.xlu1 %v9104_v36, %s8918_s15 }
 0x87b   :  { %1604 = vrot.lane.b32.xlu1 %v9058_v15, %s8910_s0 }
 0x87f   :  { %1606 = vrot.lane.b32.xlu1 %v9056_v13, %s8910_s0 }
 0x883   :  { %1610 = vrot.lane.b32.xlu1 %v9068_v18, %s8910_s0 }
 0x885   :  { %v1383_v6 = vpop.xlane.xlu1 %1382 }
 0x886   :  { %v1393_v62 = vsub.f32 %v9352_v21, %v1383_v6 }
 0x887   :  { %1614 = vrot.lane.b32.xlu1 %v9076_v26, %s8910_s0 }
 0x888   :  { %v1407_v7 = vmul.f32 1.442695, %v1393_v62 }
 0x889   :  { %v8316_v17 = vpop.permute.xlu1 %8315 }
 0x88a   :  { %8605 = vpow2.f32 %v1407_v7  ;;  %v8318_v23 = vunpack.i.h.bf16 %v8316_v17  ;;  %v8317_v38 = vunpack.i.l.bf16 %v8316_v17 }
 0x88b   :  { %1618 = vrot.lane.b32.xlu1 %v9094_v33, %s8910_s0 }
 0x88c   :  { %v7863_v27 = vpack.c.bf16 %v8318_v23, %v8317_v38 }
 0x88e   :  { %7864 = vmatprep.subr.bf16.mxu0 %v7863_v27 }
 0x88f   :  { %7866 = vmatpush3.bf16.msra.mxu0 %v7863_v27 }
 0x894   :  { %v8606_v45 = vpop.eup %8605 }
 0x895   :  { %v1429_v44 = vsel %vm152_vm3, %v8606_v45, 0.0 }
 0x896   :  { %1430 = vadd.xlane.f32.xlu0 %v1429_v44 }
 0x8ac   :  { %8325 = vrot.lane.b32.xlu0 %v9074_v25, %s8918_s15 }
 0x8b0   :  { %1608 = vrot.lane.b32.xlu0 %v9070_v20, %s8910_s0 }
 0x8b4   :  { %1612 = vrot.lane.b32.xlu0 %v9084_v30, %s8910_s0 }
 0x8b8   :  { %1616 = vrot.lane.b32.xlu0 %v9098_v35, %s8910_s0 }
 0x8b9   :  { %v1416_v21 = vpop.xlane.xlu0 %1415 }
 0x8ba   :  { %8607 = vrcp.f32 %v1416_v21  ;;  %v1413_v22 = vpop.xlane.xlu1 %1412 }
 0x8bb   :  { %8609 = vrcp.f32 %v1413_v22 }
 0x8be   :  { %v8321_v37 = vpop.permute.xlu1 %8320 }
 0x8bf   :  { %v8323_v10 = vunpack.i.h.bf16 %v8321_v37  ;;  %v8322_v40 = vunpack.i.l.bf16 %v8321_v37 }
 0x8c1   :  { %v7867_v50 = vpack.c.bf16 %v8323_v10, %v8322_v40 }
 0x8c2   :  { %v1419_v11 = vpop.xlane.xlu0 %1418 }
 0x8c3   :  { %8611 = vrcp.f32 %v1419_v11  ;;  %7869 = vmatprep.subr.msk.bf16.mxu0 %vm9080_vm8, %v7867_v50 }
 0x8c4   :  { %v8608_v43 = vpop.eup %8607 }
 0x8c5   :  { %v8610_v6 = vpop.eup %8609  ;;  %v1444_v7 = vmul.f32 %v8608_v43, %v9358_v29 }
 0x8c6   :  { %v1443_v62 = vmul.f32 %v8610_v6, %v9360_v5  ;;  %v1428_v38 = vpop.xlane.xlu0 %1427 }
 0x8c8   :  { %7199 = vmatprep.mubr.msk.f32.mxu0 %vm152_vm3, %v1443_v62 }
 0x8c9   :  { %7200 = vmatmul.mubr.msk.f32.vlgmr.msra.gmra.mrb[18].mxu0 %vm152_vm3, %v1444_v7 }
 0x8ca   :  { %7872 = vmatpush3.bf16.xpose.msk.msra.mxu0 %vm9080_vm8, %v7867_v50 }
 0x8cd   :  { %v8612_v17 = vpop.eup %8611 }
 0x8ce   :  { %v1445_v23 = vmul.f32 %v8612_v17, %v9366_v56 }
 0x8d0   :  { %7202 = vmatprep.mubr.msk.f32.mxu0 %vm152_vm3, %v1445_v23 }
 0x8ee   :  { %v1425_v27 = vpop.xlane.xlu0 %1424 }
 0x8ef   :  { %8613 = vrcp.f32 %v1425_v27  ;;  %v1422_v44 = vpop.xlane.xlu1 %1421 }
 0x8f0   :  { %8615 = vrcp.f32 %v1422_v44 }
 0x8f1   :  { %8617 = vrcp.f32 %v1428_v38 }
 0x8f2   :  { %v1434_v10 = vpop.xlane.xlu0 %1433 }
 0x8f3   :  { %8619 = vrcp.f32 %v1434_v10  ;;  %v8331_v50 = vpop.permute.xlu1 %8330 }
 0x8f4   :  { %v8333_v43 = vunpack.i.h.bf16 %v8331_v50  ;;  %v8332_v6 = vunpack.i.l.bf16 %v8331_v50 }
 0x8f7   :  { %v8336_v17 = vpop.permute.xlu1 %8335 }
 0x8f8   :  { %v8338_v27 = vunpack.i.h.bf16 %v8336_v17  ;;  %v8337_v44 = vunpack.i.l.bf16 %v8336_v17 }
 0x8f9   :  { %v8614_v5 = vpop.eup %8613 }
 0x8fa   :  { %v8616_v29 = vpop.eup %8615  ;;  %v1447_v37 = vmul.f32 %v8614_v5, %v9378_v24  ;;  %v7879_v24 = vpack.c.bf16 %v8333_v43, %v8332_v6 }
 0x8fb   :  { %v1446_v21 = vmul.f32 %v8616_v29, %v8600_v60  ;;  %v8618_v22 = vpop.eup %8617  ;;  %v1605_v29 = vpop.permute.xlu1 %1604 }
 0x8fc   :  { %v1448_v56 = vmul.f32 %v8618_v22, %v9370_v55 }
 0x8fd   :  { %7203 = vmatmul.mubr.msk.f32.gmra.mrb[20].mxu0 %vm152_vm3, %v1446_v21  ;;  %v8620_v23 = vpop.eup %8619  ;;  %v7885_v21 = vpack.c.bf16 %v8338_v27, %v8337_v44 }
 0x8fe   :  { %7205 = vmatprep.mubr.msk.f32.mxu0 %vm152_vm3, %v1447_v37  ;;  %v1450_v5 = vmul.f32 %v8620_v23, %v9382_v2 }
 0x8ff   :  { %v1607_v22 = vpop.permute.xlu1 %1606 }
 0x901   :  { %7206 = vmatmul.mubr.msk.f32.gmra.mrb[22].mxu0 %vm152_vm3, %v1448_v56 }
 0x903   :  { %v1611_v2 = vpop.permute.xlu1 %1610 }
 0x907   :  { %v1615_v56 = vpop.permute.xlu1 %1614 }
 0x923   :  { %v1431_v40 = vpop.xlane.xlu0 %1430 }
 0x924   :  { %8621 = vrcp.f32 %v1431_v40  ;;  %v1619_v40 = vpop.permute.xlu1 %1618 }
 0x927   :  { %v8326_v11 = vpop.permute.xlu0 %8325 }
 0x928   :  { %v8328_v60 = vunpack.i.h.bf16 %v8326_v11  ;;  %v8327_v62 = vunpack.i.l.bf16 %v8326_v11 }
 0x92a   :  { %v7873_v7 = vpack.c.bf16 %v8328_v60, %v8327_v62 }
 0x92c   :  { %7875 = vmatprep.subr.msk.bf16.mxu0 %vm9080_vm8, %v7873_v7 }
 0x92d   :  { %7878 = vmatpush3.bf16.xpose.msk.msra.mxu0 %vm9080_vm8, %v7873_v7 }
 0x92e   :  { %v8622_v55 = vpop.eup %8621  ;;  %7881 = vmatprep.subr.msk.bf16.mxu0 %vm9080_vm8, %v7879_v24 }
 0x92f   :  { %v1449_v38 = vmul.f32 %v8622_v55, %v8606_v45  ;;  %v1609_v45 = vpop.permute.xlu0 %1608 }
 0x931   :  { %7208 = vmatprep.mubr.msk.f32.mxu0 %vm152_vm3, %v1449_v38 }
 0x932   :  { %7209 = vmatmul.mubr.msk.f32.gmra.mrb[24].mxu0 %vm152_vm3, %v1450_v5 }
 0x933   :  { %7227 = vmatprep.mubr.msk.f32.mxu0 %vm70_vm0, %v1605_v29  ;;  %v1613_v37 = vpop.permute.xlu0 %1612 }
 0x935   :  { %7884 = vmatpush3.bf16.xpose.msk.msra.mxu0 %vm9080_vm8, %v7879_v24 }
 0x936   :  { %7887 = vmatprep.subr.msk.bf16.mxu0 %vm9080_vm8, %v7885_v21 }
 0x937   :  { %v1617_v10 = vpop.permute.xlu0 %1616 }
 0x93d   :  { %7890 = vmatpush3.bf16.xpose.msk.msra.mxu0 %vm9080_vm8, %v7885_v21 }
 0x944   :  { %7228 = vmatmul.mubr.msk.f32.vlgmr.msra.gmra.mrb[26].mxu0 %vm70_vm0, %v1607_v22 }
 0x945   :  { %7230 = vmatprep.mubr.msk.f32.mxu0 %vm70_vm0, %v1609_v45 }
 0x948   :  { %7231 = vmatmul.mubr.msk.f32.gmra.mrb[28].mxu0 %vm70_vm0, %v1611_v2 }
 0x949   :  { %7233 = vmatprep.mubr.msk.f32.mxu0 %vm70_vm0, %v1613_v37 }
 0x94c   :  { %7234 = vmatmul.mubr.msk.f32.gmra.mrb[30].mxu0 %vm70_vm0, %v1615_v56 }
 0x94d   :  { %7236 = vmatprep.mubr.msk.f32.mxu0 %vm70_vm0, %v1617_v10 }
 0x950   :  { %7237 = vmatmul.mubr.msk.f32.gmra.mrb[32].mxu0 %vm70_vm0, %v1619_v40 }
 0x99c   :  { %v9449_v50 = vpop.f32.mrb[18].mxu0 }
 0x99d   :  { %v9451_v11 = vpop.f32.mrb[19].mxu0 }
 0x9d0   :  { %v9453_v43 = vpop.f32.mrb[20].mxu0 }
 0x9d1   :  { %v9455_v6 = vpop.f32.mrb[21].mxu0 }
 0x9d4   :  { %v9457_v60 = vpop.f32.mrb[22].mxu0 }
 0x9d5   :  { %v9459_v62 = vpop.f32.mrb[23].mxu0 }
 0xa05   :  { %v9461_v7 = vpop.f32.mrb[24].mxu0 }
 0xa06   :  { %v9463_v24 = vpop.f32.mrb[25].mxu0 }
 0xa17   :  { %v7229_v17 = vpop.f32.mrb[26].mxu0 }
 0xa18   :  { %v1774_v23 = vmul.f32 0.35355338, %v7229_v17  ;;  %v1734_v55 = vpop.f32.mrb[27].mxu0 }
 0xa19   :  { %v1773_v38 = vmul.f32 0.35355338, %v1734_v55 }
 0xa1a   :  { %v1782_v27 = vadd.f32 %v1774_v23, %v9144_v1 }
 0xa1b   :  { %v7232_v44 = vpop.f32.mrb[28].mxu0  ;;  %v1781_v5 = vadd.f32 %v1773_v38, %v9149_v12 }
 0xa1c   :  { %v1776_v29 = vmul.f32 0.35355338, %v7232_v44  ;;  %v1744_v21 = vpop.f32.mrb[29].mxu0  ;;  %v1792_v22 = vsel %vm152_vm3, %v1782_v27, -inf }
 0xa1d   :  { %v1775_v45 = vmul.f32 0.35355338, %v1744_v21  ;;  %1793 = vmax.xlane.f32.xlu1 %v1792_v22  ;;  %v1789_v2 = vsel %vm152_vm3, %v1781_v5, -inf }
 0xa1e   :  { %1790 = vmax.xlane.f32.xlu0 %v1789_v2  ;;  %v9470_v37 = vadd.f32 %v1776_v29, %v9155_v19 }
 0xa1f   :  { %v7235_v56 = vpop.f32.mrb[30].mxu0  ;;  %v1783_v23 = vadd.f32 %v1775_v45, %v9167_v39 }
 0xa20   :  { %v1754_v10 = vpop.f32.mrb[31].mxu0  ;;  %v1798_v40 = vsel %vm152_vm3, %v9470_v37, -inf  ;;  %v1778_v17 = vmul.f32 0.35355338, %v7235_v56 }
 0xa21   :  { %v1795_v21 = vsel %vm152_vm3, %v1783_v23, -inf  ;;  %v1777_v45 = vmul.f32 0.35355338, %v1754_v10 }
 0xa22   :  { %1799 = vmax.xlane.f32.xlu0 %v1798_v40  ;;  %v1786_v22 = vadd.f32 %v1778_v17, %v9174_v47 }
 0xa23   :  { %v7238_v55 = vpop.f32.mrb[32].mxu0  ;;  %v1785_v40 = vadd.f32 %v1777_v45, %v9195_v14 }
 0xa24   :  { %v1764_v38 = vpop.f32.mrb[33].mxu0  ;;  %v1780_v44 = vmul.f32 0.35355338, %v7238_v55  ;;  %v1804_v29 = vsel %vm152_vm3, %v1786_v22, -inf }
 0xa25   :  { %v1801_v17 = vsel %vm152_vm3, %v1785_v40, -inf  ;;  %v1779_v55 = vmul.f32 0.35355338, %v1764_v38 }
 0xa26   :  { %1796 = vmax.xlane.f32.xlu0 %v1795_v21  ;;  %v9479_v2 = vadd.f32 %v1780_v44, %v9180_v59 }
 0xa27   :  { %v9492_v44 = vadd.f32 %v1779_v55, %v9207_v31 }
 0xa28   :  { %v1810_v56 = vsel %vm152_vm3, %v9479_v2, -inf }
 0xa29   :  { %v1807_v21 = vsel %vm152_vm3, %v9492_v44, -inf }
 0xa2a   :  { %1805 = vmax.xlane.f32.xlu0 %v1804_v29 }
 0xa2e   :  { %8340 = vrot.lane.b32.xlu1 %v9064_v16, %s8919_s16  ;;  %1811 = vmax.xlane.f32.xlu0 %v1810_v56 }
 0xa44   :  { %8345 = vrot.lane.b32.xlu0 %v9074_v25, %s8919_s16 }
 0xa52   :  { %1802 = vmax.xlane.f32.xlu1 %v1801_v17 }
 0xa63   :  { %8350 = vrot.lane.b32.xlu1 %v9092_v32, %s8919_s16 }
 0xa87   :  { %1808 = vmax.xlane.f32.xlu1 %v1807_v21 }
 0xa98   :  { %8355 = vrot.lane.b32.xlu1 %v9104_v36, %s8919_s16 }
 0xaaa   :  { %v1794_v10 = vpop.xlane.xlu1 %1793 }
 0xaab   :  { %v1814_v29 = vsub.f32 %v1782_v27, %v1794_v10  ;;  %v1791_v56 = vpop.xlane.xlu0 %1790 }
 0xaac   :  { %v1813_v45 = vsub.f32 %v1781_v5, %v1791_v56 }
 0xaad   :  { %v1823_v53 = vmul.f32 1.442695, %v1814_v29 }
 0xaae   :  { %v1821_v17 = vmul.f32 1.442695, %v1813_v45  ;;  %v8341_v46 = vpop.permute.xlu1 %8340 }
 0xaaf   :  { %8623 = vpow2.f32 %v1823_v53  ;;  %v8343_v8 = vunpack.i.h.bf16 %v8341_v46  ;;  %v8342_v38 = vunpack.i.l.bf16 %v8341_v46  ;;  %v1800_v9 = vpop.xlane.xlu0 %1799 }
 0xab0   :  { %8625 = vpow2.f32 %v1821_v17  ;;  %v1816_v45 = vsub.f32 %v9470_v37, %v1800_v9 }
 0xab1   :  { %v7891_v55 = vpack.c.bf16 %v8343_v8, %v8342_v38 }
 0xab2   :  { %v1827_v38 = vmul.f32 1.442695, %v1816_v45 }
 0xab3   :  { %7892 = vmatprep.subr.bf16.mxu1 %v7891_v55  ;;  %v1797_v0 = vpop.xlane.xlu0 %1796 }
 0xab4   :  { %v1815_v4 = vsub.f32 %v1783_v23, %v1797_v0  ;;  %7894 = vmatpush3.bf16.msra.mxu1 %v7891_v55 }
 0xab6   :  { %v1825_v21 = vmul.f32 1.442695, %v1815_v4 }
 0xab7   :  { %v1806_v61 = vpop.xlane.xlu0 %1805 }
 0xab8   :  { %8627 = vpow2.f32 %v1825_v21  ;;  %v1818_v58 = vsub.f32 %v1786_v22, %v1806_v61 }
 0xab9   :  { %v9498_v27 = vpop.eup %8623 }
 0xaba   :  { %v9500_v5 = vpop.eup %8625  ;;  %v1831_v10 = vmul.f32 1.442695, %v1818_v58  ;;  %v1840_v53 = vsel %vm152_vm3, %v9498_v27, 0.0 }
 0xabb   :  { %1841 = vadd.xlane.f32.xlu0 %v1840_v53  ;;  %v1812_v46 = vpop.xlane.xlu0 %1811  ;;  %v1837_v8 = vsel %vm152_vm3, %v9500_v5, 0.0 }
 0xabc   :  { %8629 = vpow2.f32 %v1831_v10  ;;  %1838 = vadd.xlane.f32.xlu1 %v1837_v8  ;;  %v1820_v17 = vsub.f32 %v9479_v2, %v1812_v46 }
 0xabd   :  { %8631 = vpow2.f32 %v1827_v38 }
 0xabe   :  { %v1835_v10 = vmul.f32 1.442695, %v1820_v17 }
 0xabf   :  { %v8346_v0 = vpop.permute.xlu0 %8345 }
 0xac0   :  { %v8348_v4 = vunpack.i.h.bf16 %v8346_v0  ;;  %v8347_v23 = vunpack.i.l.bf16 %v8346_v0 }
 0xac2   :  { %v9506_v29 = vpop.eup %8627  ;;  %v7895_v61 = vpack.c.bf16 %v8348_v4, %v8347_v23 }
 0xac3   :  { %v1843_v22 = vsel %vm152_vm3, %v9506_v29, 0.0 }
 0xac4   :  { %1844 = vadd.xlane.f32.xlu0 %v1843_v22  ;;  %7896 = vmatprep.subr.bf16.mxu1 %v7895_v61 }
 0xac5   :  { %7898 = vmatpush3.bf16.msra.mxu1 %v7895_v61 }
 0xac6   :  { %v9510_v58 = vpop.eup %8629 }
 0xac7   :  { %v1852_v56 = vsel %vm152_vm3, %v9510_v58, 0.0  ;;  %v8632_v61 = vpop.eup %8631 }
 0xac8   :  { %1853 = vadd.xlane.f32.xlu0 %v1852_v56  ;;  %v1846_v2 = vsel %vm152_vm3, %v8632_v61, 0.0 }
 0xacd   :  { %8360 = vrot.lane.b32.xlu1 %v9064_v16, %s8920_s17 }
 0xadf   :  { %v1803_v55 = vpop.xlane.xlu1 %1802 }
 0xae0   :  { %v1817_v21 = vsub.f32 %v1785_v40, %v1803_v55 }
 0xae2   :  { %v1829_v53 = vmul.f32 1.442695, %v1817_v21 }
 0xae3   :  { %v8351_v8 = vpop.permute.xlu1 %8350 }
 0xae4   :  { %8633 = vpow2.f32 %v1829_v53  ;;  %v8353_v0 = vunpack.i.h.bf16 %v8351_v8  ;;  %v8352_v4 = vunpack.i.l.bf16 %v8351_v8 }
 0xae5   :  { %8635 = vpow2.f32 %v1835_v10 }
 0xae6   :  { %v7899_v23 = vpack.c.bf16 %v8353_v0, %v8352_v4 }
 0xae8   :  { %7900 = vmatprep.subr.bf16.mxu1 %v7899_v23 }
 0xae9   :  { %7902 = vmatpush3.bf16.msra.mxu1 %v7899_v23 }
 0xaee   :  { %v9518_v22 = vpop.eup %8633 }
 0xaef   :  { %v1849_v9 = vsel %vm152_vm3, %v9518_v22, 0.0  ;;  %v9522_v37 = vpop.eup %8635 }
 0xaf0   :  { %1850 = vadd.xlane.f32.xlu0 %v1849_v9  ;;  %v1858_v40 = vsel %vm152_vm3, %v9522_v37, 0.0 }
 0xaf1   :  { %1847 = vadd.xlane.f32.xlu1 %v1846_v2 }
 0xaf4   :  { %1859 = vadd.xlane.f32.xlu0 %v1858_v40 }
 0xb02   :  { %8370 = vrot.lane.b32.xlu1 %v9092_v32, %s8920_s17 }
 0xb06   :  { %8375 = vrot.lane.b32.xlu1 %v9104_v36, %s8920_s17 }
 0xb0a   :  { %2030 = vrot.lane.b32.xlu1 %v9058_v15, %s8912_s8 }
 0xb0e   :  { %2032 = vrot.lane.b32.xlu1 %v9056_v13, %s8912_s8 }
 0xb12   :  { %2036 = vrot.lane.b32.xlu1 %v9068_v18, %s8912_s8 }
 0xb14   :  { %v1809_v46 = vpop.xlane.xlu1 %1808 }
 0xb15   :  { %v1819_v56 = vsub.f32 %v9492_v44, %v1809_v46 }
 0xb16   :  { %2040 = vrot.lane.b32.xlu1 %v9076_v26, %s8912_s8 }
 0xb17   :  { %v1833_v45 = vmul.f32 1.442695, %v1819_v56 }
 0xb18   :  { %v8356_v17 = vpop.permute.xlu1 %8355 }
 0xb19   :  { %8637 = vpow2.f32 %v1833_v45  ;;  %v8358_v38 = vunpack.i.h.bf16 %v8356_v17  ;;  %v8357_v55 = vunpack.i.l.bf16 %v8356_v17 }
 0xb1a   :  { %2044 = vrot.lane.b32.xlu1 %v9094_v33, %s8912_s8 }
 0xb1b   :  { %v7903_v15 = vpack.c.bf16 %v8358_v38, %v8357_v55 }
 0xb1d   :  { %7904 = vmatprep.subr.bf16.mxu1 %v7903_v15 }
 0xb1e   :  { %7906 = vmatpush3.bf16.msra.mxu1 %v7903_v15 }
 0xb23   :  { %v8638_v13 = vpop.eup %8637 }
 0xb24   :  { %v1855_v18 = vsel %vm152_vm3, %v8638_v13, 0.0 }
 0xb25   :  { %1856 = vadd.xlane.f32.xlu0 %v1855_v18 }
 0xb3b   :  { %8365 = vrot.lane.b32.xlu0 %v9074_v25, %s8920_s17 }
 0xb3f   :  { %2034 = vrot.lane.b32.xlu0 %v9070_v20, %s8912_s8 }
 0xb43   :  { %2038 = vrot.lane.b32.xlu0 %v9084_v30, %s8912_s8 }
 0xb47   :  { %2042 = vrot.lane.b32.xlu0 %v9098_v35, %s8912_s8 }
 0xb48   :  { %v1842_v26 = vpop.xlane.xlu0 %1841 }
 0xb49   :  { %8639 = vrcp.f32 %v1842_v26  ;;  %v1839_v33 = vpop.xlane.xlu1 %1838 }
 0xb4a   :  { %8641 = vrcp.f32 %v1839_v33 }
 0xb4d   :  { %v8361_v44 = vpop.permute.xlu1 %8360 }
 0xb4e   :  { %v8363_v21 = vunpack.i.h.bf16 %v8361_v44  ;;  %v8362_v10 = vunpack.i.l.bf16 %v8361_v44 }
 0xb50   :  { %v7907_v53 = vpack.c.bf16 %v8363_v21, %v8362_v10 }
 0xb51   :  { %v1845_v8 = vpop.xlane.xlu0 %1844 }
 0xb52   :  { %8643 = vrcp.f32 %v1845_v8  ;;  %7909 = vmatprep.subr.msk.bf16.mxu1 %vm9080_vm8, %v7907_v53 }
 0xb53   :  { %v8640_v20 = vpop.eup %8639 }
 0xb54   :  { %v8642_v0 = vpop.eup %8641  ;;  %v1870_v4 = vmul.f32 %v8640_v20, %v9498_v27 }
 0xb55   :  { %v1869_v30 = vmul.f32 %v8642_v0, %v9500_v5  ;;  %v1854_v9 = vpop.xlane.xlu0 %1853 }
 0xb57   :  { %7255 = vmatprep.mubr.msk.f32.mxu1 %vm152_vm3, %v1869_v30 }
 0xb58   :  { %7256 = vmatmul.mubr.msk.f32.vlgmr.msra.gmra.mrb[24].mxu1 %vm152_vm3, %v1870_v4 }
 0xb59   :  { %7912 = vmatpush3.bf16.xpose.msk.msra.mxu1 %vm9080_vm8, %v7907_v53 }
 0xb5c   :  { %v8644_v35 = vpop.eup %8643 }
 0xb5d   :  { %v1871_v23 = vmul.f32 %v8644_v35, %v9506_v29 }
 0xb5f   :  { %7258 = vmatprep.mubr.msk.f32.mxu1 %vm152_vm3, %v1871_v23 }
 0xb7d   :  { %v1851_v2 = vpop.xlane.xlu0 %1850 }
 0xb7e   :  { %8645 = vrcp.f32 %v1851_v2  ;;  %v1848_v40 = vpop.xlane.xlu1 %1847 }
 0xb7f   :  { %8647 = vrcp.f32 %v1848_v40 }
 0xb80   :  { %8649 = vrcp.f32 %v1854_v9 }
 0xb81   :  { %v1860_v17 = vpop.xlane.xlu0 %1859 }
 0xb82   :  { %8651 = vrcp.f32 %v1860_v17  ;;  %v8371_v55 = vpop.permute.xlu1 %8370 }
 0xb83   :  { %v8373_v18 = vunpack.i.h.bf16 %v8371_v55  ;;  %v8372_v26 = vunpack.i.l.bf16 %v8371_v55 }
 0xb86   :  { %v8376_v21 = vpop.permute.xlu1 %8375 }
 0xb87   :  { %v8378_v8 = vunpack.i.h.bf16 %v8376_v21  ;;  %v8377_v20 = vunpack.i.l.bf16 %v8376_v21 }
 0xb88   :  { %v8646_v5 = vpop.eup %8645 }
 0xb89   :  { %v8648_v27 = vpop.eup %8647  ;;  %v1873_v45 = vmul.f32 %v8646_v5, %v9518_v22  ;;  %v7919_v22 = vpack.c.bf16 %v8373_v18, %v8372_v26  ;;  %v7925_v4 = vpack.c.bf16 %v8378_v8, %v8377_v20 }
 0xb8a   :  { %v1872_v46 = vmul.f32 %v8648_v27, %v8632_v61  ;;  %v8650_v56 = vpop.eup %8649  ;;  %v2031_v30 = vpop.permute.xlu1 %2030 }
 0xb8b   :  { %v1874_v29 = vmul.f32 %v8650_v56, %v9510_v58 }
 0xb8c   :  { %7259 = vmatmul.mubr.msk.f32.gmra.mrb[26].mxu1 %vm152_vm3, %v1872_v46  ;;  %v8652_v10 = vpop.eup %8651 }
 0xb8d   :  { %7261 = vmatprep.mubr.msk.f32.mxu1 %vm152_vm3, %v1873_v45  ;;  %v1876_v0 = vmul.f32 %v8652_v10, %v9522_v37 }
 0xb8e   :  { %v2033_v35 = vpop.permute.xlu1 %2032 }
 0xb90   :  { %7262 = vmatmul.mubr.msk.f32.gmra.mrb[28].mxu1 %vm152_vm3, %v1874_v29 }
 0xb92   :  { %v2037_v37 = vpop.permute.xlu1 %2036 }
 0xb96   :  { %v2041_v9 = vpop.permute.xlu1 %2040 }
 0xb9a   :  { %v2045_v40 = vpop.permute.xlu1 %2044 }
 0xbb2   :  { %v1857_v38 = vpop.xlane.xlu0 %1856 }
 0xbb3   :  { %8653 = vrcp.f32 %v1857_v38 }
 0xbb6   :  { %v8366_v15 = vpop.permute.xlu0 %8365 }
 0xbb7   :  { %v8368_v61 = vunpack.i.h.bf16 %v8366_v15  ;;  %v8367_v33 = vunpack.i.l.bf16 %v8366_v15 }
 0xbb9   :  { %v7913_v44 = vpack.c.bf16 %v8368_v61, %v8367_v33 }
 0xbbb   :  { %7915 = vmatprep.subr.msk.bf16.mxu1 %vm9080_vm8, %v7913_v44 }
 0xbbc   :  { %7918 = vmatpush3.bf16.xpose.msk.msra.mxu1 %vm9080_vm8, %v7913_v44 }
 0xbbd   :  { %v8654_v58 = vpop.eup %8653  ;;  %7921 = vmatprep.subr.msk.bf16.mxu1 %vm9080_vm8, %v7919_v22 }
 0xbbe   :  { %v1875_v53 = vmul.f32 %v8654_v58, %v8638_v13  ;;  %v2035_v13 = vpop.permute.xlu0 %2034 }
 0xbc0   :  { %7264 = vmatprep.mubr.msk.f32.mxu1 %vm152_vm3, %v1875_v53 }
 0xbc1   :  { %7265 = vmatmul.mubr.msk.f32.gmra.mrb[30].mxu1 %vm152_vm3, %v1876_v0 }
 0xbc2   :  { %7283 = vmatprep.mubr.msk.f32.mxu1 %vm70_vm0, %v2031_v30  ;;  %v2039_v23 = vpop.permute.xlu0 %2038 }
 0xbc4   :  { %7924 = vmatpush3.bf16.xpose.msk.msra.mxu1 %vm9080_vm8, %v7919_v22 }
 0xbc5   :  { %7927 = vmatprep.subr.msk.bf16.mxu1 %vm9080_vm8, %v7925_v4 }
 0xbc6   :  { %v2043_v2 = vpop.permute.xlu0 %2042 }
 0xbcc   :  { %7930 = vmatpush3.bf16.xpose.msk.msra.mxu1 %vm9080_vm8, %v7925_v4 }
 0xbd3   :  { %7284 = vmatmul.mubr.msk.f32.vlgmr.msra.gmra.mrb[32].mxu1 %vm70_vm0, %v2033_v35 }
 0xbd4   :  { %7286 = vmatprep.mubr.msk.f32.mxu1 %vm70_vm0, %v2035_v13 }
 0xbd7   :  { %7287 = vmatmul.mubr.msk.f32.gmra.mrb[34].mxu1 %vm70_vm0, %v2037_v37 }
 0xbd8   :  { %7289 = vmatprep.mubr.msk.f32.mxu1 %vm70_vm0, %v2039_v23 }
 0xbdb   :  { %7290 = vmatmul.mubr.msk.f32.gmra.mrb[36].mxu1 %vm70_vm0, %v2041_v9 }
 0xbdc   :  { %7292 = vmatprep.mubr.msk.f32.mxu1 %vm70_vm0, %v2043_v2 }
 0xbdf   :  { %7293 = vmatmul.mubr.msk.f32.gmra.mrb[38].mxu1 %vm70_vm0, %v2045_v40 }
 0xc2b   :  { %v9589_v5 = vpop.f32.mrb[24].mxu1 }
 0xc2c   :  { %v9591_v27 = vpop.f32.mrb[25].mxu1 }
 0xc5f   :  { %v9593_v46 = vpop.f32.mrb[26].mxu1 }
 0xc60   :  { %v9595_v56 = vpop.f32.mrb[27].mxu1 }
 0xc63   :  { %v9597_v45 = vpop.f32.mrb[28].mxu1 }
 0xc64   :  { %v9599_v29 = vpop.f32.mrb[29].mxu1 }
 0xc94   :  { %v9601_v17 = vpop.f32.mrb[30].mxu1 }
 0xc95   :  { %v9603_v38 = vpop.f32.mrb[31].mxu1 }
 0xca6   :  { %v7285_v55 = vpop.f32.mrb[32].mxu1 }
 0xca7   :  { %v2200_v15 = vmul.f32 0.35355338, %v7285_v55  ;;  %v2160_v18 = vpop.f32.mrb[33].mxu1 }
 0xca8   :  { %v2199_v26 = vmul.f32 0.35355338, %v2160_v18 }
 0xca9   :  { %v2208_v61 = vadd.f32 %v2200_v15, %v9144_v1 }
 0xcaa   :  { %v2207_v33 = vadd.f32 %v2199_v26, %v9149_v12  ;;  %v7288_v44 = vpop.f32.mrb[34].mxu1 }
 0xcab   :  { %v2202_v22 = vmul.f32 0.35355338, %v7288_v44  ;;  %v2170_v21 = vpop.f32.mrb[35].mxu1  ;;  %v2218_v10 = vsel %vm152_vm3, %v2208_v61, -inf }
 0xcac   :  { %v2201_v58 = vmul.f32 0.35355338, %v2170_v21  ;;  %2219 = vmax.xlane.f32.xlu1 %v2218_v10  ;;  %v2215_v53 = vsel %vm152_vm3, %v2207_v33, -inf }
 0xcad   :  { %v2210_v8 = vadd.f32 %v2202_v22, %v9155_v19  ;;  %2216 = vmax.xlane.f32.xlu0 %v2215_v53 }
 0xcae   :  { %v7291_v20 = vpop.f32.mrb[36].mxu1  ;;  %v2209_v0 = vadd.f32 %v2201_v58, %v9167_v39 }
 0xcaf   :  { %v2180_v30 = vpop.f32.mrb[37].mxu1  ;;  %v2224_v4 = vsel %vm152_vm3, %v2210_v8, -inf  ;;  %v2204_v35 = vmul.f32 0.35355338, %v7291_v20 }
 0xcb0   :  { %v2203_v13 = vmul.f32 0.35355338, %v2180_v30  ;;  %v2221_v2 = vsel %vm152_vm3, %v2209_v0, -inf }
 0xcb1   :  { %2225 = vmax.xlane.f32.xlu0 %v2224_v4  ;;  %v2212_v40 = vadd.f32 %v2204_v35, %v9174_v47 }
 0xcb2   :  { %v2211_v37 = vadd.f32 %v2203_v13, %v9195_v14  ;;  %v7294_v23 = vpop.f32.mrb[38].mxu1 }
 0xcb3   :  { %v2190_v9 = vpop.f32.mrb[39].mxu1  ;;  %v2206_v55 = vmul.f32 0.35355338, %v7294_v23  ;;  %v2230_v22 = vsel %vm152_vm3, %v2212_v40, -inf }
 0xcb4   :  { %v2205_v15 = vmul.f32 0.35355338, %v2190_v9  ;;  %v2227_v18 = vsel %vm152_vm3, %v2211_v37, -inf }
 0xcb5   :  { %2222 = vmax.xlane.f32.xlu0 %v2221_v2  ;;  %2228 = vmax.xlane.f32.xlu1 %v2227_v18  ;;  %v9620_v44 = vadd.f32 %v2206_v55, %v9180_v59 }
 0xcb6   :  { %v9617_v26 = vadd.f32 %v2205_v15, %v9207_v31 }
 0xcb7   :  { %v2236_v10 = vsel %vm152_vm3, %v9620_v44, -inf }
 0xcb8   :  { %v2233_v21 = vsel %vm152_vm3, %v9617_v26, -inf }
 0xcb9   :  { %2231 = vmax.xlane.f32.xlu0 %v2230_v22  ;;  %2234 = vmax.xlane.f32.xlu1 %v2233_v21 }
 0xcbd   :  { %2237 = vmax.xlane.f32.xlu0 %v2236_v10 }
 0xcca   :  { %8380 = vrot.lane.b32.xlu1 %v9064_v16, %s8921_s18 }
 0xcd3   :  { %8385 = vrot.lane.b32.xlu0 %v9074_v25, %s8921_s18 }
 0xd39   :  { %v2220_v58 = vpop.xlane.xlu1 %2219 }
 0xd3a   :  { %v2240_v53 = vsub.f32 %v2208_v61, %v2220_v58  ;;  %v2217_v20 = vpop.xlane.xlu0 %2216 }
 0xd3b   :  { %v2239_v30 = vsub.f32 %v2207_v33, %v2217_v20 }
 0xd3c   :  { %v2249_v4 = vmul.f32 1.442695, %v2240_v53 }
 0xd3d   :  { %v2247_v35 = vmul.f32 1.442695, %v2239_v30 }
 0xd3e   :  { %8655 = vpow2.f32 %v2249_v4  ;;  %v2226_v13 = vpop.xlane.xlu0 %2225 }
 0xd3f   :  { %8657 = vpow2.f32 %v2247_v35  ;;  %v2242_v23 = vsub.f32 %v2210_v8, %v2226_v13 }
 0xd41   :  { %v2253_v9 = vmul.f32 1.442695, %v2242_v23 }
 0xd42   :  { %v2223_v2 = vpop.xlane.xlu0 %2222  ;;  %v2229_v55 = vpop.xlane.xlu1 %2228 }
 0xd43   :  { %8659 = vpow2.f32 %v2253_v9  ;;  %v2241_v15 = vsub.f32 %v2209_v0, %v2223_v2  ;;  %v2243_v18 = vsub.f32 %v2211_v37, %v2229_v55 }
 0xd45   :  { %v2251_v16 = vmul.f32 1.442695, %v2241_v15  ;;  %v2255_v22 = vmul.f32 1.442695, %v2243_v18 }
 0xd46   :  { %v2232_v21 = vpop.xlane.xlu0 %2231  ;;  %v2235_v25 = vpop.xlane.xlu1 %2234 }
 0xd47   :  { %8661 = vpow2.f32 %v2251_v16  ;;  %v2244_v61 = vsub.f32 %v2212_v40, %v2232_v21 }
 0xd48   :  { %v9631_v10 = vpop.eup %8655  ;;  %8663 = vpow2.f32 %v2255_v22 }
 0xd49   :  { %v9633_v33 = vpop.eup %8657  ;;  %v2257_v58 = vmul.f32 1.442695, %v2244_v61  ;;  %v2266_v8 = vsel %vm152_vm3, %v9631_v10, 0.0  ;;  %v2245_v61 = vsub.f32 %v9617_v26, %v2235_v25 }
 0xd4a   :  { %2267 = vadd.xlane.f32.xlu0 %v2266_v8  ;;  %v2238_v53 = vpop.xlane.xlu0 %2237  ;;  %v8381_v20 = vpop.permute.xlu1 %8380  ;;  %v2263_v0 = vsel %vm152_vm3, %v9633_v33, 0.0 }
 0xd4b   :  { %8665 = vpow2.f32 %v2257_v58  ;;  %v8383_v37 = vunpack.i.h.bf16 %v8381_v20  ;;  %v8382_v30 = vunpack.i.l.bf16 %v8381_v20  ;;  %2264 = vadd.xlane.f32.xlu1 %v2263_v0  ;;  %v2246_v58 = vsub.f32 %v9620_v44, %v2238_v53 }
 0xd4c   :  { %v2259_v8 = vmul.f32 1.442695, %v2245_v61 }
 0xd4d   :  { %v9639_v40 = vpop.eup %8659  ;;  %v7931_v4 = vpack.c.bf16 %v8383_v37, %v8382_v30  ;;  %v2261_v20 = vmul.f32 1.442695, %v2246_v58 }
 0xd4e   :  { %v8386_v35 = vpop.permute.xlu0 %8385  ;;  %v2272_v13 = vsel %vm152_vm3, %v9639_v40, 0.0  ;;  %8667 = vpow2.f32 %v2259_v8 }
 0xd4f   :  { %v8388_v23 = vunpack.i.h.bf16 %v8386_v35  ;;  %v8387_v9 = vunpack.i.l.bf16 %v8386_v35  ;;  %2273 = vadd.xlane.f32.xlu0 %v2272_v13  ;;  %7932 = vmatprep.subr.bf16.mxu0 %v7931_v4  ;;  %8669 = vpow2.f32 %v2261_v20 }
 0xd50   :  { %7934 = vmatpush3.bf16.msra.mxu0 %v7931_v4 }
 0xd51   :  { %v9643_v2 = vpop.eup %8661  ;;  %v7935_v55 = vpack.c.bf16 %v8388_v23, %v8387_v9 }
 0xd52   :  { %v2269_v15 = vsel %vm152_vm3, %v9643_v2, 0.0  ;;  %v9647_v18 = vpop.eup %8663 }
 0xd53   :  { %2270 = vadd.xlane.f32.xlu1 %v2269_v15  ;;  %7936 = vmatprep.subr.bf16.mxu0 %v7935_v55  ;;  %v2275_v21 = vsel %vm152_vm3, %v9647_v18, 0.0 }
 0xd54   :  { %7938 = vmatpush3.bf16.msra.mxu0 %v7935_v55 }
 0xd55   :  { %v9649_v16 = vpop.eup %8665 }
 0xd56   :  { %v2278_v22 = vsel %vm152_vm3, %v9649_v16, 0.0 }
 0xd57   :  { %2279 = vadd.xlane.f32.xlu0 %v2278_v22  ;;  %2276 = vadd.xlane.f32.xlu1 %v2275_v21 }
 0xd58   :  { %v9661_v0 = vpop.eup %8667 }
 0xd59   :  { %v9663_v37 = vpop.eup %8669 }
 0xd5a   :  { %v2284_v30 = vsel %vm152_vm3, %v9663_v37, 0.0 }
 0xd68   :  { %8390 = vrot.lane.b32.xlu1 %v9092_v32, %s8921_s18  ;;  %v2281_v32 = vsel %vm152_vm3, %v9661_v0, 0.0 }
 0xd6d   :  { %8395 = vrot.lane.b32.xlu0 %v9104_v36, %s8921_s18 }
 0xd8c   :  { %2285 = vadd.xlane.f32.xlu0 %v2284_v30  ;;  %2282 = vadd.xlane.f32.xlu1 %v2281_v32  ;;  %v2578_v30 = vld [vmem:[#allocation2 + $0x78] sm:$0xff]  ;;  %v2579_v32 = vld [vmem:[#allocation2 + $0x80] sm:$0xff] }
 0xd9d   :  { %2464 = vrot.lane.b32.xlu1 %v9451_v11, %s8907_s26 }
 0xda1   :  { %2496 = vrot.lane.b32.xlu1 %v9591_v27, %s8922_s19 }
 0xda2   :  { %2466 = vrot.lane.b32.xlu0 %v9449_v50, %s8907_s26 }
 0xda5   :  { %2498 = vrot.lane.b32.xlu1 %v9589_v5, %s8922_s19 }
 0xda6   :  { %2468 = vrot.lane.b32.xlu0 %v9455_v6, %s8907_s26 }
 0xda9   :  { %2470 = vrot.lane.b32.xlu1 %v9453_v43, %s8907_s26 }
 0xdaa   :  { %2500 = vrot.lane.b32.xlu0 %v9595_v56, %s8922_s19 }
 0xdad   :  { %2502 = vrot.lane.b32.xlu1 %v9593_v46, %s8922_s19 }
 0xdae   :  { %2472 = vrot.lane.b32.xlu0 %v9459_v62, %s8907_s26 }
 0xdb1   :  { %2474 = vrot.lane.b32.xlu1 %v9457_v60, %s8907_s26 }
 0xdd7   :  { %v2268_v50 = vpop.xlane.xlu0 %2267 }
 0xdd8   :  { %v2265_v36 = vpop.xlane.xlu1 %2264 }
 0xdd9   :  { %8671 = vrcp.f32 %v2265_v36  ;;  %v2580_v36 = vld [vmem:[#allocation2 + $0x88] sm:$0xff] }
 0xdda   :  { %8673 = vrcp.f32 %v2268_v50  ;;  %v7951_v50 = vpack.c.bf16 %v2580_v36, %v2579_v32 }
 0xddc   :  { %v2274_v11 = vpop.xlane.xlu0 %2273 }
 0xde0   :  { %v2271_v6 = vpop.xlane.xlu1 %2270 }
 0xde1   :  { %8675 = vrcp.f32 %v2271_v6 }
 0xde2   :  { %8677 = vrcp.f32 %v2274_v11 }
 0xde3   :  { %v8672_v5 = vpop.eup %8671 }
 0xde4   :  { %v2280_v27 = vpop.xlane.xlu0 %2279  ;;  %v2277_v43 = vpop.xlane.xlu1 %2276  ;;  %v2295_v26 = vmul.f32 %v8672_v5, %v9633_v33 }
 0xde5   :  { %8679 = vrcp.f32 %v2277_v43  ;;  %v8674_v35 = vpop.eup %8673 }
 0xde6   :  { %7311 = vmatprep.mubr.msk.f32.mxu0 %vm152_vm3, %v2295_v26  ;;  %8681 = vrcp.f32 %v2280_v27  ;;  %v2296_v13 = vmul.f32 %v8674_v35, %v9631_v10 }
 0xde8   :  { %v8396_v46 = vpop.permute.xlu0 %8395  ;;  %v8391_v56 = vpop.permute.xlu1 %8390 }
 0xde9   :  { %v8398_v62 = vunpack.i.h.bf16 %v8396_v46  ;;  %v8397_v44 = vunpack.i.l.bf16 %v8396_v46  ;;  %v8393_v25 = vunpack.i.h.bf16 %v8391_v56  ;;  %v8392_v60 = vunpack.i.l.bf16 %v8391_v56 }
 0xdeb   :  { %v7939_v53 = vpack.c.bf16 %v8393_v25, %v8392_v60  ;;  %v7943_v4 = vpack.c.bf16 %v8398_v62, %v8397_v44  ;;  %v8676_v33 = vpop.eup %8675 }
 0xdec   :  { %v8678_v23 = vpop.eup %8677  ;;  %v2297_v9 = vmul.f32 %v8676_v33, %v9643_v2 }
 0xded   :  { %7940 = vmatprep.subr.bf16.mxu0 %v7939_v53  ;;  %v2298_v15 = vmul.f32 %v8678_v23, %v9639_v40 }
 0xdee   :  { %7942 = vmatpush3.bf16.msra.mxu0 %v7939_v53 }
 0xdef   :  { %7944 = vmatprep.subr.bf16.mxu0 %v7943_v4  ;;  %v8680_v55 = vpop.eup %8679 }
 0xdf0   :  { %v8682_v22 = vpop.eup %8681  ;;  %v2299_v21 = vmul.f32 %v8680_v55, %v9647_v18  ;;  %v2577_v18 = vld [vmem:[#allocation2 + $0x70] sm:$0xff] }
 0xdf1   :  { %v2300_v61 = vmul.f32 %v8682_v22, %v9649_v16  ;;  %v7947_v16 = vpack.c.bf16 %v2578_v30, %v2577_v18 }
 0xdf2   :  { %7946 = vmatpush3.bf16.msra.mxu0 %v7943_v4 }
 0xdf3   :  { %7948 = vmatprep.subr.bf16.mxu0 %v7947_v16 }
 0xdf5   :  { %7312 = vmatmul.mubr.msk.f32.vlgmr.msra.gmra.mrb[34].mxu0 %vm152_vm3, %v2296_v13 }
 0xdf6   :  { %7314 = vmatprep.mubr.msk.f32.mxu0 %vm152_vm3, %v2297_v9  ;;  %7950 = vmatpush3.bf16.msra.mxu0 %v7947_v16 }
 0xdf7   :  { %7952 = vmatprep.subr.bf16.mxu0 %v7951_v50 }
 0xdf9   :  { %7315 = vmatmul.mubr.msk.f32.gmra.mrb[36].mxu0 %vm152_vm3, %v2298_v15 }
 0xdfa   :  { %7317 = vmatprep.mubr.msk.f32.mxu0 %vm152_vm3, %v2299_v21  ;;  %7954 = vmatpush3.bf16.msra.mxu0 %v7951_v50 }
 0xdfd   :  { %7318 = vmatmul.mubr.msk.f32.gmra.mrb[38].mxu0 %vm152_vm3, %v2300_v61 }
 0xe19   :  { %v2286_v10 = vpop.xlane.xlu0 %2285  ;;  %v2283_v2 = vpop.xlane.xlu1 %2282 }
 0xe1a   :  { %8683 = vrcp.f32 %v2286_v10 }
 0xe1b   :  { %8685 = vrcp.f32 %v2283_v2 }
 0xe24   :  { %v8684_v58 = vpop.eup %8683 }
 0xe25   :  { %v8686_v8 = vpop.eup %8685  ;;  %v2302_v20 = vmul.f32 %v8684_v58, %v9663_v37 }
 0xe26   :  { %v2301_v40 = vmul.f32 %v8686_v8, %v9661_v0 }
 0xe28   :  { %7320 = vmatprep.mubr.msk.f32.mxu0 %vm152_vm3, %v2301_v40 }
 0xe29   :  { %7321 = vmatmul.mubr.msk.f32.gmra.mrb[40].mxu0 %vm152_vm3, %v2302_v20 }
 0xec8   :  { %v7313_v11 = vpop.f32.mrb[34].mxu0 }
 0xec9   :  { %2530 = vrot.lane.b32.xlu1 %v7313_v11, %s8923_s20  ;;  %v2417_v37 = vpop.f32.mrb[35].mxu0 }
 0xeca   :  { %2528 = vrot.lane.b32.xlu0 %v2417_v37, %s8923_s20 }
 0xecc   :  { %v7316_v0 = vpop.f32.mrb[36].mxu0 }
 0xecd   :  { %2506 = vrot.lane.b32.xlu1 %v9597_v45, %s8922_s19  ;;  %v2427_v6 = vpop.f32.mrb[37].mxu0 }
 0xece   :  { %2504 = vrot.lane.b32.xlu0 %v9599_v29, %s8922_s19 }
 0xed0   :  { %v7319_v5 = vpop.f32.mrb[38].mxu0 }
 0xed1   :  { %2534 = vrot.lane.b32.xlu1 %v7316_v0, %s8923_s20  ;;  %v2437_v27 = vpop.f32.mrb[39].mxu0 }
 0xed2   :  { %2532 = vrot.lane.b32.xlu0 %v2427_v6, %s8923_s20 }
 0xed5   :  { %2478 = vrot.lane.b32.xlu1 %v9461_v7, %s8907_s26  ;;  %v2465_v7 = vpop.permute.xlu1 %2464 }
 0xed6   :  { %2476 = vrot.lane.b32.xlu0 %v9463_v24, %s8907_s26  ;;  %v2467_v24 = vpop.permute.xlu0 %2466 }
 0xed7   :  { %v2553_v53 = vsel %vm70_vm0, %v9309_v57, %v2467_v24 }
 0xed9   :  { %2538 = vrot.lane.b32.xlu1 %v7319_v5, %s8923_s20  ;;  %v2497_v43 = vpop.permute.xlu1 %2496 }
 0xeda   :  { %2536 = vrot.lane.b32.xlu0 %v2437_v27, %s8923_s20  ;;  %v2469_v56 = vpop.permute.xlu0 %2468 }
 0xedd   :  { %2510 = vrot.lane.b32.xlu1 %v9601_v17, %s8922_s19  ;;  %v2499_v26 = vpop.permute.xlu1 %2498  ;;  %v2552_v17 = vsel %vm70_vm0, %v9311_v42, %v2465_v7  ;;  %v2554_v42 = vsel %vm70_vm0, %v9315_v54, %v2469_v56 }
 0xede   :  { %2508 = vrot.lane.b32.xlu0 %v9603_v38, %s8922_s19  ;;  %v2501_v44 = vpop.permute.xlu0 %2500  ;;  %v2560_v4 = vsel %vm236_vm6, %v2552_v17, %v2497_v43  ;;  %v2561_v33 = vsel %vm236_vm6, %v2553_v53, %v2499_v26 }
 0xedf   :  { %v2562_v57 = vsel %vm236_vm6, %v2554_v42, %v2501_v44 }
 0xee1   :  { %v2471_v46 = vpop.permute.xlu1 %2470 }
 0xee2   :  { %v2473_v60 = vpop.permute.xlu0 %2472  ;;  %v2555_v22 = vsel %vm70_vm0, %v9313_v41, %v2471_v46 }
 0xee3   :  { %v2556_v54 = vsel %vm70_vm0, %v9319_v34, %v2473_v60 }
 0xee5   :  { %v2503_v62 = vpop.permute.xlu1 %2502 }
 0xee6   :  { %v2563_v61 = vsel %vm236_vm6, %v2555_v22, %v2503_v62 }
 0xee9   :  { %v2475_v25 = vpop.permute.xlu1 %2474 }
 0xeea   :  { %v2557_v41 = vsel %vm70_vm0, %v9317_v48, %v2475_v25 }
 0xefc   :  { %v7322_v45 = vpop.f32.mrb[40].mxu0 }
 0xefd   :  { %2542 = vrot.lane.b32.xlu1 %v7322_v45, %s8923_s20  ;;  %v2447_v29 = vpop.f32.mrb[41].mxu0  ;;  %v9766_v45 = vsub.s32 5, %v8964_v3 }
 0xefe   :  { %2540 = vrot.lane.b32.xlu0 %v2447_v29, %s8923_s20 }
 0xf3b   :  { %v2531_v38 = vpop.permute.xlu1 %2530 }
 0xf3c   :  { %v2529_v35 = vpop.permute.xlu0 %2528  ;;  %v2570_v23 = vsel %vm2568_vm2, %v2561_v33, %v2531_v38  ;;  %v10941_v38 = vld [vmem:[#allocation9_spill] sm:$0xff] }
 0xf3d   :  { %v2569_v13 = vsel %vm2568_vm2, %v2560_v4, %v2529_v35  ;;  %v10942_v4 = vld [vmem:[#allocation11_spill] sm:$0xff] }
 0xf3e   :  { %7331 = vmatprep.mubr.msk.f32.mxu0 %vm630_vm7, %v2569_v13 }
 0xf3f   :  { %v2507_v9 = vpop.permute.xlu1 %2506  ;;  %7332 = vmatmul.mubr.msk.f32.vlgmr.msra.gmra.mrb[42].mxu0 %vm630_vm7, %v2570_v23 }
 0xf40   :  { %v2505_v55 = vpop.permute.xlu0 %2504  ;;  %v2565_v30 = vsel %vm236_vm6, %v2557_v41, %v2507_v9 }
 0xf41   :  { %v2564_v40 = vsel %vm236_vm6, %v2556_v54, %v2505_v55  ;;  %v10943_v55 = vld [vmem:[#allocation13_spill] sm:$0xff] }
 0xf43   :  { %v2535_v15 = vpop.permute.xlu1 %2534 }
 0xf44   :  { %v2533_v21 = vpop.permute.xlu0 %2532  ;;  %v2572_v2 = vsel %vm2568_vm2, %v2563_v61, %v2535_v15  ;;  %v10944_v15 = vld [vmem:[#allocation12_spill] sm:$0xff] }
 0xf45   :  { %v2571_v10 = vsel %vm2568_vm2, %v2562_v57, %v2533_v21 }
 0xf46   :  { %7334 = vmatprep.mubr.msk.f32.mxu0 %vm630_vm7, %v2571_v10 }
 0xf47   :  { %v2479_v58 = vpop.permute.xlu1 %2478  ;;  %7335 = vmatmul.mubr.msk.f32.gmra.mrb[44].mxu0 %vm630_vm7, %v2572_v2 }
 0xf48   :  { %v2477_v8 = vpop.permute.xlu0 %2476  ;;  %v2559_v48 = vsel %vm70_vm0, %v9321_v63, %v2479_v58  ;;  %v9771_v63 = vld [vmem:[%s10899_s3] sm:$0xff] }
 0xf49   :  { %v2558_v34 = vsel %vm70_vm0, %v9323_v49, %v2477_v8  ;;  %v2713_v49 = vrot.slane %v9771_v63, %v9766_v45  ;;  %v10945_v8 = vld [vmem:[#allocation15_spill] sm:$0xff] }
 0xf4b   :  { %v2539_v20 = vpop.permute.xlu1 %2538 }
 0xf4c   :  { %v2537_v18 = vpop.permute.xlu0 %2536  ;;  %v2574_v16 = vsel %vm2568_vm2, %v2565_v30, %v2539_v20  ;;  %v10946_v20 = vld [vmem:[#allocation14_spill] sm:$0xff] }
 0xf4d   :  { %v2573_v32 = vsel %vm2568_vm2, %v2564_v40, %v2537_v18 }
 0xf4e   :  { %7337 = vmatprep.mubr.msk.f32.mxu0 %vm630_vm7, %v2573_v32 }
 0xf4f   :  { %7338 = vmatmul.mubr.msk.f32.gmra.mrb[46].mxu0 %vm630_vm7, %v2574_v16  ;;  %v2511_v36 = vpop.permute.xlu1 %2510 }
 0xf50   :  { %v2509_v50 = vpop.permute.xlu0 %2508  ;;  %v2567_v6 = vsel %vm236_vm6, %v2559_v48, %v2511_v36 }
 0xf51   :  { %v2566_v37 = vsel %vm236_vm6, %v2558_v34, %v2509_v50 }
 0xf6f   :  { %v2543_v11 = vpop.permute.xlu1 %2542 }
 0xf70   :  { %v2541_v0 = vpop.permute.xlu0 %2540  ;;  %v2576_v27 = vsel %vm2568_vm2, %v2567_v6, %v2543_v11 }
 0xf71   :  { %v2575_v5 = vsel %vm2568_vm2, %v2566_v37, %v2541_v0 }
 0xf72   :  { %7340 = vmatprep.mubr.msk.f32.mxu0 %vm630_vm7, %v2575_v5 }
 0xf73   :  { %7341 = vmatmul.mubr.msk.f32.gmra.mrb[48].mxu0 %vm630_vm7, %v2576_v27 }
0x1012   :  { %v7333_v29 = vpop.f32.mrb[42].mxu0 }
0x1013   :  { %v2715_v7 = vadd.f32 %v7333_v29, %v2713_v49  ;;  %v2671_v43 = vpop.f32.mrb[43].mxu0 }
0x1014   :  { %v2714_v26 = vadd.f32 %v2713_v49, %v2671_v43 }
0x1015   :  { %v2723_v24 = vadd.f32 %v2715_v7, %v9010_v52 }
0x1016   :  { %v2722_v46 = vadd.f32 %v2714_v26, %v9008_v51 }
0x1017   :  { %v2733_v56 = vsel %vm630_vm7, %v2723_v24, 0.0 }
0x1018   :  { %2734 = vadd.xlane.f32.xlu1 %v2733_v56  ;;  %v2730_v62 = vsel %vm630_vm7, %v2722_v46, 0.0 }
0x1019   :  { %2731 = vadd.xlane.f32.xlu0 %v2730_v62 }
0x101a   :  { %v7336_v44 = vpop.f32.mrb[44].mxu0 }
0x101b   :  { %v2681_v25 = vpop.f32.mrb[45].mxu0  ;;  %v2717_v60 = vadd.f32 %v7336_v44, %v2713_v49 }
0x101c   :  { %v2716_v17 = vadd.f32 %v2713_v49, %v2681_v25 }
0x101d   :  { %v2725_v35 = vadd.f32 %v2717_v60, %v10942_v4 }
0x101e   :  { %v2724_v53 = vadd.f32 %v2716_v17, %v10941_v38 }
0x101f   :  { %v2739_v9 = vsel %vm630_vm7, %v2725_v35, 0.0 }
0x1020   :  { %v2736_v33 = vsel %vm630_vm7, %v2724_v53, 0.0 }
0x1021   :  { %2737 = vadd.xlane.f32.xlu0 %v2736_v33  ;;  %v2859_v33 = vld [vmem:[#allocation2 + $0x90] sm:$0xff] }
0x1022   :  { %v7339_v52 = vpop.f32.mrb[46].mxu0 }
0x1023   :  { %v2719_v13 = vadd.f32 %v7339_v52, %v2713_v49  ;;  %v2691_v51 = vpop.f32.mrb[47].mxu0  ;;  %v2860_v52 = vld [vmem:[#allocation2 + $0x98] sm:$0xff] }
0x1024   :  { %v2718_v23 = vadd.f32 %v2713_v49, %v2691_v51  ;;  %v2861_v51 = vld [vmem:[#allocation2 + $0xa0] sm:$0xff] }
0x1025   :  { %v2727_v42 = vadd.f32 %v2719_v13, %v10943_v55  ;;  %2740 = vadd.xlane.f32.xlu0 %v2739_v9  ;;  %v7955_v13 = vpack.c.bf16 %v2860_v52, %v2859_v33 }
0x1026   :  { %v2726_v57 = vadd.f32 %v2718_v23, %v10944_v15  ;;  %v2862_v23 = vld [vmem:[#allocation2 + $0xa8] sm:$0xff] }
0x1027   :  { %v2745_v22 = vsel %vm630_vm7, %v2727_v42, 0.0  ;;  %7956 = vmatprep.subr.bf16.mxu1 %v7955_v13  ;;  %v7959_v9 = vpack.c.bf16 %v2862_v23, %v2861_v51 }
0x1028   :  { %v2742_v21 = vsel %vm630_vm7, %v2726_v57, 0.0  ;;  %7958 = vmatpush3.bf16.msra.mxu1 %v7955_v13 }
0x1029   :  { %2746 = vadd.xlane.f32.xlu0 %v2745_v22  ;;  %2743 = vadd.xlane.f32.xlu1 %v2742_v21 }
0x102a   :  { %7960 = vmatprep.subr.bf16.mxu1 %v7959_v9 }
0x102c   :  { %7962 = vmatpush3.bf16.msra.mxu1 %v7959_v9 }
0x1046   :  { %v7342_v61 = vpop.f32.mrb[48].mxu0 }
0x1047   :  { %v2721_v10 = vadd.f32 %v7342_v61, %v2713_v49  ;;  %v2701_v2 = vpop.f32.mrb[49].mxu0 }
0x1048   :  { %v2720_v58 = vadd.f32 %v2713_v49, %v2701_v2 }
0x1049   :  { %v2729_v54 = vadd.f32 %v2721_v10, %v10945_v8  ;;  %v3004_v8 = vld [vmem:[#allocation2 + $0xb0] sm:$0xff] }
0x104a   :  { %v2728_v41 = vadd.f32 %v2720_v58, %v10946_v20  ;;  %v3005_v20 = vld [vmem:[#allocation2 + $0xb8] sm:$0xff] }
0x104b   :  { %v2751_v40 = vsel %vm630_vm7, %v2729_v54, 0.0 }
0x104c   :  { %2752 = vadd.xlane.f32.xlu0 %v2751_v40  ;;  %v2748_v18 = vsel %vm630_vm7, %v2728_v41, 0.0  ;;  %v3006_v40 = vld [vmem:[#allocation2 + $0xc0] sm:$0xff] }
0x104d   :  { %2749 = vadd.xlane.f32.xlu1 %v2748_v18  ;;  %v7963_v18 = vpack.c.bf16 %v3005_v20, %v3004_v8 }
0x104f   :  { %7964 = vmatprep.subr.bf16.mxu0 %v7963_v18 }
0x1050   :  { %7966 = vmatpush3.bf16.msra.mxu0 %v7963_v18 }
0x10a5   :  { %v2735_v30 = vpop.xlane.xlu1 %2734 }
0x10a6   :  { %v2756_v32 = vmul.f32 0.03125, %v2735_v30  ;;  %v2732_v16 = vpop.xlane.xlu0 %2731 }
0x10a7   :  { %v2755_v36 = vmul.f32 0.03125, %v2732_v16 }
0x10a8   :  { %v9791_v50 = vsub.f32 %v2723_v24, %v2756_v32  ;;  %v3009_v32 = vld [vmem:[#allocation2 + $0xd8] sm:$0xff] }
0x10a9   :  { %v9793_v34 = vsub.f32 %v2722_v46, %v2755_v36 }
0x10aa   :  { %v2772_v11 = vmul.f32 %v9791_v50, %v9791_v50 }
0x10ab   :  { %v2771_v48 = vmul.f32 %v9793_v34, %v9793_v34 }
0x10ac   :  { %v2782_v37 = vsel %vm630_vm7, %v2772_v11, 0.0 }
0x10ad   :  { %2783 = vadd.xlane.f32.xlu0 %v2782_v37  ;;  %v2779_v0 = vsel %vm630_vm7, %v2771_v48, 0.0 }
0x10ae   :  { %v2738_v6 = vpop.xlane.xlu0 %2737  ;;  %2780 = vadd.xlane.f32.xlu1 %v2779_v0 }
0x10af   :  { %v2757_v5 = vmul.f32 0.03125, %v2738_v6 }
0x10b1   :  { %v9801_v27 = vsub.f32 %v2724_v53, %v2757_v5 }
0x10b2   :  { %v2741_v49 = vpop.xlane.xlu0 %2740 }
0x10b3   :  { %v2758_v29 = vmul.f32 0.03125, %v2741_v49  ;;  %v2773_v7 = vmul.f32 %v9801_v27, %v9801_v27 }
0x10b5   :  { %v9805_v43 = vsub.f32 %v2725_v35, %v2758_v29  ;;  %v2785_v26 = vsel %vm630_vm7, %v2773_v7, 0.0  ;;  %v9834_v29 = vld [vmem:[%s10899_s3 + $0x8] sm:$0xff] }
0x10b6   :  { %v2747_v24 = vpop.xlane.xlu0 %2746  ;;  %v2744_v46 = vpop.xlane.xlu1 %2743  ;;  %2786 = vadd.xlane.f32.xlu1 %v2785_v26 }
0x10b7   :  { %v2760_v56 = vmul.f32 0.03125, %v2747_v24  ;;  %v2759_v62 = vmul.f32 0.03125, %v2744_v46  ;;  %v2774_v44 = vmul.f32 %v9805_v43, %v9805_v43  ;;  %v10947_v24 = vld [vmem:[#allocation6_spill] sm:$0xff] }
0x10b8   :  { %v2838_v46 = vrot.slane %v9834_v29, %v10947_v24 }
0x10b9   :  { %v9810_v25 = vsub.f32 %v2727_v42, %v2760_v56  ;;  %v9812_v60 = vsub.f32 %v2726_v57, %v2759_v62  ;;  %v2788_v17 = vsel %vm630_vm7, %v2774_v44, 0.0 }
0x10ba   :  { %2789 = vadd.xlane.f32.xlu0 %v2788_v17  ;;  %v10948_v17 = vld [vmem:[#allocation7_spill] sm:$0xff] }
0x10bb   :  { %v2776_v38 = vmul.f32 %v9810_v25, %v9810_v25  ;;  %v2775_v53 = vmul.f32 %v9812_v60, %v9812_v60 }
0x10bd   :  { %v2794_v4 = vsel %vm630_vm7, %v2776_v38, 0.0  ;;  %v2791_v35 = vsel %vm630_vm7, %v2775_v53, 0.0  ;;  %v2850_v38 = vrot.slane %v9834_v29, %v10948_v17 }
0x10be   :  { %2795 = vadd.xlane.f32.xlu0 %v2794_v4  ;;  %2792 = vadd.xlane.f32.xlu1 %v2791_v35 }
0x10d9   :  { %v2753_v55 = vpop.xlane.xlu0 %2752 }
0x10da   :  { %v2762_v42 = vmul.f32 0.03125, %v2753_v55  ;;  %v2750_v15 = vpop.xlane.xlu1 %2749 }
0x10db   :  { %v2761_v57 = vmul.f32 0.03125, %v2750_v15 }
0x10dc   :  { %v9821_v22 = vsub.f32 %v2729_v54, %v2762_v42  ;;  %v3007_v54 = vld [vmem:[#allocation2 + $0xc8] sm:$0xff] }
0x10dd   :  { %v9823_v21 = vsub.f32 %v2728_v41, %v2761_v57  ;;  %v7967_v30 = vpack.c.bf16 %v3007_v54, %v3006_v40  ;;  %v3008_v41 = vld [vmem:[#allocation2 + $0xd0] sm:$0xff] }
0x10de   :  { %v2778_v61 = vmul.f32 %v9821_v22, %v9821_v22  ;;  %v7971_v16 = vpack.c.bf16 %v3009_v32, %v3008_v41 }
0x10df   :  { %v2777_v10 = vmul.f32 %v9823_v21, %v9823_v21  ;;  %7968 = vmatprep.subr.bf16.mxu0 %v7967_v30 }
0x10e0   :  { %v2800_v2 = vsel %vm630_vm7, %v2778_v61, 0.0  ;;  %7970 = vmatpush3.bf16.msra.mxu0 %v7967_v30 }
0x10e1   :  { %2801 = vadd.xlane.f32.xlu0 %v2800_v2  ;;  %v2797_v58 = vsel %vm630_vm7, %v2777_v10, 0.0  ;;  %7972 = vmatprep.subr.bf16.mxu0 %v7971_v16 }
0x10e2   :  { %2798 = vadd.xlane.f32.xlu1 %v2797_v58 }
0x10e4   :  { %7974 = vmatpush3.bf16.msra.mxu0 %v7971_v16 }
0x113a   :  { %v2784_v36 = vpop.xlane.xlu0 %2783 }
0x113b   :  { %v2804_v11 = vmul.f32 0.03125, %v2784_v36  ;;  %v2781_v48 = vpop.xlane.xlu1 %2780 }
0x113c   :  { %v2803_v37 = vmul.f32 0.03125, %v2781_v48 }
0x113d   :  { %v2812_v0 = vadd.f32 1e-05, %v2804_v11 }
0x113e   :  { %v2811_v6 = vadd.f32 1e-05, %v2803_v37 }
0x113f   :  { %8687 = vrsqrt.f32 %v2812_v0 }
0x1140   :  { %8689 = vrsqrt.f32 %v2811_v6 }
0x1143   :  { %v2787_v5 = vpop.xlane.xlu1 %2786 }
0x1144   :  { %v2805_v49 = vmul.f32 0.03125, %v2787_v5 }
0x1146   :  { %v2813_v7 = vadd.f32 1e-05, %v2805_v49 }
0x1147   :  { %v2790_v26 = vpop.xlane.xlu0 %2789 }
0x1148   :  { %8691 = vrsqrt.f32 %v2813_v7  ;;  %v2806_v56 = vmul.f32 0.03125, %v2790_v26 }
0x1149   :  { %v8688_v62 = vpop.eup %8687 }
0x114a   :  { %v8690_v44 = vpop.eup %8689  ;;  %v2828_v53 = vmul.f32 %v8688_v62, %v9791_v50  ;;  %v2814_v4 = vadd.f32 1e-05, %v2806_v56  ;;  %v3010_v62 = vld [vmem:[#allocation2 + $0xe0] sm:$0xff] }
0x114b   :  { %v2796_v35 = vpop.xlane.xlu0 %2795  ;;  %v2793_v33 = vpop.xlane.xlu1 %2792  ;;  %v2827_v52 = vmul.f32 %v8690_v44, %v9793_v34  ;;  %v3011_v44 = vld [vmem:[#allocation2 + $0xe8] sm:$0xff] }
0x114c   :  { %v2840_v13 = vmul.f32 %v2838_v46, %v2828_v53  ;;  %8693 = vrsqrt.f32 %v2814_v4  ;;  %v2808_v51 = vmul.f32 0.03125, %v2796_v35  ;;  %v2807_v23 = vmul.f32 0.03125, %v2793_v33 }
0x114d   :  { %v2839_v9 = vmul.f32 %v2838_v46, %v2827_v52  ;;  %v7975_v53 = vpack.c.bf16 %v3011_v44, %v3010_v62 }
0x114e   :  { %v2816_v55 = vadd.f32 1e-05, %v2808_v51  ;;  %v2815_v42 = vadd.f32 1e-05, %v2807_v23  ;;  %v9842_v15 = vadd.f32 %v2850_v38, %v2840_v13 }
0x114f   :  { %v9844_v57 = vadd.f32 %v2850_v38, %v2839_v9  ;;  %7976 = vmatprep.subr.bf16.mxu0 %v7975_v53 }
0x1150   :  { %8695 = vrsqrt.f32 %v2816_v55  ;;  %7978 = vmatpush3.bf16.msra.mxu0 %v7975_v53 }
0x1151   :  { %8697 = vrsqrt.f32 %v2815_v42  ;;  %7351 = vmatprep.mubr.msk.f32.mxu1 %vm630_vm7, %v9844_v57 }
0x1152   :  { %v8692_v50 = vpop.eup %8691  ;;  %7352 = vmatmul.mubr.msk.f32.vlgmr.msra.gmra.mrb[40].mxu1 %vm630_vm7, %v9842_v15 }
0x1153   :  { %v2829_v34 = vmul.f32 %v8692_v50, %v9801_v27 }
0x1155   :  { %v2841_v61 = vmul.f32 %v2838_v46, %v2829_v34 }
0x1156   :  { %v8694_v10 = vpop.eup %8693 }
0x1157   :  { %v9851_v2 = vadd.f32 %v2850_v38, %v2841_v61  ;;  %v2830_v58 = vmul.f32 %v8694_v10, %v9805_v43 }
0x1159   :  { %7354 = vmatprep.mubr.msk.f32.mxu1 %vm630_vm7, %v9851_v2  ;;  %v2842_v8 = vmul.f32 %v2838_v46, %v2830_v58 }
0x115a   :  { %v8696_v20 = vpop.eup %8695 }
0x115b   :  { %v8698_v40 = vpop.eup %8697  ;;  %v9856_v18 = vadd.f32 %v2850_v38, %v2842_v8  ;;  %v2832_v54 = vmul.f32 %v8696_v20, %v9810_v25 }
0x115c   :  { %v2831_v30 = vmul.f32 %v8698_v40, %v9812_v60 }
0x115d   :  { %7355 = vmatmul.mubr.msk.f32.gmra.mrb[42].mxu1 %vm630_vm7, %v9856_v18  ;;  %v2844_v27 = vmul.f32 %v2838_v46, %v2832_v54 }
0x115e   :  { %v2843_v41 = vmul.f32 %v2838_v46, %v2831_v30 }
0x115f   :  { %v9862_v32 = vadd.f32 %v2850_v38, %v2844_v27 }
0x1160   :  { %v9864_v43 = vadd.f32 %v2850_v38, %v2843_v41 }
0x1162   :  { %7357 = vmatprep.mubr.msk.f32.mxu1 %vm630_vm7, %v9864_v43 }
0x1163   :  { %7358 = vmatmul.mubr.msk.f32.gmra.mrb[44].mxu1 %vm630_vm7, %v9862_v32 }
0x116e   :  { %v2802_v16 = vpop.xlane.xlu0 %2801 }
0x116f   :  { %v2810_v36 = vmul.f32 0.03125, %v2802_v16  ;;  %v2799_v25 = vpop.xlane.xlu1 %2798  ;;  %v10917_v16 = vsub.s32 7, %v8964_v3 }
0x1170   :  { %v2809_v11 = vmul.f32 0.03125, %v2799_v25 }
0x1171   :  { %v2818_v60 = vadd.f32 1e-05, %v2810_v36  ;;  %v3144_v36 = vrot.slane %v9771_v63, %v10917_v16 }
0x1172   :  { %v2817_v48 = vadd.f32 1e-05, %v2809_v11 }
0x1173   :  { %8699 = vrsqrt.f32 %v2818_v60 }
0x1174   :  { %8701 = vrsqrt.f32 %v2817_v48 }
0x117d   :  { %v8700_v37 = vpop.eup %8699 }
0x117e   :  { %v8702_v0 = vpop.eup %8701  ;;  %v2834_v6 = vmul.f32 %v8700_v37, %v9821_v22  ;;  %v9881_v22 = vsub.s32 6, %v8964_v3 }
0x117f   :  { %v2833_v5 = vmul.f32 %v8702_v0, %v9823_v21 }
0x1180   :  { %v2846_v49 = vmul.f32 %v2838_v46, %v2834_v6  ;;  %10949 = vst [vmem:[#allocation9_spill] sm:$0xff] %v9881_v22  ;;  %v2866_v21 = vrot.slane %v9771_v63, %v9881_v22 }
0x1181   :  { %v2845_v7 = vmul.f32 %v2838_v46, %v2833_v5 }
0x1182   :  { %v9872_v26 = vadd.f32 %v2850_v38, %v2846_v49 }
0x1183   :  { %v9874_v56 = vadd.f32 %v2850_v38, %v2845_v7 }
0x1185   :  { %7360 = vmatprep.mubr.msk.f32.mxu1 %vm630_vm7, %v9874_v56 }
0x1186   :  { %7361 = vmatmul.mubr.msk.f32.gmra.mrb[46].mxu1 %vm630_vm7, %v9872_v26 }
0x1225   :  { %v7353_v46 = vpop.f32.mrb[40].mxu1 }
0x1226   :  { %v2963_v38 = vadd.f32 %v7353_v46, %v2866_v21  ;;  %v2957_v4 = vpop.f32.mrb[41].mxu1 }
0x1227   :  { %v2958_v35 = vadd.f32 %v2957_v4, %v2866_v21 }
0x1228   :  { %v2997_v52 = vmax.f32 %v2963_v38, 0.0 }
0x1229   :  { %v2996_v33 = vmax.f32 %v2958_v35, 0.0 }
0x122b   :  { %7379 = vmatprep.mubr.msk.f32.mxu0 %vm152_vm3, %v2996_v33 }
0x122c   :  { %7380 = vmatmul.mubr.msk.f32.vlgmr.msra.gmra.mrb[50].mxu0 %vm152_vm3, %v2997_v52 }
0x1230   :  { %v7356_v13 = vpop.f32.mrb[42].mxu1 }
0x1231   :  { %v2973_v51 = vadd.f32 %v7356_v13, %v2866_v21  ;;  %v2967_v23 = vpop.f32.mrb[43].mxu1 }
0x1232   :  { %v2968_v9 = vadd.f32 %v2967_v23, %v2866_v21 }
0x1233   :  { %v2999_v42 = vmax.f32 %v2973_v51, 0.0 }
0x1234   :  { %v2998_v55 = vmax.f32 %v2968_v9, 0.0 }
0x1236   :  { %v7359_v50 = vpop.f32.mrb[44].mxu1  ;;  %7382 = vmatprep.mubr.msk.f32.mxu0 %vm152_vm3, %v2998_v55 }
0x1237   :  { %v2983_v34 = vadd.f32 %v7359_v50, %v2866_v21  ;;  %v2977_v61 = vpop.f32.mrb[45].mxu1  ;;  %7383 = vmatmul.mubr.msk.f32.gmra.mrb[52].mxu0 %vm152_vm3, %v2999_v42 }
0x1238   :  { %v2978_v10 = vadd.f32 %v2977_v61, %v2866_v21 }
0x1239   :  { %v3001_v8 = vmax.f32 %v2983_v34, 0.0 }
0x123a   :  { %v3000_v58 = vmax.f32 %v2978_v10, 0.0 }
0x123c   :  { %7385 = vmatprep.mubr.msk.f32.mxu0 %vm152_vm3, %v3000_v58 }
0x123d   :  { %7386 = vmatmul.mubr.msk.f32.gmra.mrb[54].mxu0 %vm152_vm3, %v3001_v8 }
0x1259   :  { %v7362_v20 = vpop.f32.mrb[46].mxu1 }
0x125a   :  { %v2993_v40 = vadd.f32 %v7362_v20, %v2866_v21  ;;  %v2987_v54 = vpop.f32.mrb[47].mxu1 }
0x125b   :  { %v2988_v30 = vadd.f32 %v2987_v54, %v2866_v21 }
0x125c   :  { %v3003_v41 = vmax.f32 %v2993_v40, 0.0 }
0x125d   :  { %v3002_v27 = vmax.f32 %v2988_v30, 0.0 }
0x125f   :  { %7388 = vmatprep.mubr.msk.f32.mxu0 %vm152_vm3, %v3002_v27 }
0x1260   :  { %7389 = vmatmul.mubr.msk.f32.gmra.mrb[56].mxu0 %vm152_vm3, %v3003_v41 }
0x12ff   :  { %v7381_v25 = vpop.f32.mrb[50].mxu0 }
0x1300   :  { %v3146_v11 = vadd.f32 %v7381_v25, %v3144_v36  ;;  %v3102_v60 = vpop.f32.mrb[51].mxu0 }
0x1301   :  { %v3145_v48 = vadd.f32 %v3144_v36, %v3102_v60 }
0x1302   :  { %v3154_v37 = vadd.f32 %v3146_v11, %v9842_v15 }
0x1303   :  { %v3153_v0 = vadd.f32 %v3145_v48, %v9844_v57 }
0x1304   :  { %v3164_v6 = vsel %vm630_vm7, %v3154_v37, 0.0 }
0x1305   :  { %3165 = vadd.xlane.f32.xlu0 %v3164_v6  ;;  %v3161_v5 = vsel %vm630_vm7, %v3153_v0, 0.0 }
0x1306   :  { %3162 = vadd.xlane.f32.xlu1 %v3161_v5 }
0x130a   :  { %v7384_v49 = vpop.f32.mrb[52].mxu0 }
0x130b   :  { %v3148_v7 = vadd.f32 %v7384_v49, %v3144_v36  ;;  %v3112_v62 = vpop.f32.mrb[53].mxu0 }
0x130c   :  { %v3147_v44 = vadd.f32 %v3144_v36, %v3112_v62 }
0x130d   :  { %v3156_v63 = vadd.f32 %v3148_v7, %v9856_v18 }
0x130e   :  { %v3155_v53 = vadd.f32 %v3147_v44, %v9851_v2 }
0x130f   :  { %v3170_v21 = vsel %vm630_vm7, %v3156_v63, 0.0 }
0x1310   :  { %v7387_v46 = vpop.f32.mrb[54].mxu0  ;;  %3171 = vadd.xlane.f32.xlu0 %v3170_v21  ;;  %v3167_v15 = vsel %vm630_vm7, %v3155_v53, 0.0  ;;  %v3289_v21 = vld [vmem:[#allocation2 + $0xf0] sm:$0xff] }
0x1311   :  { %v3150_v57 = vadd.f32 %v7387_v46, %v3144_v36  ;;  %v3122_v38 = vpop.f32.mrb[55].mxu0  ;;  %3168 = vadd.xlane.f32.xlu1 %v3167_v15  ;;  %v3290_v46 = vld [vmem:[#allocation2 + $0xf8] sm:$0xff] }
0x1312   :  { %v3149_v4 = vadd.f32 %v3144_v36, %v3122_v38  ;;  %v7979_v15 = vpack.c.bf16 %v3290_v46, %v3289_v21  ;;  %v3292_v38 = vld [vmem:[#allocation2 + $0x108] sm:$0xff] }
0x1313   :  { %v3158_v35 = vadd.f32 %v3150_v57, %v9862_v32  ;;  %v3291_v57 = vld [vmem:[#allocation2 + $0x100] sm:$0xff] }
0x1314   :  { %v3157_v33 = vadd.f32 %v3149_v4, %v9864_v43  ;;  %7980 = vmatprep.subr.bf16.mxu1 %v7979_v15  ;;  %v7983_v4 = vpack.c.bf16 %v3292_v38, %v3291_v57 }
0x1315   :  { %v3176_v52 = vsel %vm630_vm7, %v3158_v35, 0.0  ;;  %7982 = vmatpush3.bf16.msra.mxu1 %v7979_v15 }
0x1316   :  { %3177 = vadd.xlane.f32.xlu0 %v3176_v52  ;;  %v3173_v18 = vsel %vm630_vm7, %v3157_v33, 0.0  ;;  %7984 = vmatprep.subr.bf16.mxu1 %v7983_v4 }
0x1317   :  { %3174 = vadd.xlane.f32.xlu1 %v3173_v18 }
0x1319   :  { %7986 = vmatpush3.bf16.msra.mxu1 %v7983_v4 }
0x1333   :  { %v7390_v2 = vpop.f32.mrb[56].mxu0 }
0x1334   :  { %v3152_v13 = vadd.f32 %v7390_v2, %v3144_v36  ;;  %v3132_v51 = vpop.f32.mrb[57].mxu0 }
0x1335   :  { %v3151_v23 = vadd.f32 %v3144_v36, %v3132_v51 }
0x1336   :  { %v3160_v9 = vadd.f32 %v3152_v13, %v9872_v26 }
0x1337   :  { %v3159_v55 = vadd.f32 %v3151_v23, %v9874_v56 }
0x1338   :  { %v3182_v42 = vsel %vm630_vm7, %v3160_v9, 0.0 }
0x1339   :  { %3183 = vadd.xlane.f32.xlu0 %v3182_v42  ;;  %v3179_v32 = vsel %vm630_vm7, %v3159_v55, 0.0 }
0x133a   :  { %3180 = vadd.xlane.f32.xlu1 %v3179_v32 }
0x1392   :  { %v3166_v43 = vpop.xlane.xlu0 %3165 }
0x1393   :  { %v3186_v50 = vmul.f32 0.03125, %v3166_v43  ;;  %v3163_v34 = vpop.xlane.xlu1 %3162 }
0x1394   :  { %v3185_v61 = vmul.f32 0.03125, %v3163_v34 }
0x1395   :  { %v9913_v10 = vsub.f32 %v3154_v37, %v3186_v50 }
0x1396   :  { %v9915_v58 = vsub.f32 %v3153_v0, %v3185_v61 }
0x1397   :  { %v3202_v8 = vmul.f32 %v9913_v10, %v9913_v10 }
0x1398   :  { %v3201_v26 = vmul.f32 %v9915_v58, %v9915_v58 }
0x1399   :  { %v3212_v56 = vsel %vm630_vm7, %v3202_v8, 0.0 }
0x139a   :  { %3213 = vadd.xlane.f32.xlu0 %v3212_v56  ;;  %v3209_v20 = vsel %vm630_vm7, %v3201_v26, 0.0 }
0x139b   :  { %3210 = vadd.xlane.f32.xlu1 %v3209_v20 }
0x139d   :  { %v3172_v40 = vpop.xlane.xlu0 %3171 }
0x139e   :  { %v3188_v54 = vmul.f32 0.03125, %v3172_v40  ;;  %v3169_v30 = vpop.xlane.xlu1 %3168  ;;  %v10950_v40 = vld [vmem:[#allocation8_spill] sm:$0xff] }
0x139f   :  { %v3187_v27 = vmul.f32 0.03125, %v3169_v30 }
0x13a0   :  { %v9923_v41 = vsub.f32 %v3156_v63, %v3188_v54  ;;  %v3268_v54 = vrot.slane %v9834_v29, %v10950_v40 }
0x13a1   :  { %v9925_v36 = vsub.f32 %v3155_v53, %v3187_v27 }
0x13a2   :  { %v3204_v25 = vmul.f32 %v9923_v41, %v9923_v41 }
0x13a3   :  { %v3178_v11 = vpop.xlane.xlu0 %3177  ;;  %v3203_v60 = vmul.f32 %v9925_v36, %v9925_v36 }
0x13a4   :  { %v3190_v48 = vmul.f32 0.03125, %v3178_v11  ;;  %v3175_v37 = vpop.xlane.xlu1 %3174  ;;  %v3218_v0 = vsel %vm630_vm7, %v3204_v25, 0.0 }
0x13a5   :  { %v3189_v6 = vmul.f32 0.03125, %v3175_v37  ;;  %3219 = vadd.xlane.f32.xlu0 %v3218_v0  ;;  %v3215_v5 = vsel %vm630_vm7, %v3203_v60, 0.0  ;;  %v10951_v60 = vld [vmem:[#allocation10_spill] sm:$0xff] }
0x13a6   :  { %v9933_v49 = vsub.f32 %v3158_v35, %v3190_v48  ;;  %3216 = vadd.xlane.f32.xlu1 %v3215_v5  ;;  %v3280_v48 = vrot.slane %v9834_v29, %v10951_v60 }
0x13a7   :  { %v9935_v7 = vsub.f32 %v3157_v33, %v3189_v6 }
0x13a8   :  { %v3206_v62 = vmul.f32 %v9933_v49, %v9933_v49 }
0x13a9   :  { %v3205_v44 = vmul.f32 %v9935_v7, %v9935_v7 }
0x13aa   :  { %v3224_v63 = vsel %vm630_vm7, %v3206_v62, 0.0 }
0x13ab   :  { %3225 = vadd.xlane.f32.xlu0 %v3224_v63  ;;  %v3221_v53 = vsel %vm630_vm7, %v3205_v44, 0.0 }
0x13ac   :  { %3222 = vadd.xlane.f32.xlu1 %v3221_v53 }
0x13c6   :  { %v3184_v35 = vpop.xlane.xlu0 %3183 }
0x13c7   :  { %v3192_v33 = vmul.f32 0.03125, %v3184_v35  ;;  %v3181_v52 = vpop.xlane.xlu1 %3180 }
0x13c8   :  { %v3191_v18 = vmul.f32 0.03125, %v3181_v52 }
0x13c9   :  { %v9943_v2 = vsub.f32 %v3160_v9, %v3192_v33 }
0x13ca   :  { %v9945_v13 = vsub.f32 %v3159_v55, %v3191_v18 }
0x13cb   :  { %v3208_v51 = vmul.f32 %v9943_v2, %v9943_v2 }
0x13cc   :  { %v3207_v23 = vmul.f32 %v9945_v13, %v9945_v13 }
0x13cd   :  { %v3230_v42 = vsel %vm630_vm7, %v3208_v51, 0.0 }
0x13ce   :  { %3231 = vadd.xlane.f32.xlu0 %v3230_v42  ;;  %v3227_v32 = vsel %vm630_vm7, %v3207_v23, 0.0 }
0x13cf   :  { %3228 = vadd.xlane.f32.xlu1 %v3227_v32 }
0x1427   :  { %v3214_v43 = vpop.xlane.xlu0 %3213 }
0x1428   :  { %v3234_v50 = vmul.f32 0.03125, %v3214_v43  ;;  %v3211_v34 = vpop.xlane.xlu1 %3210 }
0x1429   :  { %v3233_v61 = vmul.f32 0.03125, %v3211_v34 }
0x142a   :  { %v3242_v9 = vadd.f32 1e-05, %v3234_v50 }
0x142b   :  { %v3241_v8 = vadd.f32 1e-05, %v3233_v61 }
0x142c   :  { %8703 = vrsqrt.f32 %v3242_v9 }
0x142d   :  { %8705 = vrsqrt.f32 %v3241_v8 }
0x1432   :  { %v3220_v55 = vpop.xlane.xlu0 %3219 }
0x1433   :  { %v3236_v26 = vmul.f32 0.03125, %v3220_v55  ;;  %v3217_v56 = vpop.xlane.xlu1 %3216 }
0x1434   :  { %v3235_v20 = vmul.f32 0.03125, %v3217_v56 }
0x1435   :  { %v3244_v30 = vadd.f32 1e-05, %v3236_v26 }
0x1436   :  { %v8704_v27 = vpop.eup %8703  ;;  %v3243_v25 = vadd.f32 1e-05, %v3235_v20 }
0x1437   :  { %v8706_v11 = vpop.eup %8705  ;;  %v3258_v37 = vmul.f32 %v8704_v27, %v9913_v10  ;;  %8707 = vrsqrt.f32 %v3244_v30 }
0x1438   :  { %8709 = vrsqrt.f32 %v3243_v25  ;;  %v3226_v0 = vpop.xlane.xlu0 %3225  ;;  %v3257_v6 = vmul.f32 %v8706_v11, %v9915_v58 }
0x1439   :  { %v3270_v5 = vmul.f32 %v3268_v54, %v3258_v37  ;;  %v3238_v62 = vmul.f32 0.03125, %v3226_v0  ;;  %v3223_v44 = vpop.xlane.xlu1 %3222  ;;  %v10958_v37 = vld [vmem:[#allocation16_spill] sm:$0xff] }
0x143a   :  { %v3237_v63 = vmul.f32 0.03125, %v3223_v44  ;;  %v3269_v53 = vmul.f32 %v3268_v54, %v3257_v6  ;;  %v3296_v0 = vrot.slane %v9834_v29, %v10958_v37 }
0x143b   :  { %v3246_v21 = vadd.f32 1e-05, %v3238_v62  ;;  %v9959_v46 = vadd.f32 %v3280_v48, %v3270_v5 }
0x143c   :  { %v3245_v15 = vadd.f32 1e-05, %v3237_v63  ;;  %v9961_v57 = vadd.f32 %v3280_v48, %v3269_v53 }
0x143d   :  { %8711 = vrsqrt.f32 %v3246_v21 }
0x143e   :  { %8713 = vrsqrt.f32 %v3245_v15  ;;  %7399 = vmatprep.mubr.msk.f32.mxu1 %vm630_vm7, %v9961_v57 }
0x143f   :  { %7400 = vmatmul.mubr.msk.f32.vlgmr.msra.gmra.mrb[48].mxu1 %vm630_vm7, %v9959_v46 }
0x1441   :  { %v8708_v10 = vpop.eup %8707 }
0x1442   :  { %v8710_v58 = vpop.eup %8709  ;;  %v3260_v38 = vmul.f32 %v8708_v10, %v9923_v41 }
0x1443   :  { %v3259_v4 = vmul.f32 %v8710_v58, %v9925_v36 }
0x1444   :  { %v3272_v35 = vmul.f32 %v3268_v54, %v3260_v38 }
0x1445   :  { %v3271_v33 = vmul.f32 %v3268_v54, %v3259_v4 }
0x1446   :  { %v9969_v52 = vadd.f32 %v3280_v48, %v3272_v35 }
0x1447   :  { %v8712_v18 = vpop.eup %8711  ;;  %v9971_v51 = vadd.f32 %v3280_v48, %v3271_v33 }
0x1448   :  { %10952 = vst [vmem:[#allocation11_spill] sm:$0xff] %v9969_v52  ;;  %v8714_v23 = vpop.eup %8713  ;;  %v3262_v42 = vmul.f32 %v8712_v18, %v9933_v49 }
0x1449   :  { %10953 = vst [vmem:[#allocation13_spill] sm:$0xff] %v9971_v51  ;;  %7402 = vmatprep.mubr.msk.f32.mxu1 %vm630_vm7, %v9971_v51  ;;  %v3261_v32 = vmul.f32 %v8714_v23, %v9935_v7 }
0x144a   :  { %7403 = vmatmul.mubr.msk.f32.gmra.mrb[50].mxu1 %vm630_vm7, %v9969_v52  ;;  %v3274_v41 = vmul.f32 %v3268_v54, %v3262_v42 }
0x144b   :  { %v3273_v36 = vmul.f32 %v3268_v54, %v3261_v32 }
0x144c   :  { %v9979_v43 = vadd.f32 %v3280_v48, %v3274_v41 }
0x144d   :  { %v9981_v50 = vadd.f32 %v3280_v48, %v3273_v36 }
0x144e   :  { %10954 = vst [vmem:[#allocation12_spill] sm:$0xff] %v9979_v43 }
0x144f   :  { %10955 = vst [vmem:[#allocation15_spill] sm:$0xff] %v9981_v50  ;;  %7405 = vmatprep.mubr.msk.f32.mxu1 %vm630_vm7, %v9981_v50 }
0x1450   :  { %7406 = vmatmul.mubr.msk.f32.gmra.mrb[52].mxu1 %vm630_vm7, %v9979_v43 }
0x145b   :  { %v3232_v49 = vpop.xlane.xlu0 %3231 }
0x145c   :  { %v3240_v34 = vmul.f32 0.03125, %v3232_v49  ;;  %v3229_v61 = vpop.xlane.xlu1 %3228 }
0x145d   :  { %v3239_v9 = vmul.f32 0.03125, %v3229_v61 }
0x145e   :  { %v3248_v7 = vadd.f32 1e-05, %v3240_v34 }
0x145f   :  { %v3247_v8 = vadd.f32 1e-05, %v3239_v9 }
0x1460   :  { %8715 = vrsqrt.f32 %v3248_v7 }
0x1461   :  { %8717 = vrsqrt.f32 %v3247_v8 }
0x146a   :  { %v8716_v55 = vpop.eup %8715 }
0x146b   :  { %v8718_v26 = vpop.eup %8717  ;;  %v3264_v56 = vmul.f32 %v8716_v55, %v9943_v2 }
0x146c   :  { %v3263_v20 = vmul.f32 %v8718_v26, %v9945_v13 }
0x146d   :  { %v3276_v30 = vmul.f32 %v3268_v54, %v3264_v56 }
0x146e   :  { %v3275_v27 = vmul.f32 %v3268_v54, %v3263_v20 }
0x146f   :  { %v9989_v25 = vadd.f32 %v3280_v48, %v3276_v30 }
0x1470   :  { %v9991_v11 = vadd.f32 %v3280_v48, %v3275_v27 }
0x1471   :  { %10956 = vst [vmem:[#allocation14_spill] sm:$0xff] %v9989_v25 }
0x1472   :  { %10957 = vst [vmem:[#allocation17_spill] sm:$0xff] %v9991_v11  ;;  %7408 = vmatprep.mubr.msk.f32.mxu1 %vm630_vm7, %v9991_v11 }
0x1473   :  { %7409 = vmatmul.mubr.msk.f32.gmra.mrb[54].mxu1 %vm630_vm7, %v9989_v25 }
0x1512   :  { %v7401_v6 = vpop.f32.mrb[48].mxu1 }
0x1513   :  { %v9999_v5 = vadd.f32 %v7401_v6, %v3296_v0  ;;  %v3387_v2 = vpop.f32.mrb[49].mxu1 }
0x1514   :  { %v10001_v13 = vadd.f32 %v3387_v2, %v3296_v0 }
0x1516   :  { %7427 = vmatprep.mubr.msk.f32.mxu0 %vm70_vm0, %v10001_v13  ;;  %v10007_v54 = vpack.i.bf16 %v9999_v5, %v10001_v13 }
0x1518   :  { %8400 = vrot.lane.b32.xlu1 %v10007_v54, %s8913_s11 }
0x151d   :  { %v7404_v48 = vpop.f32.mrb[50].mxu1 }
0x151e   :  { %v10011_v62 = vadd.f32 %v7404_v48, %v3296_v0  ;;  %v3397_v29 = vpop.f32.mrb[51].mxu1 }
0x151f   :  { %v10013_v44 = vadd.f32 %v3397_v29, %v3296_v0 }
0x1521   :  { %v10017_v63 = vpack.i.bf16 %v10011_v62, %v10013_v44 }
0x1523   :  { %v7407_v53 = vpop.f32.mrb[52].mxu1  ;;  %8405 = vrot.lane.b32.xlu0 %v10017_v63, %s8913_s11 }
0x1524   :  { %v10021_v21 = vadd.f32 %v7407_v53, %v3296_v0  ;;  %v3407_v15 = vpop.f32.mrb[53].mxu1 }
0x1525   :  { %v10023_v10 = vadd.f32 %v3407_v15, %v3296_v0 }
0x1527   :  { %v10027_v58 = vpack.i.bf16 %v10021_v21, %v10023_v10 }
0x1529   :  { %8410 = vrot.lane.b32.xlu1 %v10027_v58, %s8913_s11 }
0x1546   :  { %v7410_v38 = vpop.f32.mrb[54].mxu1 }
0x1547   :  { %v10031_v4 = vadd.f32 %v7410_v38, %v3296_v0  ;;  %v3417_v35 = vpop.f32.mrb[55].mxu1 }
0x1548   :  { %v10033_v33 = vadd.f32 %v3417_v35, %v3296_v0 }
0x154a   :  { %v10037_v18 = vpack.i.bf16 %v10031_v4, %v10033_v33 }
0x154c   :  { %8415 = vrot.lane.b32.xlu1 %v10037_v18, %s8913_s11 }
0x158a   :  { %v8401_v23 = vpop.permute.xlu1 %8400 }
0x158b   :  { %v8403_v42 = vunpack.i.h.bf16 %v8401_v23  ;;  %v8402_v32 = vunpack.i.l.bf16 %v8401_v23 }
0x158d   :  { %v7987_v41 = vpack.c.bf16 %v8403_v42, %v8402_v32 }
0x158f   :  { %7989 = vmatprep.subr.msk.bf16.mxu0 %vm9080_vm8, %v7987_v41 }
0x1590   :  { %7992 = vmatpush3.bf16.xpose.msk.msra.mxu0 %vm9080_vm8, %v7987_v41 }
0x1595   :  { %v8406_v36 = vpop.permute.xlu0 %8405 }
0x1596   :  { %v8408_v49 = vunpack.i.h.bf16 %v8406_v36  ;;  %v8407_v34 = vunpack.i.l.bf16 %v8406_v36 }
0x1598   :  { %v7993_v61 = vpack.c.bf16 %v8408_v49, %v8407_v34 }
0x159a   :  { %7995 = vmatprep.subr.msk.bf16.mxu0 %vm9080_vm8, %v7993_v61 }
0x159b   :  { %v8411_v9 = vpop.permute.xlu1 %8410  ;;  %7998 = vmatpush3.bf16.xpose.msk.msra.mxu0 %vm9080_vm8, %v7993_v61 }
0x159c   :  { %v8413_v7 = vunpack.i.h.bf16 %v8411_v9  ;;  %v8412_v8 = vunpack.i.l.bf16 %v8411_v9 }
0x159e   :  { %v7999_v55 = vpack.c.bf16 %v8413_v7, %v8412_v8 }
0x15a0   :  { %8001 = vmatprep.subr.msk.bf16.mxu0 %vm9080_vm8, %v7999_v55 }
0x15a3   :  { %8004 = vmatpush3.bf16.xpose.msk.msra.mxu0 %vm9080_vm8, %v7999_v55 }
0x15be   :  { %v8416_v26 = vpop.permute.xlu1 %8415 }
0x15bf   :  { %v8418_v56 = vunpack.i.h.bf16 %v8416_v26  ;;  %v8417_v20 = vunpack.i.l.bf16 %v8416_v26 }
0x15c1   :  { %v8005_v30 = vpack.c.bf16 %v8418_v56, %v8417_v20 }
0x15c3   :  { %8007 = vmatprep.subr.msk.bf16.mxu0 %vm9080_vm8, %v8005_v30 }
0x15c4   :  { %8010 = vmatpush3.bf16.xpose.msk.msra.mxu0 %vm9080_vm8, %v8005_v30 }
0x15cb   :  { %7428 = vmatmul.mubr.msk.f32.vlgmr.msra.gmra.mrb[58].mxu0 %vm70_vm0, %v9999_v5 }
0x15cc   :  { %7430 = vmatprep.mubr.msk.f32.mxu0 %vm70_vm0, %v10013_v44 }
0x15cf   :  { %7431 = vmatmul.mubr.msk.f32.gmra.mrb[60].mxu0 %vm70_vm0, %v10011_v62 }
0x15d0   :  { %7433 = vmatprep.mubr.msk.f32.mxu0 %vm70_vm0, %v10023_v10 }
0x15d3   :  { %7434 = vmatmul.mubr.msk.f32.gmra.mrb[62].mxu0 %vm70_vm0, %v10021_v21 }
0x15d4   :  { %7436 = vmatprep.mubr.msk.f32.mxu0 %vm70_vm0, %v10033_v33 }
0x15d7   :  { %7437 = vmatmul.mubr.msk.f32.gmra.mrb[64].mxu0 %vm70_vm0, %v10031_v4 }
0x169e   :  { %v7429_v27 = vpop.f32.mrb[58].mxu0 }
0x169f   :  { %v3588_v0 = vmul.f32 0.35355338, %v7429_v27  ;;  %v3548_v6 = vpop.f32.mrb[59].mxu0 }
0x16a0   :  { %v3587_v2 = vmul.f32 0.35355338, %v3548_v6 }
0x16a1   :  { %v3596_v48 = vadd.f32 %v3588_v0, %v9144_v1 }
0x16a2   :  { %v3595_v29 = vadd.f32 %v3587_v2, %v9149_v12  ;;  %v7432_v53 = vpop.f32.mrb[60].mxu0 }
0x16a3   :  { %v3590_v15 = vmul.f32 0.35355338, %v7432_v53  ;;  %v3558_v38 = vpop.f32.mrb[61].mxu0  ;;  %v3606_v35 = vsel %vm152_vm3, %v3596_v48, -inf }
0x16a4   :  { %v3589_v23 = vmul.f32 0.35355338, %v3558_v38  ;;  %3607 = vmax.xlane.f32.xlu1 %v3606_v35  ;;  %v3603_v42 = vsel %vm152_vm3, %v3595_v29, -inf }
0x16a5   :  { %v10076_v32 = vadd.f32 %v3590_v15, %v9155_v19  ;;  %3604 = vmax.xlane.f32.xlu0 %v3603_v42 }
0x16a6   :  { %v7435_v41 = vpop.f32.mrb[62].mxu0  ;;  %v3597_v34 = vadd.f32 %v3589_v23, %v9167_v39 }
0x16a7   :  { %v3568_v36 = vpop.f32.mrb[63].mxu0  ;;  %v3612_v49 = vsel %vm152_vm3, %v10076_v32, -inf  ;;  %v3592_v61 = vmul.f32 0.35355338, %v7435_v41 }
0x16a8   :  { %v3609_v26 = vsel %vm152_vm3, %v3597_v34, -inf  ;;  %v3591_v27 = vmul.f32 0.35355338, %v3568_v36 }
0x16a9   :  { %3613 = vmax.xlane.f32.xlu0 %v3612_v49  ;;  %v3600_v8 = vadd.f32 %v3592_v61, %v9174_v47 }
0x16aa   :  { %v7438_v9 = vpop.f32.mrb[64].mxu0  ;;  %v3599_v0 = vadd.f32 %v3591_v27, %v9195_v14 }
0x16ab   :  { %v3578_v7 = vpop.f32.mrb[65].mxu0  ;;  %v3594_v55 = vmul.f32 0.35355338, %v7438_v9  ;;  %v3618_v20 = vsel %vm152_vm3, %v3600_v8, -inf }
0x16ac   :  { %v3615_v6 = vsel %vm152_vm3, %v3599_v0, -inf  ;;  %v3593_v2 = vmul.f32 0.35355338, %v3578_v7 }
0x16ad   :  { %3610 = vmax.xlane.f32.xlu0 %v3609_v26  ;;  %v10084_v56 = vadd.f32 %v3594_v55, %v9180_v59 }
0x16ae   :  { %v10098_v53 = vadd.f32 %v3593_v2, %v9207_v31 }
0x16af   :  { %v3624_v30 = vsel %vm152_vm3, %v10084_v56, -inf }
0x16b0   :  { %v3621_v15 = vsel %vm152_vm3, %v10098_v53, -inf }
0x16b1   :  { %3619 = vmax.xlane.f32.xlu0 %v3618_v20 }
0x16b5   :  { %8420 = vrot.lane.b32.xlu1 %v10007_v54, %s8915_s12  ;;  %3625 = vmax.xlane.f32.xlu0 %v3624_v30 }
0x16cb   :  { %8425 = vrot.lane.b32.xlu0 %v10017_v63, %s8915_s12 }
0x16d9   :  { %3616 = vmax.xlane.f32.xlu1 %v3615_v6 }
0x16ea   :  { %8430 = vrot.lane.b32.xlu1 %v10027_v58, %s8915_s12 }
0x170e   :  { %3622 = vmax.xlane.f32.xlu1 %v3621_v15 }
0x171f   :  { %8435 = vrot.lane.b32.xlu1 %v10037_v18, %s8915_s12 }
0x1731   :  { %v3608_v38 = vpop.xlane.xlu1 %3607 }
0x1732   :  { %v3628_v35 = vsub.f32 %v3596_v48, %v3608_v38  ;;  %v3605_v23 = vpop.xlane.xlu0 %3604 }
0x1733   :  { %v3627_v42 = vsub.f32 %v3595_v29, %v3605_v23 }
0x1734   :  { %v3637_v41 = vmul.f32 1.442695, %v3628_v35 }
0x1735   :  { %v3635_v36 = vmul.f32 1.442695, %v3627_v42  ;;  %v8421_v49 = vpop.permute.xlu1 %8420 }
0x1736   :  { %8719 = vpow2.f32 %v3637_v41  ;;  %v8423_v61 = vunpack.i.h.bf16 %v8421_v49  ;;  %v8422_v9 = vunpack.i.l.bf16 %v8421_v49  ;;  %v3614_v7 = vpop.xlane.xlu0 %3613 }
0x1737   :  { %8721 = vpow2.f32 %v3635_v36 }
0x1738   :  { %v8011_v55 = vpack.c.bf16 %v8423_v61, %v8422_v9  ;;  %v3630_v9 = vsub.f32 %v10076_v32, %v3614_v7 }
0x173a   :  { %8012 = vmatprep.subr.bf16.mxu1 %v8011_v55  ;;  %v3611_v26 = vpop.xlane.xlu0 %3610 }
0x173b   :  { %v3629_v20 = vsub.f32 %v3597_v34, %v3611_v26  ;;  %8014 = vmatpush3.bf16.msra.mxu1 %v8011_v55  ;;  %v3641_v26 = vmul.f32 1.442695, %v3630_v9 }
0x173d   :  { %v3639_v30 = vmul.f32 1.442695, %v3629_v20 }
0x173e   :  { %v3620_v27 = vpop.xlane.xlu0 %3619 }
0x173f   :  { %8723 = vpow2.f32 %v3639_v30  ;;  %v3632_v6 = vsub.f32 %v3600_v8, %v3620_v27 }
0x1740   :  { %v10104_v48 = vpop.eup %8719 }
0x1741   :  { %v10106_v29 = vpop.eup %8721  ;;  %v3645_v2 = vmul.f32 1.442695, %v3632_v6  ;;  %v3654_v15 = vsel %vm152_vm3, %v10104_v48, 0.0 }
0x1742   :  { %3655 = vadd.xlane.f32.xlu0 %v3654_v15  ;;  %v3626_v38 = vpop.xlane.xlu0 %3625  ;;  %v3651_v35 = vsel %vm152_vm3, %v10106_v29, 0.0 }
0x1743   :  { %8725 = vpow2.f32 %v3645_v2  ;;  %3652 = vadd.xlane.f32.xlu1 %v3651_v35  ;;  %v3634_v55 = vsub.f32 %v10084_v56, %v3626_v38 }
0x1744   :  { %8727 = vpow2.f32 %v3641_v26 }
0x1745   :  { %v3649_v27 = vmul.f32 1.442695, %v3634_v55 }
0x1746   :  { %v8426_v34 = vpop.permute.xlu0 %8425 }
0x1747   :  { %v8428_v23 = vunpack.i.h.bf16 %v8426_v34  ;;  %v8427_v42 = vunpack.i.l.bf16 %v8426_v34 }
0x1749   :  { %v10112_v41 = vpop.eup %8723  ;;  %v8015_v8 = vpack.c.bf16 %v8428_v23, %v8427_v42 }
0x174a   :  { %v3657_v36 = vsel %vm152_vm3, %v10112_v41, 0.0 }
0x174b   :  { %3658 = vadd.xlane.f32.xlu0 %v3657_v36  ;;  %8016 = vmatprep.subr.bf16.mxu1 %v8015_v8 }
0x174c   :  { %8018 = vmatpush3.bf16.msra.mxu1 %v8015_v8 }
0x174d   :  { %v10116_v49 = vpop.eup %8725 }
0x174e   :  { %v3666_v61 = vsel %vm152_vm3, %v10116_v49, 0.0  ;;  %v8728_v23 = vpop.eup %8727 }
0x174f   :  { %3667 = vadd.xlane.f32.xlu0 %v3666_v61 }
0x1754   :  { %8440 = vrot.lane.b32.xlu1 %v10007_v54, %s8916_s13 }
0x1766   :  { %v3617_v20 = vpop.xlane.xlu1 %3616 }
0x1767   :  { %v3631_v30 = vsub.f32 %v3599_v0, %v3617_v20  ;;  %v3660_v0 = vsel %vm152_vm3, %v8728_v23, 0.0 }
0x1769   :  { %v3643_v6 = vmul.f32 1.442695, %v3631_v30 }
0x176a   :  { %v8431_v2 = vpop.permute.xlu1 %8430 }
0x176b   :  { %8729 = vpow2.f32 %v3643_v6  ;;  %v8433_v15 = vunpack.i.h.bf16 %v8431_v2  ;;  %v8432_v35 = vunpack.i.l.bf16 %v8431_v2 }
0x176c   :  { %8731 = vpow2.f32 %v3649_v27 }
0x176d   :  { %v8019_v34 = vpack.c.bf16 %v8433_v15, %v8432_v35 }
0x176f   :  { %8020 = vmatprep.subr.bf16.mxu1 %v8019_v34 }
0x1770   :  { %8022 = vmatpush3.bf16.msra.mxu1 %v8019_v34 }
0x1775   :  { %v10124_v42 = vpop.eup %8729 }
0x1776   :  { %v3663_v32 = vsel %vm152_vm3, %v10124_v42, 0.0  ;;  %v10128_v56 = vpop.eup %8731 }
0x1777   :  { %3664 = vadd.xlane.f32.xlu0 %v3663_v32  ;;  %v3672_v7 = vsel %vm152_vm3, %v10128_v56, 0.0 }
0x1778   :  { %3661 = vadd.xlane.f32.xlu1 %v3660_v0 }
0x177b   :  { %3673 = vadd.xlane.f32.xlu0 %v3672_v7 }
0x1789   :  { %8450 = vrot.lane.b32.xlu1 %v10027_v58, %s8916_s13 }
0x178d   :  { %8455 = vrot.lane.b32.xlu1 %v10037_v18, %s8916_s13 }
0x1791   :  { %3844 = vrot.lane.b32.xlu1 %v10001_v13, %s8911_s1 }
0x1795   :  { %3846 = vrot.lane.b32.xlu1 %v9999_v5, %s8911_s1 }
0x1799   :  { %3850 = vrot.lane.b32.xlu1 %v10011_v62, %s8911_s1 }
0x179b   :  { %v3623_v38 = vpop.xlane.xlu1 %3622 }
0x179c   :  { %v3633_v8 = vsub.f32 %v10098_v53, %v3623_v38 }
0x179d   :  { %3854 = vrot.lane.b32.xlu1 %v10021_v21, %s8911_s1 }
0x179e   :  { %v3647_v36 = vmul.f32 1.442695, %v3633_v8 }
0x179f   :  { %v8436_v61 = vpop.permute.xlu1 %8435 }
0x17a0   :  { %8733 = vpow2.f32 %v3647_v36  ;;  %v8438_v9 = vunpack.i.h.bf16 %v8436_v61  ;;  %v8437_v55 = vunpack.i.l.bf16 %v8436_v61 }
0x17a1   :  { %3858 = vrot.lane.b32.xlu1 %v10031_v4, %s8911_s1 }
0x17a2   :  { %v8023_v26 = vpack.c.bf16 %v8438_v9, %v8437_v55 }
0x17a4   :  { %8024 = vmatprep.subr.bf16.mxu1 %v8023_v26 }
0x17a5   :  { %8026 = vmatpush3.bf16.msra.mxu1 %v8023_v26 }
0x17aa   :  { %v8734_v20 = vpop.eup %8733 }
0x17ab   :  { %v3669_v30 = vsel %vm152_vm3, %v8734_v20, 0.0 }
0x17ac   :  { %3670 = vadd.xlane.f32.xlu0 %v3669_v30 }
0x17c2   :  { %8445 = vrot.lane.b32.xlu0 %v10017_v63, %s8916_s13 }
0x17c6   :  { %3848 = vrot.lane.b32.xlu0 %v10013_v44, %s8911_s1 }
0x17ca   :  { %3852 = vrot.lane.b32.xlu0 %v10023_v10, %s8911_s1 }
0x17ce   :  { %3856 = vrot.lane.b32.xlu0 %v10033_v33, %s8911_s1 }
0x17cf   :  { %v3656_v53 = vpop.xlane.xlu0 %3655 }
0x17d0   :  { %8735 = vrcp.f32 %v3656_v53  ;;  %v3653_v27 = vpop.xlane.xlu1 %3652 }
0x17d1   :  { %8737 = vrcp.f32 %v3653_v27 }
0x17d4   :  { %v8441_v6 = vpop.permute.xlu1 %8440 }
0x17d5   :  { %v8443_v2 = vunpack.i.h.bf16 %v8441_v6  ;;  %v8442_v15 = vunpack.i.l.bf16 %v8441_v6 }
0x17d7   :  { %v8027_v35 = vpack.c.bf16 %v8443_v2, %v8442_v15 }
0x17d8   :  { %v3659_v34 = vpop.xlane.xlu0 %3658 }
0x17d9   :  { %8739 = vrcp.f32 %v3659_v34  ;;  %8029 = vmatprep.subr.msk.bf16.mxu1 %vm9080_vm8, %v8027_v35 }
0x17da   :  { %v8736_v32 = vpop.eup %8735 }
0x17db   :  { %v8738_v0 = vpop.eup %8737  ;;  %v3684_v38 = vmul.f32 %v8736_v32, %v10104_v48 }
0x17dc   :  { %v3683_v7 = vmul.f32 %v8738_v0, %v10106_v29  ;;  %v3668_v61 = vpop.xlane.xlu0 %3667 }
0x17de   :  { %7455 = vmatprep.mubr.msk.f32.mxu1 %vm152_vm3, %v3683_v7 }
0x17df   :  { %7456 = vmatmul.mubr.msk.f32.vlgmr.msra.gmra.mrb[56].mxu1 %vm152_vm3, %v3684_v38 }
0x17e0   :  { %8032 = vmatpush3.bf16.xpose.msk.msra.mxu1 %vm9080_vm8, %v8027_v35 }
0x17e3   :  { %v8740_v8 = vpop.eup %8739 }
0x17e4   :  { %v3685_v36 = vmul.f32 %v8740_v8, %v10112_v41 }
0x17e6   :  { %7458 = vmatprep.mubr.msk.f32.mxu1 %vm152_vm3, %v3685_v36 }
0x1804   :  { %v3665_v9 = vpop.xlane.xlu0 %3664 }
0x1805   :  { %8741 = vrcp.f32 %v3665_v9  ;;  %v3662_v55 = vpop.xlane.xlu1 %3661 }
0x1806   :  { %8743 = vrcp.f32 %v3662_v55 }
0x1807   :  { %8745 = vrcp.f32 %v3668_v61 }
0x1808   :  { %v3674_v27 = vpop.xlane.xlu0 %3673 }
0x1809   :  { %8747 = vrcp.f32 %v3674_v27  ;;  %v8451_v2 = vpop.permute.xlu1 %8450 }
0x180a   :  { %v8453_v35 = vunpack.i.h.bf16 %v8451_v2  ;;  %v8452_v34 = vunpack.i.l.bf16 %v8451_v2 }
0x180d   :  { %v8456_v7 = vpop.permute.xlu1 %8455 }
0x180e   :  { %v8458_v36 = vunpack.i.h.bf16 %v8456_v7  ;;  %v8457_v61 = vunpack.i.l.bf16 %v8456_v7 }
0x180f   :  { %v8742_v29 = vpop.eup %8741 }
0x1810   :  { %v8744_v48 = vpop.eup %8743  ;;  %v3687_v53 = vmul.f32 %v8742_v29, %v10124_v42  ;;  %v8039_v42 = vpack.c.bf16 %v8453_v35, %v8452_v34  ;;  %v8045_v29 = vpack.c.bf16 %v8458_v36, %v8457_v61 }
0x1811   :  { %v3686_v26 = vmul.f32 %v8744_v48, %v8728_v23  ;;  %v8746_v30 = vpop.eup %8745  ;;  %v3845_v55 = vpop.permute.xlu1 %3844 }
0x1812   :  { %v3688_v41 = vmul.f32 %v8746_v30, %v10116_v49 }
0x1813   :  { %7459 = vmatmul.mubr.msk.f32.gmra.mrb[58].mxu1 %vm152_vm3, %v3686_v26  ;;  %v8748_v38 = vpop.eup %8747 }
0x1814   :  { %7461 = vmatprep.mubr.msk.f32.mxu1 %vm152_vm3, %v3687_v53  ;;  %v3690_v9 = vmul.f32 %v8748_v38, %v10128_v56 }
0x1815   :  { %v3847_v48 = vpop.permute.xlu1 %3846 }
0x1817   :  { %7462 = vmatmul.mubr.msk.f32.gmra.mrb[60].mxu1 %vm152_vm3, %v3688_v41 }
0x1819   :  { %v3851_v56 = vpop.permute.xlu1 %3850 }
0x181d   :  { %v3855_v30 = vpop.permute.xlu1 %3854 }
0x1821   :  { %v3859_v41 = vpop.permute.xlu1 %3858 }
0x1839   :  { %v3671_v6 = vpop.xlane.xlu0 %3670 }
0x183a   :  { %8749 = vrcp.f32 %v3671_v6 }
0x183d   :  { %v8446_v15 = vpop.permute.xlu0 %8445 }
0x183e   :  { %v8448_v23 = vunpack.i.h.bf16 %v8446_v15  ;;  %v8447_v32 = vunpack.i.l.bf16 %v8446_v15 }
0x1840   :  { %v8033_v0 = vpack.c.bf16 %v8448_v23, %v8447_v32 }
0x1842   :  { %8035 = vmatprep.subr.msk.bf16.mxu1 %vm9080_vm8, %v8033_v0 }
0x1843   :  { %8038 = vmatpush3.bf16.xpose.msk.msra.mxu1 %vm9080_vm8, %v8033_v0 }
0x1844   :  { %v8750_v49 = vpop.eup %8749  ;;  %8041 = vmatprep.subr.msk.bf16.mxu1 %vm9080_vm8, %v8039_v42 }
0x1845   :  { %v3689_v8 = vmul.f32 %v8750_v49, %v8734_v20  ;;  %v3849_v20 = vpop.permute.xlu0 %3848 }
0x1847   :  { %7464 = vmatprep.mubr.msk.f32.mxu1 %vm152_vm3, %v3689_v8 }
0x1848   :  { %7465 = vmatmul.mubr.msk.f32.gmra.mrb[62].mxu1 %vm152_vm3, %v3690_v9 }
0x1849   :  { %7483 = vmatprep.mubr.msk.f32.mxu1 %vm70_vm0, %v3845_v55  ;;  %v3853_v26 = vpop.permute.xlu0 %3852 }
0x184b   :  { %8044 = vmatpush3.bf16.xpose.msk.msra.mxu1 %vm9080_vm8, %v8039_v42 }
0x184c   :  { %8047 = vmatprep.subr.msk.bf16.mxu1 %vm9080_vm8, %v8045_v29 }
0x184d   :  { %v3857_v53 = vpop.permute.xlu0 %3856 }
0x1853   :  { %8050 = vmatpush3.bf16.xpose.msk.msra.mxu1 %vm9080_vm8, %v8045_v29 }
0x185a   :  { %7484 = vmatmul.mubr.msk.f32.vlgmr.msra.gmra.mrb[64].mxu1 %vm70_vm0, %v3847_v48 }
0x185b   :  { %7486 = vmatprep.mubr.msk.f32.mxu1 %vm70_vm0, %v3849_v20 }
0x185e   :  { %7487 = vmatmul.mubr.msk.f32.gmra.mrb[66].mxu1 %vm70_vm0, %v3851_v56 }
0x185f   :  { %7489 = vmatprep.mubr.msk.f32.mxu1 %vm70_vm0, %v3853_v26 }
0x1862   :  { %7490 = vmatmul.mubr.msk.f32.gmra.mrb[68].mxu1 %vm70_vm0, %v3855_v30 }
0x1863   :  { %7492 = vmatprep.mubr.msk.f32.mxu1 %vm70_vm0, %v3857_v53 }
0x1866   :  { %7493 = vmatmul.mubr.msk.f32.gmra.mrb[70].mxu1 %vm70_vm0, %v3859_v41 }
0x18b2   :  { %v10195_v27 = vpop.f32.mrb[56].mxu1 }
0x18b3   :  { %v10197_v6 = vpop.f32.mrb[57].mxu1 }
0x18e6   :  { %v10199_v2 = vpop.f32.mrb[58].mxu1 }
0x18e7   :  { %v10201_v15 = vpop.f32.mrb[59].mxu1 }
0x18ea   :  { %v10203_v35 = vpop.f32.mrb[60].mxu1 }
0x18eb   :  { %v10205_v34 = vpop.f32.mrb[61].mxu1 }
0x191b   :  { %v10207_v23 = vpop.f32.mrb[62].mxu1 }
0x191c   :  { %v10209_v32 = vpop.f32.mrb[63].mxu1 }
0x192d   :  { %v7485_v0 = vpop.f32.mrb[64].mxu1 }
0x192e   :  { %v4014_v42 = vmul.f32 0.35355338, %v7485_v0  ;;  %v3974_v7 = vpop.f32.mrb[65].mxu1 }
0x192f   :  { %v4013_v38 = vmul.f32 0.35355338, %v3974_v7 }
0x1930   :  { %v4022_v49 = vadd.f32 %v4014_v42, %v9144_v1 }
0x1931   :  { %v4021_v8 = vadd.f32 %v4013_v38, %v9149_v12  ;;  %v7488_v36 = vpop.f32.mrb[66].mxu1 }
0x1932   :  { %v4016_v61 = vmul.f32 0.35355338, %v7488_v36  ;;  %v3984_v9 = vpop.f32.mrb[67].mxu1  ;;  %v4032_v55 = vsel %vm152_vm3, %v4022_v49, -inf }
0x1933   :  { %v4015_v29 = vmul.f32 0.35355338, %v3984_v9  ;;  %4033 = vmax.xlane.f32.xlu1 %v4032_v55  ;;  %v4029_v48 = vsel %vm152_vm3, %v4021_v8, -inf }
0x1934   :  { %v10216_v20 = vadd.f32 %v4016_v61, %v9155_v19  ;;  %4030 = vmax.xlane.f32.xlu0 %v4029_v48 }
0x1935   :  { %v7491_v56 = vpop.f32.mrb[68].mxu1  ;;  %v4023_v53 = vadd.f32 %v4015_v29, %v9167_v39 }
0x1936   :  { %v3994_v26 = vpop.f32.mrb[69].mxu1  ;;  %v4038_v30 = vsel %vm152_vm3, %v10216_v20, -inf  ;;  %v4018_v41 = vmul.f32 0.35355338, %v7491_v56 }
0x1937   :  { %v4035_v36 = vsel %vm152_vm3, %v4023_v53, -inf  ;;  %v4017_v29 = vmul.f32 0.35355338, %v3994_v26 }
0x1938   :  { %4039 = vmax.xlane.f32.xlu0 %v4038_v30  ;;  %v4026_v7 = vadd.f32 %v4018_v41, %v9174_v47 }
0x1939   :  { %v7494_v0 = vpop.f32.mrb[70].mxu1  ;;  %v4025_v48 = vadd.f32 %v4017_v29, %v9195_v14 }
0x193a   :  { %v4004_v42 = vpop.f32.mrb[71].mxu1  ;;  %v4020_v38 = vmul.f32 0.35355338, %v7494_v0  ;;  %v4044_v9 = vsel %vm152_vm3, %v4026_v7, -inf }
0x193b   :  { %v4041_v56 = vsel %vm152_vm3, %v4025_v48, -inf  ;;  %v4019_v30 = vmul.f32 0.35355338, %v4004_v42 }
0x193c   :  { %4036 = vmax.xlane.f32.xlu0 %v4035_v36  ;;  %v10224_v61 = vadd.f32 %v4020_v38, %v9180_v59 }
0x193d   :  { %v10238_v41 = vadd.f32 %v4019_v30, %v9207_v31 }
0x193e   :  { %v4050_v55 = vsel %vm152_vm3, %v10224_v61, -inf }
0x193f   :  { %v4047_v0 = vsel %vm152_vm3, %v10238_v41, -inf }
0x1940   :  { %4045 = vmax.xlane.f32.xlu0 %v4044_v9 }
0x1944   :  { %8460 = vrot.lane.b32.xlu1 %v10007_v54, %s8917_s14  ;;  %4051 = vmax.xlane.f32.xlu0 %v4050_v55 }
0x195a   :  { %8465 = vrot.lane.b32.xlu0 %v10017_v63, %s8917_s14 }
0x1968   :  { %4042 = vmax.xlane.f32.xlu1 %v4041_v56 }
0x1979   :  { %8470 = vrot.lane.b32.xlu1 %v10027_v58, %s8917_s14 }
0x199d   :  { %4048 = vmax.xlane.f32.xlu1 %v4047_v0 }
0x19ae   :  { %8475 = vrot.lane.b32.xlu1 %v10037_v18, %s8917_s14 }
0x19c0   :  { %v4034_v26 = vpop.xlane.xlu1 %4033 }
0x19c1   :  { %v4054_v38 = vsub.f32 %v4022_v49, %v4034_v26  ;;  %v4031_v36 = vpop.xlane.xlu0 %4030 }
0x19c2   :  { %v4053_v9 = vsub.f32 %v4021_v8, %v4031_v36 }
0x19c3   :  { %v4063_v55 = vmul.f32 1.442695, %v4054_v38 }
0x19c4   :  { %v4061_v29 = vmul.f32 1.442695, %v4053_v9  ;;  %v8461_v56 = vpop.permute.xlu1 %8460 }
0x19c5   :  { %8751 = vpow2.f32 %v4063_v55  ;;  %v8463_v16 = vunpack.i.h.bf16 %v8461_v56  ;;  %v8462_v42 = vunpack.i.l.bf16 %v8461_v56  ;;  %v4040_v37 = vpop.xlane.xlu0 %4039 }
0x19c6   :  { %8753 = vpow2.f32 %v4061_v29  ;;  %v4056_v29 = vsub.f32 %v10216_v20, %v4040_v37 }
0x19c7   :  { %v8051_v30 = vpack.c.bf16 %v8463_v16, %v8462_v42 }
0x19c8   :  { %v4067_v42 = vmul.f32 1.442695, %v4056_v29 }
0x19c9   :  { %8052 = vmatprep.subr.bf16.mxu0 %v8051_v30  ;;  %v4037_v60 = vpop.xlane.xlu0 %4036 }
0x19ca   :  { %v4055_v40 = vsub.f32 %v4023_v53, %v4037_v60  ;;  %8054 = vmatpush3.bf16.msra.mxu0 %v8051_v30 }
0x19cc   :  { %v4065_v0 = vmul.f32 1.442695, %v4055_v40 }
0x19cd   :  { %v4046_v3 = vpop.xlane.xlu0 %4045 }
0x19ce   :  { %8755 = vpow2.f32 %v4065_v0  ;;  %v4058_v22 = vsub.f32 %v4026_v7, %v4046_v3 }
0x19cf   :  { %v10244_v49 = vpop.eup %8751 }
0x19d0   :  { %v10246_v8 = vpop.eup %8753  ;;  %v4071_v26 = vmul.f32 1.442695, %v4058_v22  ;;  %v4080_v38 = vsel %vm152_vm3, %v10244_v49, 0.0 }
0x19d1   :  { %4081 = vadd.xlane.f32.xlu0 %v4080_v38  ;;  %v4052_v36 = vpop.xlane.xlu0 %4051  ;;  %v4077_v16 = vsel %vm152_vm3, %v10246_v8, 0.0 }
0x19d2   :  { %8757 = vpow2.f32 %v4071_v26  ;;  %4078 = vadd.xlane.f32.xlu1 %v4077_v16  ;;  %v4060_v56 = vsub.f32 %v10224_v61, %v4052_v36 }
0x19d3   :  { %8759 = vpow2.f32 %v4067_v42 }
0x19d4   :  { %v4075_v26 = vmul.f32 1.442695, %v4060_v56 }
0x19d5   :  { %v8466_v60 = vpop.permute.xlu0 %8465 }
0x19d6   :  { %v8468_v40 = vunpack.i.h.bf16 %v8466_v60  ;;  %v8467_v53 = vunpack.i.l.bf16 %v8466_v60 }
0x19d8   :  { %v10252_v9 = vpop.eup %8755  ;;  %v8055_v3 = vpack.c.bf16 %v8468_v40, %v8467_v53 }
0x19d9   :  { %v4083_v7 = vsel %vm152_vm3, %v10252_v9, 0.0 }
0x19da   :  { %4084 = vadd.xlane.f32.xlu0 %v4083_v7  ;;  %8056 = vmatprep.subr.bf16.mxu0 %v8055_v3 }
0x19db   :  { %8058 = vmatpush3.bf16.msra.mxu0 %v8055_v3 }
0x19dc   :  { %v10256_v22 = vpop.eup %8757 }
0x19dd   :  { %v4092_v55 = vsel %vm152_vm3, %v10256_v22, 0.0  ;;  %v8760_v3 = vpop.eup %8759 }
0x19de   :  { %4093 = vadd.xlane.f32.xlu0 %v4092_v55  ;;  %v4086_v61 = vsel %vm152_vm3, %v8760_v3, 0.0 }
0x19e3   :  { %8480 = vrot.lane.b32.xlu1 %v10007_v54, %s8918_s15 }
0x19f5   :  { %v4043_v30 = vpop.xlane.xlu1 %4042 }
0x19f6   :  { %v4057_v0 = vsub.f32 %v4025_v48, %v4043_v30 }
0x19f8   :  { %v4069_v38 = vmul.f32 1.442695, %v4057_v0 }
0x19f9   :  { %v8471_v16 = vpop.permute.xlu1 %8470 }
0x19fa   :  { %8761 = vpow2.f32 %v4069_v38  ;;  %v8473_v60 = vunpack.i.h.bf16 %v8471_v16  ;;  %v8472_v40 = vunpack.i.l.bf16 %v8471_v16 }
0x19fb   :  { %8763 = vpow2.f32 %v4075_v26 }
0x19fc   :  { %v8059_v53 = vpack.c.bf16 %v8473_v60, %v8472_v40 }
0x19fe   :  { %8060 = vmatprep.subr.bf16.mxu0 %v8059_v53 }
0x19ff   :  { %8062 = vmatpush3.bf16.msra.mxu0 %v8059_v53 }
0x1a04   :  { %v10264_v7 = vpop.eup %8761 }
0x1a05   :  { %v4089_v37 = vsel %vm152_vm3, %v10264_v7, 0.0  ;;  %v10268_v20 = vpop.eup %8763 }
0x1a06   :  { %4090 = vadd.xlane.f32.xlu0 %v4089_v37  ;;  %v4098_v48 = vsel %vm152_vm3, %v10268_v20, 0.0 }
0x1a07   :  { %4087 = vadd.xlane.f32.xlu1 %v4086_v61 }
0x1a0a   :  { %4099 = vadd.xlane.f32.xlu0 %v4098_v48 }
0x1a18   :  { %8490 = vrot.lane.b32.xlu1 %v10027_v58, %s8918_s15 }
0x1a1c   :  { %8495 = vrot.lane.b32.xlu1 %v10037_v18, %s8918_s15 }
0x1a20   :  { %4270 = vrot.lane.b32.xlu1 %v10001_v13, %s8910_s0 }
0x1a24   :  { %4272 = vrot.lane.b32.xlu1 %v9999_v5, %s8910_s0 }
0x1a28   :  { %4276 = vrot.lane.b32.xlu1 %v10011_v62, %s8910_s0 }
0x1a2a   :  { %v4049_v36 = vpop.xlane.xlu1 %4048 }
0x1a2b   :  { %v4059_v55 = vsub.f32 %v10238_v41, %v4049_v36 }
0x1a2c   :  { %4280 = vrot.lane.b32.xlu1 %v10021_v21, %s8910_s0 }
0x1a2d   :  { %v4073_v29 = vmul.f32 1.442695, %v4059_v55 }
0x1a2e   :  { %v8476_v56 = vpop.permute.xlu1 %8475 }
0x1a2f   :  { %8765 = vpow2.f32 %v4073_v29  ;;  %v8478_v42 = vunpack.i.h.bf16 %v8476_v56  ;;  %v8477_v30 = vunpack.i.l.bf16 %v8476_v56 }
0x1a30   :  { %4284 = vrot.lane.b32.xlu1 %v10031_v4, %s8910_s0 }
0x1a31   :  { %v8063_v0 = vpack.c.bf16 %v8478_v42, %v8477_v30 }
0x1a33   :  { %8064 = vmatprep.subr.bf16.mxu0 %v8063_v0 }
0x1a34   :  { %8066 = vmatpush3.bf16.msra.mxu0 %v8063_v0 }
0x1a39   :  { %v8766_v26 = vpop.eup %8765 }
0x1a3a   :  { %v4095_v38 = vsel %vm152_vm3, %v8766_v26, 0.0 }
0x1a3b   :  { %4096 = vadd.xlane.f32.xlu0 %v4095_v38 }
0x1a51   :  { %8485 = vrot.lane.b32.xlu0 %v10017_v63, %s8918_s15 }
0x1a55   :  { %4274 = vrot.lane.b32.xlu0 %v10013_v44, %s8910_s0 }
0x1a59   :  { %4278 = vrot.lane.b32.xlu0 %v10023_v10, %s8910_s0 }
0x1a5d   :  { %4282 = vrot.lane.b32.xlu0 %v10033_v33, %s8910_s0 }
0x1a5e   :  { %v4082_v41 = vpop.xlane.xlu0 %4081 }
0x1a5f   :  { %8767 = vrcp.f32 %v4082_v41  ;;  %v4079_v16 = vpop.xlane.xlu1 %4078 }
0x1a60   :  { %8769 = vrcp.f32 %v4079_v16 }
0x1a63   :  { %v8481_v60 = vpop.permute.xlu1 %8480 }
0x1a64   :  { %v8483_v40 = vunpack.i.h.bf16 %v8481_v60  ;;  %v8482_v53 = vunpack.i.l.bf16 %v8481_v60 }
0x1a66   :  { %v8067_v37 = vpack.c.bf16 %v8483_v40, %v8482_v53 }
0x1a67   :  { %v4085_v61 = vpop.xlane.xlu0 %4084 }
0x1a68   :  { %8771 = vrcp.f32 %v4085_v61  ;;  %8069 = vmatprep.subr.msk.bf16.mxu0 %vm9080_vm8, %v8067_v37 }
0x1a69   :  { %v8768_v48 = vpop.eup %8767 }
0x1a6a   :  { %v8770_v36 = vpop.eup %8769  ;;  %v4110_v29 = vmul.f32 %v8768_v48, %v10244_v49 }
0x1a6b   :  { %v4109_v55 = vmul.f32 %v8770_v36, %v10246_v8  ;;  %v4094_v30 = vpop.xlane.xlu0 %4093 }
0x1a6d   :  { %7511 = vmatprep.mubr.msk.f32.mxu0 %vm152_vm3, %v4109_v55 }
0x1a6e   :  { %7512 = vmatmul.mubr.msk.f32.vlgmr.msra.gmra.mrb[66].mxu0 %vm152_vm3, %v4110_v29 }
0x1a6f   :  { %8072 = vmatpush3.bf16.xpose.msk.msra.mxu0 %vm9080_vm8, %v8067_v37 }
0x1a72   :  { %v8772_v56 = vpop.eup %8771 }
0x1a73   :  { %v4111_v42 = vmul.f32 %v8772_v56, %v10252_v9 }
0x1a75   :  { %7514 = vmatprep.mubr.msk.f32.mxu0 %vm152_vm3, %v4111_v42 }
0x1a93   :  { %v4091_v0 = vpop.xlane.xlu0 %4090 }
0x1a94   :  { %8773 = vrcp.f32 %v4091_v0  ;;  %v4088_v38 = vpop.xlane.xlu1 %4087 }
0x1a95   :  { %8775 = vrcp.f32 %v4088_v38 }
0x1a96   :  { %8777 = vrcp.f32 %v4094_v30 }
0x1a97   :  { %v4100_v40 = vpop.xlane.xlu0 %4099 }
0x1a98   :  { %8779 = vrcp.f32 %v4100_v40  ;;  %v8491_v37 = vpop.permute.xlu1 %8490 }
0x1a99   :  { %v8493_v48 = vunpack.i.h.bf16 %v8491_v37  ;;  %v8492_v36 = vunpack.i.l.bf16 %v8491_v37 }
0x1a9c   :  { %v8496_v56 = vpop.permute.xlu1 %8495 }
0x1a9d   :  { %v8498_v0 = vunpack.i.h.bf16 %v8496_v56  ;;  %v8497_v38 = vunpack.i.l.bf16 %v8496_v56 }
0x1a9e   :  { %v8774_v8 = vpop.eup %8773 }
0x1a9f   :  { %v8776_v49 = vpop.eup %8775  ;;  %v4113_v60 = vmul.f32 %v8774_v8, %v10264_v7  ;;  %v8079_v7 = vpack.c.bf16 %v8493_v48, %v8492_v36 }
0x1aa0   :  { %v4112_v41 = vmul.f32 %v8776_v49, %v8760_v3  ;;  %v8778_v16 = vpop.eup %8777  ;;  %v4271_v49 = vpop.permute.xlu1 %4270 }
0x1aa1   :  { %v4114_v9 = vmul.f32 %v8778_v16, %v10256_v22 }
0x1aa2   :  { %7515 = vmatmul.mubr.msk.f32.gmra.mrb[68].mxu0 %vm152_vm3, %v4112_v41  ;;  %v8780_v42 = vpop.eup %8779  ;;  %v8085_v41 = vpack.c.bf16 %v8498_v0, %v8497_v38 }
0x1aa3   :  { %7517 = vmatprep.mubr.msk.f32.mxu0 %vm152_vm3, %v4113_v60  ;;  %v4116_v8 = vmul.f32 %v8780_v42, %v10268_v20 }
0x1aa4   :  { %v4273_v16 = vpop.permute.xlu1 %4272 }
0x1aa6   :  { %7518 = vmatmul.mubr.msk.f32.gmra.mrb[70].mxu0 %vm152_vm3, %v4114_v9 }
0x1aa8   :  { %v4277_v20 = vpop.permute.xlu1 %4276 }
0x1aac   :  { %v4281_v9 = vpop.permute.xlu1 %4280 }
0x1ac8   :  { %v4097_v53 = vpop.xlane.xlu0 %4096 }
0x1ac9   :  { %8781 = vrcp.f32 %v4097_v53  ;;  %v4285_v53 = vpop.permute.xlu1 %4284 }
0x1acc   :  { %v8486_v61 = vpop.permute.xlu0 %8485 }
0x1acd   :  { %v8488_v3 = vunpack.i.h.bf16 %v8486_v61  ;;  %v8487_v55 = vunpack.i.l.bf16 %v8486_v61 }
0x1acf   :  { %v8073_v29 = vpack.c.bf16 %v8488_v3, %v8487_v55 }
0x1ad1   :  { %8075 = vmatprep.subr.msk.bf16.mxu0 %vm9080_vm8, %v8073_v29 }
0x1ad2   :  { %8078 = vmatpush3.bf16.xpose.msk.msra.mxu0 %vm9080_vm8, %v8073_v29 }
0x1ad3   :  { %v8782_v22 = vpop.eup %8781  ;;  %8081 = vmatprep.subr.msk.bf16.mxu0 %vm9080_vm8, %v8079_v7 }
0x1ad4   :  { %v4115_v30 = vmul.f32 %v8782_v22, %v8766_v26  ;;  %v4275_v26 = vpop.permute.xlu0 %4274 }
0x1ad6   :  { %7520 = vmatprep.mubr.msk.f32.mxu0 %vm152_vm3, %v4115_v30 }
0x1ad7   :  { %7521 = vmatmul.mubr.msk.f32.gmra.mrb[72].mxu0 %vm152_vm3, %v4116_v8 }
0x1ad8   :  { %7539 = vmatprep.mubr.msk.f32.mxu0 %vm70_vm0, %v4271_v49  ;;  %v4279_v60 = vpop.permute.xlu0 %4278 }
0x1ada   :  { %8084 = vmatpush3.bf16.xpose.msk.msra.mxu0 %vm9080_vm8, %v8079_v7 }
0x1adb   :  { %8087 = vmatprep.subr.msk.bf16.mxu0 %vm9080_vm8, %v8085_v41 }
0x1adc   :  { %v4283_v40 = vpop.permute.xlu0 %4282 }
0x1ae2   :  { %8090 = vmatpush3.bf16.xpose.msk.msra.mxu0 %vm9080_vm8, %v8085_v41 }
0x1ae9   :  { %7540 = vmatmul.mubr.msk.f32.vlgmr.msra.gmra.mrb[74].mxu0 %vm70_vm0, %v4273_v16 }
0x1aea   :  { %7542 = vmatprep.mubr.msk.f32.mxu0 %vm70_vm0, %v4275_v26 }
0x1aed   :  { %7543 = vmatmul.mubr.msk.f32.gmra.mrb[76].mxu0 %vm70_vm0, %v4277_v20 }
0x1aee   :  { %7545 = vmatprep.mubr.msk.f32.mxu0 %vm70_vm0, %v4279_v60 }
0x1af1   :  { %7546 = vmatmul.mubr.msk.f32.gmra.mrb[78].mxu0 %vm70_vm0, %v4281_v9 }
0x1af2   :  { %7548 = vmatprep.mubr.msk.f32.mxu0 %vm70_vm0, %v4283_v40 }
0x1af5   :  { %7549 = vmatmul.mubr.msk.f32.gmra.mrb[80].mxu0 %vm70_vm0, %v4285_v53 }
0x1b41   :  { %v10335_v37 = vpop.f32.mrb[66].mxu0 }
0x1b42   :  { %v10337_v61 = vpop.f32.mrb[67].mxu0 }
0x1b75   :  { %v10339_v48 = vpop.f32.mrb[68].mxu0 }
0x1b76   :  { %v10341_v36 = vpop.f32.mrb[69].mxu0 }
0x1b79   :  { %v10343_v3 = vpop.f32.mrb[70].mxu0 }
0x1b7a   :  { %v10345_v55 = vpop.f32.mrb[71].mxu0 }
0x1baa   :  { %v10347_v29 = vpop.f32.mrb[72].mxu0 }
0x1bab   :  { %v10349_v7 = vpop.f32.mrb[73].mxu0 }
0x1bbc   :  { %v7541_v56 = vpop.f32.mrb[74].mxu0 }
0x1bbd   :  { %v4440_v42 = vmul.f32 0.35355338, %v7541_v56  ;;  %v4400_v22 = vpop.f32.mrb[75].mxu0 }
0x1bbe   :  { %v4439_v30 = vmul.f32 0.35355338, %v4400_v22 }
0x1bbf   :  { %v4448_v0 = vadd.f32 %v4440_v42, %v9144_v1 }
0x1bc0   :  { %v4447_v38 = vadd.f32 %v4439_v30, %v9149_v12  ;;  %v7544_v8 = vpop.f32.mrb[76].mxu0 }
0x1bc1   :  { %v4442_v49 = vmul.f32 0.35355338, %v7544_v8  ;;  %v4410_v41 = vpop.f32.mrb[77].mxu0  ;;  %v4458_v16 = vsel %vm152_vm3, %v4448_v0, -inf }
0x1bc2   :  { %v4441_v26 = vmul.f32 0.35355338, %v4410_v41  ;;  %4459 = vmax.xlane.f32.xlu1 %v4458_v16  ;;  %v4455_v20 = vsel %vm152_vm3, %v4447_v38, -inf }
0x1bc3   :  { %v10356_v60 = vadd.f32 %v4442_v49, %v9155_v19  ;;  %4456 = vmax.xlane.f32.xlu0 %v4455_v20 }
0x1bc4   :  { %v7547_v9 = vpop.f32.mrb[78].mxu0  ;;  %v4449_v56 = vadd.f32 %v4441_v26, %v9167_v39 }
0x1bc5   :  { %v4420_v40 = vpop.f32.mrb[79].mxu0  ;;  %v4464_v53 = vsel %vm152_vm3, %v10356_v60, -inf  ;;  %v4444_v42 = vmul.f32 0.35355338, %v7547_v9 }
0x1bc6   :  { %v4461_v16 = vsel %vm152_vm3, %v4449_v56, -inf  ;;  %v4443_v26 = vmul.f32 0.35355338, %v4420_v40 }
0x1bc7   :  { %4465 = vmax.xlane.f32.xlu0 %v4464_v53  ;;  %v4452_v8 = vadd.f32 %v4444_v42, %v9174_v47 }
0x1bc8   :  { %v7550_v22 = vpop.f32.mrb[80].mxu0  ;;  %v4451_v9 = vadd.f32 %v4443_v26, %v9195_v14 }
0x1bc9   :  { %v4430_v30 = vpop.f32.mrb[81].mxu0  ;;  %v4446_v41 = vmul.f32 0.35355338, %v7550_v22  ;;  %v4470_v20 = vsel %vm152_vm3, %v4452_v8, -inf }
0x1bca   :  { %v4467_v53 = vsel %vm152_vm3, %v4451_v9, -inf  ;;  %v4445_v42 = vmul.f32 0.35355338, %v4430_v30 }
0x1bcb   :  { %4462 = vmax.xlane.f32.xlu0 %v4461_v16  ;;  %v10364_v49 = vadd.f32 %v4446_v41, %v9180_v59 }
0x1bcc   :  { %v10378_v22 = vadd.f32 %v4445_v42, %v9207_v31 }
0x1bcd   :  { %v4476_v17 = vsel %vm152_vm3, %v10364_v49, -inf }
0x1bce   :  { %v4473_v41 = vsel %vm152_vm3, %v10378_v22, -inf }
0x1bcf   :  { %4471 = vmax.xlane.f32.xlu0 %v4470_v20 }
0x1bd3   :  { %8500 = vrot.lane.b32.xlu1 %v10007_v54, %s8919_s16  ;;  %4477 = vmax.xlane.f32.xlu0 %v4476_v17 }
0x1be9   :  { %8505 = vrot.lane.b32.xlu0 %v10017_v63, %s8919_s16 }
0x1bf7   :  { %4468 = vmax.xlane.f32.xlu1 %v4467_v53 }
0x1c08   :  { %8510 = vrot.lane.b32.xlu1 %v10027_v58, %s8919_s16 }
0x1c2c   :  { %4474 = vmax.xlane.f32.xlu1 %v4473_v41 }
0x1c3d   :  { %8515 = vrot.lane.b32.xlu1 %v10037_v18, %s8919_s16 }
0x1c4f   :  { %v4460_v17 = vpop.xlane.xlu1 %4459 }
0x1c50   :  { %v4480_v40 = vsub.f32 %v4448_v0, %v4460_v17  ;;  %v4457_v16 = vpop.xlane.xlu0 %4456 }
0x1c51   :  { %v4479_v20 = vsub.f32 %v4447_v38, %v4457_v16 }
0x1c52   :  { %v4489_v26 = vmul.f32 1.442695, %v4480_v40 }
0x1c53   :  { %v4487_v53 = vmul.f32 1.442695, %v4479_v20  ;;  %v8501_v24 = vpop.permute.xlu1 %8500 }
0x1c54   :  { %8783 = vpow2.f32 %v4489_v26  ;;  %v8503_v11 = vunpack.i.h.bf16 %v8501_v24  ;;  %v8502_v30 = vunpack.i.l.bf16 %v8501_v24  ;;  %v4466_v25 = vpop.xlane.xlu0 %4465 }
0x1c55   :  { %8785 = vpow2.f32 %v4487_v53  ;;  %v4482_v26 = vsub.f32 %v10356_v60, %v4466_v25 }
0x1c56   :  { %v8091_v42 = vpack.c.bf16 %v8503_v11, %v8502_v30 }
0x1c57   :  { %v4493_v30 = vmul.f32 1.442695, %v4482_v26 }
0x1c58   :  { %8092 = vmatprep.subr.bf16.mxu1 %v8091_v42  ;;  %v4463_v50 = vpop.xlane.xlu0 %4462 }
0x1c59   :  { %v4481_v43 = vsub.f32 %v4449_v56, %v4463_v50  ;;  %8094 = vmatpush3.bf16.msra.mxu1 %v8091_v42 }
0x1c5b   :  { %v4491_v41 = vmul.f32 1.442695, %v4481_v43 }
0x1c5c   :  { %v4472_v52 = vpop.xlane.xlu0 %4471 }
0x1c5d   :  { %8787 = vpow2.f32 %v4491_v41  ;;  %v4484_v51 = vsub.f32 %v4452_v8, %v4472_v52 }
0x1c5e   :  { %v10384_v0 = vpop.eup %8783 }
0x1c5f   :  { %v10386_v38 = vpop.eup %8785  ;;  %v4497_v17 = vmul.f32 1.442695, %v4484_v51  ;;  %v4506_v40 = vsel %vm152_vm3, %v10384_v0, 0.0 }
0x1c60   :  { %4507 = vadd.xlane.f32.xlu0 %v4506_v40  ;;  %v4478_v24 = vpop.xlane.xlu0 %4477  ;;  %v4503_v11 = vsel %vm152_vm3, %v10386_v38, 0.0 }
0x1c61   :  { %8789 = vpow2.f32 %v4497_v17  ;;  %4504 = vadd.xlane.f32.xlu1 %v4503_v11  ;;  %v4486_v53 = vsub.f32 %v10364_v49, %v4478_v24 }
0x1c62   :  { %8791 = vpow2.f32 %v4493_v30 }
0x1c63   :  { %v4501_v17 = vmul.f32 1.442695, %v4486_v53 }
0x1c64   :  { %v8506_v50 = vpop.permute.xlu0 %8505 }
0x1c65   :  { %v8508_v43 = vunpack.i.h.bf16 %v8506_v50  ;;  %v8507_v56 = vunpack.i.l.bf16 %v8506_v50 }
0x1c67   :  { %v10392_v16 = vpop.eup %8787  ;;  %v8095_v52 = vpack.c.bf16 %v8508_v43, %v8507_v56 }
0x1c68   :  { %v4509_v8 = vsel %vm152_vm3, %v10392_v16, 0.0 }
0x1c69   :  { %4510 = vadd.xlane.f32.xlu0 %v4509_v8  ;;  %8096 = vmatprep.subr.bf16.mxu1 %v8095_v52 }
0x1c6a   :  { %8098 = vmatpush3.bf16.msra.mxu1 %v8095_v52 }
0x1c6b   :  { %v10396_v51 = vpop.eup %8789 }
0x1c6c   :  { %v4518_v20 = vsel %vm152_vm3, %v10396_v51, 0.0  ;;  %v8792_v52 = vpop.eup %8791 }
0x1c6d   :  { %4519 = vadd.xlane.f32.xlu0 %v4518_v20  ;;  %v4512_v49 = vsel %vm152_vm3, %v8792_v52, 0.0 }
0x1c72   :  { %8520 = vrot.lane.b32.xlu1 %v10007_v54, %s8920_s17 }
0x1c84   :  { %v4469_v42 = vpop.xlane.xlu1 %4468 }
0x1c85   :  { %v4483_v41 = vsub.f32 %v4451_v9, %v4469_v42 }
0x1c87   :  { %v4495_v40 = vmul.f32 1.442695, %v4483_v41 }
0x1c88   :  { %v8511_v11 = vpop.permute.xlu1 %8510 }
0x1c89   :  { %8793 = vpow2.f32 %v4495_v40  ;;  %v8513_v50 = vunpack.i.h.bf16 %v8511_v11  ;;  %v8512_v43 = vunpack.i.l.bf16 %v8511_v11 }
0x1c8a   :  { %8795 = vpow2.f32 %v4501_v17 }
0x1c8b   :  { %v8099_v56 = vpack.c.bf16 %v8513_v50, %v8512_v43 }
0x1c8d   :  { %8100 = vmatprep.subr.bf16.mxu1 %v8099_v56 }
0x1c8e   :  { %8102 = vmatpush3.bf16.msra.mxu1 %v8099_v56 }
0x1c93   :  { %v10404_v8 = vpop.eup %8793 }
0x1c94   :  { %v4515_v25 = vsel %vm152_vm3, %v10404_v8, 0.0  ;;  %v10408_v60 = vpop.eup %8795 }
0x1c95   :  { %4516 = vadd.xlane.f32.xlu0 %v4515_v25  ;;  %v4524_v9 = vsel %vm152_vm3, %v10408_v60, 0.0 }
0x1c96   :  { %4513 = vadd.xlane.f32.xlu1 %v4512_v49 }
0x1c99   :  { %4525 = vadd.xlane.f32.xlu0 %v4524_v9 }
0x1ca7   :  { %8530 = vrot.lane.b32.xlu1 %v10027_v58, %s8920_s17 }
0x1cab   :  { %8535 = vrot.lane.b32.xlu1 %v10037_v18, %s8920_s17 }
0x1caf   :  { %4696 = vrot.lane.b32.xlu1 %v10001_v13, %s8912_s8 }
0x1cb3   :  { %4698 = vrot.lane.b32.xlu1 %v9999_v5, %s8912_s8 }
0x1cb7   :  { %4702 = vrot.lane.b32.xlu1 %v10011_v62, %s8912_s8 }
0x1cb9   :  { %v4475_v24 = vpop.xlane.xlu1 %4474 }
0x1cba   :  { %v4485_v20 = vsub.f32 %v10378_v22, %v4475_v24 }
0x1cbb   :  { %4706 = vrot.lane.b32.xlu1 %v10021_v21, %s8912_s8 }
0x1cbc   :  { %v4499_v26 = vmul.f32 1.442695, %v4485_v20 }
0x1cbd   :  { %v8516_v53 = vpop.permute.xlu1 %8515 }
0x1cbe   :  { %8797 = vpow2.f32 %v4499_v26  ;;  %v8518_v30 = vunpack.i.h.bf16 %v8516_v53  ;;  %v8517_v42 = vunpack.i.l.bf16 %v8516_v53 }
0x1cbf   :  { %4710 = vrot.lane.b32.xlu1 %v10031_v4, %s8912_s8 }
0x1cc0   :  { %v8103_v13 = vpack.c.bf16 %v8518_v30, %v8517_v42 }
0x1cc2   :  { %8104 = vmatprep.subr.bf16.mxu1 %v8103_v13 }
0x1cc3   :  { %8106 = vmatpush3.bf16.msra.mxu1 %v8103_v13 }
0x1cc8   :  { %v8798_v5 = vpop.eup %8797 }
0x1cc9   :  { %v4521_v62 = vsel %vm152_vm3, %v8798_v5, 0.0 }
0x1cca   :  { %4522 = vadd.xlane.f32.xlu0 %v4521_v62 }
0x1ce0   :  { %8525 = vrot.lane.b32.xlu0 %v10017_v63, %s8920_s17 }
0x1ce4   :  { %4700 = vrot.lane.b32.xlu0 %v10013_v44, %s8912_s8 }
0x1ce8   :  { %4704 = vrot.lane.b32.xlu0 %v10023_v10, %s8912_s8 }
0x1cec   :  { %4708 = vrot.lane.b32.xlu0 %v10033_v33, %s8912_s8 }
0x1ced   :  { %v4508_v21 = vpop.xlane.xlu0 %4507 }
0x1cee   :  { %8799 = vrcp.f32 %v4508_v21  ;;  %v4505_v4 = vpop.xlane.xlu1 %4504 }
0x1cef   :  { %8801 = vrcp.f32 %v4505_v4 }
0x1cf2   :  { %v8521_v22 = vpop.permute.xlu1 %8520 }
0x1cf3   :  { %v8523_v41 = vunpack.i.h.bf16 %v8521_v22  ;;  %v8522_v17 = vunpack.i.l.bf16 %v8521_v22 }
0x1cf5   :  { %v8107_v40 = vpack.c.bf16 %v8523_v41, %v8522_v17 }
0x1cf6   :  { %v4511_v11 = vpop.xlane.xlu0 %4510 }
0x1cf7   :  { %8803 = vrcp.f32 %v4511_v11  ;;  %8109 = vmatprep.subr.msk.bf16.mxu1 %vm9080_vm8, %v8107_v40 }
0x1cf8   :  { %v8800_v44 = vpop.eup %8799 }
0x1cf9   :  { %v8802_v50 = vpop.eup %8801  ;;  %v4536_v43 = vmul.f32 %v8800_v44, %v10384_v0 }
0x1cfa   :  { %v4535_v10 = vmul.f32 %v8802_v50, %v10386_v38  ;;  %v4520_v25 = vpop.xlane.xlu0 %4519 }
0x1cfc   :  { %7567 = vmatprep.mubr.msk.f32.mxu1 %vm152_vm3, %v4535_v10 }
0x1cfd   :  { %7568 = vmatmul.mubr.msk.f32.vlgmr.msra.gmra.mrb[72].mxu1 %vm152_vm3, %v4536_v43 }
0x1cfe   :  { %8112 = vmatpush3.bf16.xpose.msk.msra.mxu1 %vm9080_vm8, %v8107_v40 }
0x1d01   :  { %v8804_v33 = vpop.eup %8803 }
0x1d02   :  { %v4537_v56 = vmul.f32 %v8804_v33, %v10392_v16 }
0x1d04   :  { %7570 = vmatprep.mubr.msk.f32.mxu1 %vm152_vm3, %v4537_v56 }
0x1d22   :  { %v4517_v49 = vpop.xlane.xlu0 %4516 }
0x1d23   :  { %8805 = vrcp.f32 %v4517_v49  ;;  %v4514_v9 = vpop.xlane.xlu1 %4513 }
0x1d24   :  { %8807 = vrcp.f32 %v4514_v9 }
0x1d25   :  { %8809 = vrcp.f32 %v4520_v25 }
0x1d26   :  { %v4526_v53 = vpop.xlane.xlu0 %4525 }
0x1d27   :  { %8811 = vrcp.f32 %v4526_v53  ;;  %v8531_v42 = vpop.permute.xlu1 %8530 }
0x1d28   :  { %v8533_v62 = vunpack.i.h.bf16 %v8531_v42  ;;  %v8532_v21 = vunpack.i.l.bf16 %v8531_v42 }
0x1d2b   :  { %v8536_v41 = vpop.permute.xlu1 %8535 }
0x1d2c   :  { %v8538_v11 = vunpack.i.h.bf16 %v8536_v41  ;;  %v8537_v44 = vunpack.i.l.bf16 %v8536_v41 }
0x1d2d   :  { %v8806_v38 = vpop.eup %8805 }
0x1d2e   :  { %v8808_v0 = vpop.eup %8807  ;;  %v4539_v26 = vmul.f32 %v8806_v38, %v10404_v8  ;;  %v8119_v8 = vpack.c.bf16 %v8533_v62, %v8532_v21  ;;  %v8125_v43 = vpack.c.bf16 %v8538_v11, %v8537_v44 }
0x1d2f   :  { %v4538_v24 = vmul.f32 %v8808_v0, %v8792_v52  ;;  %v8810_v20 = vpop.eup %8809  ;;  %v4697_v10 = vpop.permute.xlu1 %4696 }
0x1d30   :  { %v4540_v16 = vmul.f32 %v8810_v20, %v10396_v51 }
0x1d31   :  { %7571 = vmatmul.mubr.msk.f32.gmra.mrb[74].mxu1 %vm152_vm3, %v4538_v24  ;;  %v8812_v17 = vpop.eup %8811 }
0x1d32   :  { %7573 = vmatprep.mubr.msk.f32.mxu1 %vm152_vm3, %v4539_v26  ;;  %v4542_v50 = vmul.f32 %v8812_v17, %v10408_v60 }
0x1d33   :  { %v4699_v33 = vpop.permute.xlu1 %4698 }
0x1d35   :  { %7574 = vmatmul.mubr.msk.f32.gmra.mrb[76].mxu1 %vm152_vm3, %v4540_v16 }
0x1d37   :  { %v4703_v60 = vpop.permute.xlu1 %4702 }
0x1d3b   :  { %v4707_v25 = vpop.permute.xlu1 %4706 }
0x1d3f   :  { %v4711_v9 = vpop.permute.xlu1 %4710 }
0x1d57   :  { %v4523_v30 = vpop.xlane.xlu0 %4522 }
0x1d58   :  { %8813 = vrcp.f32 %v4523_v30 }
0x1d5b   :  { %v8526_v13 = vpop.permute.xlu0 %8525 }
0x1d5c   :  { %v8528_v52 = vunpack.i.h.bf16 %v8526_v13  ;;  %v8527_v4 = vunpack.i.l.bf16 %v8526_v13 }
0x1d5e   :  { %v8113_v22 = vpack.c.bf16 %v8528_v52, %v8527_v4 }
0x1d60   :  { %8115 = vmatprep.subr.msk.bf16.mxu1 %vm9080_vm8, %v8113_v22 }
0x1d61   :  { %8118 = vmatpush3.bf16.xpose.msk.msra.mxu1 %vm9080_vm8, %v8113_v22 }
0x1d62   :  { %v8814_v51 = vpop.eup %8813  ;;  %8121 = vmatprep.subr.msk.bf16.mxu1 %vm9080_vm8, %v8119_v8 }
0x1d63   :  { %v4541_v40 = vmul.f32 %v8814_v51, %v8798_v5  ;;  %v4701_v5 = vpop.permute.xlu0 %4700 }
0x1d65   :  { %7576 = vmatprep.mubr.msk.f32.mxu1 %vm152_vm3, %v4541_v40 }
0x1d66   :  { %7577 = vmatmul.mubr.msk.f32.gmra.mrb[78].mxu1 %vm152_vm3, %v4542_v50 }
0x1d67   :  { %7595 = vmatprep.mubr.msk.f32.mxu1 %vm70_vm0, %v4697_v10  ;;  %v4705_v56 = vpop.permute.xlu0 %4704 }
0x1d69   :  { %8124 = vmatpush3.bf16.xpose.msk.msra.mxu1 %vm9080_vm8, %v8119_v8 }
0x1d6a   :  { %8127 = vmatprep.subr.msk.bf16.mxu1 %vm9080_vm8, %v8125_v43 }
0x1d6b   :  { %v4709_v49 = vpop.permute.xlu0 %4708 }
0x1d71   :  { %8130 = vmatpush3.bf16.xpose.msk.msra.mxu1 %vm9080_vm8, %v8125_v43 }
0x1d78   :  { %7596 = vmatmul.mubr.msk.f32.vlgmr.msra.gmra.mrb[80].mxu1 %vm70_vm0, %v4699_v33 }
0x1d79   :  { %7598 = vmatprep.mubr.msk.f32.mxu1 %vm70_vm0, %v4701_v5 }
0x1d7c   :  { %7599 = vmatmul.mubr.msk.f32.gmra.mrb[82].mxu1 %vm70_vm0, %v4703_v60 }
0x1d7d   :  { %7601 = vmatprep.mubr.msk.f32.mxu1 %vm70_vm0, %v4705_v56 }
0x1d80   :  { %7602 = vmatmul.mubr.msk.f32.gmra.mrb[84].mxu1 %vm70_vm0, %v4707_v25 }
0x1d81   :  { %7604 = vmatprep.mubr.msk.f32.mxu1 %vm70_vm0, %v4709_v49 }
0x1d84   :  { %7605 = vmatmul.mubr.msk.f32.gmra.mrb[86].mxu1 %vm70_vm0, %v4711_v9 }
0x1dd0   :  { %v10475_v28 = vpop.f32.mrb[72].mxu1 }
0x1dd1   :  { %v10477_v38 = vpop.f32.mrb[73].mxu1 }
0x1e04   :  { %v10479_v0 = vpop.f32.mrb[74].mxu1 }
0x1e05   :  { %v10481_v24 = vpop.f32.mrb[75].mxu1 }
0x1e08   :  { %v10483_v20 = vpop.f32.mrb[76].mxu1 }
0x1e09   :  { %v10485_v26 = vpop.f32.mrb[77].mxu1 }
0x1e39   :  { %v10487_v16 = vpop.f32.mrb[78].mxu1 }
0x1e3a   :  { %v10489_v53 = vpop.f32.mrb[79].mxu1 }
0x1e4b   :  { %v7597_v30 = vpop.f32.mrb[80].mxu1 }
0x1e4c   :  { %v4866_v42 = vmul.f32 0.35355338, %v7597_v30  ;;  %v4826_v13 = vpop.f32.mrb[81].mxu1 }
0x1e4d   :  { %v4865_v62 = vmul.f32 0.35355338, %v4826_v13 }
0x1e4e   :  { %v4874_v21 = vadd.f32 %v4866_v42, %v9144_v1 }
0x1e4f   :  { %v4873_v52 = vadd.f32 %v4865_v62, %v9149_v12  ;;  %v7600_v4 = vpop.f32.mrb[82].mxu1 }
0x1e50   :  { %v4868_v22 = vmul.f32 0.35355338, %v7600_v4  ;;  %v4836_v8 = vpop.f32.mrb[83].mxu1  ;;  %v4884_v41 = vsel %vm152_vm3, %v4874_v21, -inf }
0x1e51   :  { %v4867_v17 = vmul.f32 0.35355338, %v4836_v8  ;;  %4885 = vmax.xlane.f32.xlu1 %v4884_v41  ;;  %v4881_v51 = vsel %vm152_vm3, %v4873_v52, -inf }
0x1e52   :  { %4882 = vmax.xlane.f32.xlu0 %v4881_v51  ;;  %v4876_v44 = vadd.f32 %v4868_v22, %v9155_v19 }
0x1e53   :  { %v4875_v40 = vadd.f32 %v4867_v17, %v9167_v39  ;;  %v7603_v11 = vpop.f32.mrb[84].mxu1 }
0x1e54   :  { %v4846_v50 = vpop.f32.mrb[85].mxu1  ;;  %v4870_v10 = vmul.f32 0.35355338, %v7603_v11  ;;  %v4890_v60 = vsel %vm152_vm3, %v4876_v44, -inf }
0x1e55   :  { %v4869_v1 = vmul.f32 0.35355338, %v4846_v50  ;;  %v4887_v12 = vsel %vm152_vm3, %v4875_v40, -inf }
0x1e56   :  { %4888 = vmax.xlane.f32.xlu0 %v4887_v12  ;;  %v4878_v56 = vadd.f32 %v4870_v10, %v9174_v47 }
0x1e57   :  { %v10499_v43 = vadd.f32 %v4869_v1, %v9195_v14  ;;  %v7606_v33 = vpop.f32.mrb[86].mxu1 }
0x1e58   :  { %v4856_v5 = vpop.f32.mrb[87].mxu1  ;;  %v4872_v25 = vmul.f32 0.35355338, %v7606_v33  ;;  %v4896_v14 = vsel %vm152_vm3, %v4878_v56, -inf }
0x1e59   :  { %v4871_v39 = vmul.f32 0.35355338, %v4856_v5  ;;  %v4893_v19 = vsel %vm152_vm3, %v10499_v43, -inf }
0x1e5a   :  { %4891 = vmax.xlane.f32.xlu0 %v4890_v60  ;;  %4894 = vmax.xlane.f32.xlu1 %v4893_v19  ;;  %v10509_v9 = vadd.f32 %v4872_v25, %v9180_v59 }
0x1e5b   :  { %v10506_v49 = vadd.f32 %v4871_v39, %v9207_v31 }
0x1e5c   :  { %v4902_v47 = vsel %vm152_vm3, %v10509_v9, -inf }
0x1e5d   :  { %v4899_v30 = vsel %vm152_vm3, %v10506_v49, -inf }
0x1e5e   :  { %4897 = vmax.xlane.f32.xlu0 %v4896_v14  ;;  %4900 = vmax.xlane.f32.xlu1 %v4899_v30 }
0x1e62   :  { %4903 = vmax.xlane.f32.xlu0 %v4902_v47 }
0x1e6f   :  { %8540 = vrot.lane.b32.xlu1 %v10007_v54, %s8921_s18 }
0x1e78   :  { %8545 = vrot.lane.b32.xlu0 %v10017_v63, %s8921_s18 }
0x1ede   :  { %v4886_v31 = vpop.xlane.xlu1 %4885 }
0x1edf   :  { %v4906_v59 = vsub.f32 %v4874_v21, %v4886_v31  ;;  %v4883_v42 = vpop.xlane.xlu0 %4882 }
0x1ee0   :  { %v4905_v13 = vsub.f32 %v4873_v52, %v4883_v42 }
0x1ee1   :  { %v4915_v62 = vmul.f32 1.442695, %v4906_v59 }
0x1ee2   :  { %v4913_v4 = vmul.f32 1.442695, %v4905_v13 }
0x1ee3   :  { %8815 = vpow2.f32 %v4915_v62  ;;  %v4889_v22 = vpop.xlane.xlu0 %4888 }
0x1ee4   :  { %8817 = vpow2.f32 %v4913_v4  ;;  %v4907_v8 = vsub.f32 %v4875_v40, %v4889_v22 }
0x1ee6   :  { %v4917_v41 = vmul.f32 1.442695, %v4907_v8 }
0x1ee7   :  { %v4892_v17 = vpop.xlane.xlu0 %4891  ;;  %v4895_v51 = vpop.xlane.xlu1 %4894 }
0x1ee8   :  { %8819 = vpow2.f32 %v4917_v41  ;;  %v4908_v11 = vsub.f32 %v4876_v44, %v4892_v17  ;;  %v4909_v62 = vsub.f32 %v10499_v43, %v4895_v51 }
0x1eea   :  { %v4919_v50 = vmul.f32 1.442695, %v4908_v11  ;;  %v4921_v4 = vmul.f32 1.442695, %v4909_v62  ;;  %v5242_v62 = vld [vmem:[#allocation2 + $0x110] sm:$0xff] }
0x1eeb   :  { %v4898_v54 = vpop.xlane.xlu0 %4897  ;;  %v4901_v10 = vpop.xlane.xlu1 %4900 }
0x1eec   :  { %8821 = vpow2.f32 %v4919_v50  ;;  %v4910_v63 = vsub.f32 %v4878_v56, %v4898_v54  ;;  %v4911_v22 = vsub.f32 %v10506_v49, %v4901_v10 }
0x1eed   :  { %v10520_v1 = vpop.eup %8815 }
0x1eee   :  { %v10522_v21 = vpop.eup %8817  ;;  %v4923_v52 = vmul.f32 1.442695, %v4910_v63  ;;  %v4932_v12 = vsel %vm152_vm3, %v10520_v1, 0.0  ;;  %v4925_v8 = vmul.f32 1.442695, %v4911_v22  ;;  %v5244_v22 = vld [vmem:[#allocation2 + $0x120] sm:$0xff] }
0x1eef   :  { %4933 = vadd.xlane.f32.xlu0 %v4932_v12  ;;  %v4904_v40 = vpop.xlane.xlu0 %4903  ;;  %v8541_v33 = vpop.permute.xlu1 %8540  ;;  %v4929_v5 = vsel %vm152_vm3, %v10522_v21, 0.0 }
0x1ef0   :  { %8823 = vpow2.f32 %v4923_v52  ;;  %v8543_v44 = vunpack.i.h.bf16 %v8541_v33  ;;  %v8542_v60 = vunpack.i.l.bf16 %v8541_v33  ;;  %4930 = vadd.xlane.f32.xlu1 %v4929_v5  ;;  %v4912_v41 = vsub.f32 %v10509_v9, %v4904_v40 }
0x1ef1   :  { %8825 = vpow2.f32 %v4921_v4  ;;  %v5243_v4 = vld [vmem:[#allocation2 + $0x118] sm:$0xff] }
0x1ef2   :  { %v10528_v25 = vpop.eup %8819  ;;  %v8131_v56 = vpack.c.bf16 %v8543_v44, %v8542_v60  ;;  %8827 = vpow2.f32 %v4925_v8  ;;  %v8147_v8 = vpack.c.bf16 %v5243_v4, %v5242_v62 }
0x1ef3   :  { %v8546_v39 = vpop.permute.xlu0 %8545  ;;  %v4935_v19 = vsel %vm152_vm3, %v10528_v25, 0.0 }
0x1ef4   :  { %v8548_v14 = vunpack.i.h.bf16 %v8546_v39  ;;  %v8547_v30 = vunpack.i.l.bf16 %v8546_v39  ;;  %4936 = vadd.xlane.f32.xlu1 %v4935_v19  ;;  %8132 = vmatprep.subr.bf16.mxu0 %v8131_v56 }
0x1ef5   :  { %8134 = vmatpush3.bf16.msra.mxu0 %v8131_v56 }
0x1ef6   :  { %v10532_v47 = vpop.eup %8821  ;;  %v8135_v31 = vpack.c.bf16 %v8548_v14, %v8547_v30 }
0x1ef7   :  { %v4938_v59 = vsel %vm152_vm3, %v10532_v47, 0.0 }
0x1ef8   :  { %4939 = vadd.xlane.f32.xlu0 %v4938_v59  ;;  %8136 = vmatprep.subr.bf16.mxu0 %v8135_v31 }
0x1ef9   :  { %8138 = vmatpush3.bf16.msra.mxu0 %v8135_v31 }
0x1efa   :  { %v10536_v42 = vpop.eup %8823 }
0x1efb   :  { %v4944_v13 = vsel %vm152_vm3, %v10536_v42, 0.0 }
0x1efc   :  { %4945 = vadd.xlane.f32.xlu0 %v4944_v13 }
0x1f05   :  { %8550 = vrot.lane.b32.xlu1 %v10027_v58, %s8921_s18  ;;  %v4927_v58 = vmul.f32 1.442695, %v4912_v41  ;;  %v5245_v41 = vld [vmem:[#allocation2 + $0x128] sm:$0xff] }
0x1f07   :  { %8829 = vpow2.f32 %v4927_v58  ;;  %v8151_v58 = vpack.c.bf16 %v5245_v41, %v5244_v22 }
0x1f12   :  { %8555 = vrot.lane.b32.xlu0 %v10037_v18, %s8921_s18  ;;  %v8826_v18 = vpop.eup %8825 }
0x1f13   :  { %v8828_v43 = vpop.eup %8827 }
0x1f14   :  { %v8830_v49 = vpop.eup %8829 }
0x1f15   :  { %v4950_v9 = vsel %vm152_vm3, %v8830_v49, 0.0 }
0x1f16   :  { %5132 = vrot.lane.b32.xlu0 %v10335_v37, %s8907_s26  ;;  %v4941_v37 = vsel %vm152_vm3, %v8826_v18, 0.0 }
0x1f1a   :  { %5162 = vrot.lane.b32.xlu0 %v10477_v38, %s8922_s19  ;;  %v4947_v38 = vsel %vm152_vm3, %v8828_v43, 0.0 }
0x1f1e   :  { %5134 = vrot.lane.b32.xlu0 %v10341_v36, %s8907_s26 }
0x1f22   :  { %5166 = vrot.lane.b32.xlu0 %v10481_v24, %s8922_s19 }
0x1f29   :  { %4942 = vadd.xlane.f32.xlu1 %v4941_v37 }
0x1f2d   :  { %4948 = vadd.xlane.f32.xlu1 %v4947_v38 }
0x1f31   :  { %4951 = vadd.xlane.f32.xlu1 %v4950_v9 }
0x1f42   :  { %5130 = vrot.lane.b32.xlu1 %v10337_v61, %s8907_s26 }
0x1f46   :  { %5164 = vrot.lane.b32.xlu1 %v10475_v28, %s8922_s19 }
0x1f4a   :  { %5136 = vrot.lane.b32.xlu1 %v10339_v48, %s8907_s26 }
0x1f4e   :  { %5168 = vrot.lane.b32.xlu1 %v10479_v0, %s8922_s19 }
0x1f7c   :  { %v4934_v24 = vpop.xlane.xlu0 %4933 }
0x1f7d   :  { %v4931_v36 = vpop.xlane.xlu1 %4930 }
0x1f7e   :  { %8831 = vrcp.f32 %v4931_v36 }
0x1f7f   :  { %8833 = vrcp.f32 %v4934_v24 }
0x1f81   :  { %v4937_v17 = vpop.xlane.xlu1 %4936 }
0x1f82   :  { %8835 = vrcp.f32 %v4937_v17 }
0x1f85   :  { %v4940_v51 = vpop.xlane.xlu0 %4939  ;;  %v8551_v11 = vpop.permute.xlu1 %8550 }
0x1f86   :  { %v8553_v50 = vunpack.i.h.bf16 %v8551_v11  ;;  %v8552_v54 = vunpack.i.l.bf16 %v8551_v11  ;;  %8837 = vrcp.f32 %v4940_v51 }
0x1f88   :  { %v8832_v10 = vpop.eup %8831  ;;  %v8139_v61 = vpack.c.bf16 %v8553_v50, %v8552_v54 }
0x1f89   :  { %v4946_v63 = vpop.xlane.xlu0 %4945  ;;  %v4961_v28 = vmul.f32 %v8832_v10, %v10522_v21  ;;  %v8834_v40 = vpop.eup %8833 }
0x1f8a   :  { %8140 = vmatprep.subr.bf16.mxu0 %v8139_v61  ;;  %v4962_v5 = vmul.f32 %v8834_v40, %v10520_v1  ;;  %8839 = vrcp.f32 %v4946_v63 }
0x1f8b   :  { %8142 = vmatpush3.bf16.msra.mxu0 %v8139_v61  ;;  %7623 = vmatprep.mubr.msk.f32.mxu0 %vm152_vm3, %v4961_v28 }
0x1f8c   :  { %v8836_v33 = vpop.eup %8835 }
0x1f8d   :  { %v8556_v48 = vpop.permute.xlu0 %8555  ;;  %v4963_v60 = vmul.f32 %v8836_v33, %v10528_v25 }
0x1f8e   :  { %v8558_v0 = vunpack.i.h.bf16 %v8556_v48  ;;  %v8557_v52 = vunpack.i.l.bf16 %v8556_v48 }
0x1f90   :  { %v8143_v12 = vpack.c.bf16 %v8558_v0, %v8557_v52  ;;  %v8838_v44 = vpop.eup %8837 }
0x1f91   :  { %v4964_v21 = vmul.f32 %v8838_v44, %v10532_v47 }
0x1f92   :  { %8144 = vmatprep.subr.bf16.mxu0 %v8143_v12 }
0x1f93   :  { %8146 = vmatpush3.bf16.msra.mxu0 %v8143_v12 }
0x1f94   :  { %v8840_v14 = vpop.eup %8839  ;;  %8148 = vmatprep.subr.bf16.mxu0 %v8147_v8 }
0x1f95   :  { %v4966_v25 = vmul.f32 %v8840_v14, %v10536_v42 }
0x1f96   :  { %7624 = vmatmul.mubr.msk.f32.vlgmr.msra.gmra.mrb[82].mxu0 %vm152_vm3, %v4962_v5 }
0x1f97   :  { %7626 = vmatprep.mubr.msk.f32.mxu0 %vm152_vm3, %v4963_v60  ;;  %8150 = vmatpush3.bf16.msra.mxu0 %v8147_v8 }
0x1f98   :  { %8152 = vmatprep.subr.bf16.mxu0 %v8151_v58 }
0x1f9a   :  { %7627 = vmatmul.mubr.msk.f32.gmra.mrb[84].mxu0 %vm152_vm3, %v4964_v21 }
0x1f9b   :  { %8154 = vmatpush3.bf16.msra.mxu0 %v8151_v58 }
0x1fb6   :  { %v4943_v56 = vpop.xlane.xlu1 %4942 }
0x1fb7   :  { %8841 = vrcp.f32 %v4943_v56 }
0x1fba   :  { %v4949_v39 = vpop.xlane.xlu1 %4948 }
0x1fbb   :  { %8843 = vrcp.f32 %v4949_v39 }
0x1fbe   :  { %v4952_v19 = vpop.xlane.xlu1 %4951 }
0x1fbf   :  { %8845 = vrcp.f32 %v4952_v19 }
0x1fc1   :  { %v8842_v1 = vpop.eup %8841 }
0x1fc2   :  { %v4965_v30 = vmul.f32 %v8842_v1, %v8826_v18 }
0x1fc4   :  { %7629 = vmatprep.mubr.msk.f32.mxu0 %vm152_vm3, %v4965_v30 }
0x1fc5   :  { %v8844_v31 = vpop.eup %8843  ;;  %7630 = vmatmul.mubr.msk.f32.gmra.mrb[86].mxu0 %vm152_vm3, %v4966_v25 }
0x1fc6   :  { %v4967_v47 = vmul.f32 %v8844_v31, %v8828_v43 }
0x1fc8   :  { %7632 = vmatprep.mubr.msk.f32.mxu0 %vm152_vm3, %v4967_v47 }
0x1fc9   :  { %v8846_v59 = vpop.eup %8845 }
0x1fca   :  { %v4968_v13 = vmul.f32 %v8846_v59, %v8830_v49 }
0x1fcc   :  { %7633 = vmatmul.mubr.msk.f32.gmra.mrb[88].mxu0 %vm152_vm3, %v4968_v13 }
0x2069   :  { %v7625_v42 = vpop.f32.mrb[82].mxu0 }
0x206a   :  { %5196 = vrot.lane.b32.xlu1 %v7625_v42, %s8923_s20  ;;  %v5083_v18 = vpop.f32.mrb[83].mxu0 }
0x206b   :  { %5194 = vrot.lane.b32.xlu0 %v5083_v18, %s8923_s20 }
0x206d   :  { %v7628_v37 = vpop.f32.mrb[84].mxu0 }
0x206e   :  { %5200 = vrot.lane.b32.xlu1 %v7628_v37, %s8923_s20  ;;  %v5093_v43 = vpop.f32.mrb[85].mxu0 }
0x206f   :  { %5198 = vrot.lane.b32.xlu0 %v5093_v43, %s8923_s20 }
0x2072   :  { %5140 = vrot.lane.b32.xlu1 %v10343_v3, %s8907_s26 }
0x2073   :  { %5138 = vrot.lane.b32.xlu0 %v10345_v55, %s8907_s26 }
0x2076   :  { %5172 = vrot.lane.b32.xlu1 %v10483_v20, %s8922_s19 }
0x2077   :  { %5170 = vrot.lane.b32.xlu0 %v10485_v26, %s8922_s19 }
0x207a   :  { %5144 = vrot.lane.b32.xlu1 %v10347_v29, %s8907_s26  ;;  %v5131_v29 = vpop.permute.xlu1 %5130 }
0x207b   :  { %5142 = vrot.lane.b32.xlu0 %v10349_v7, %s8907_s26  ;;  %v5133_v7 = vpop.permute.xlu0 %5132 }
0x207e   :  { %v5165_v20 = vpop.permute.xlu1 %5164 }
0x207f   :  { %v5163_v26 = vpop.permute.xlu0 %5162 }
0x2082   :  { %v5137_v9 = vpop.permute.xlu1 %5136 }
0x2083   :  { %v5135_v36 = vpop.permute.xlu0 %5134 }
0x2084   :  { %v5220_v63 = vsel %vm70_vm0, %v10201_v15, %v5135_v36 }
0x2086   :  { %v5169_v24 = vpop.permute.xlu1 %5168 }
0x2087   :  { %v5167_v17 = vpop.permute.xlu0 %5166 }
0x2088   :  { %v5228_v28 = vsel %vm236_vm6, %v5220_v63, %v5167_v17 }
0x2098   :  { %v7631_v38 = vpop.f32.mrb[86].mxu0 }
0x2099   :  { %5204 = vrot.lane.b32.xlu1 %v7631_v38, %s8923_s20  ;;  %v5103_v49 = vpop.f32.mrb[87].mxu0 }
0x209a   :  { %5202 = vrot.lane.b32.xlu0 %v5103_v49, %s8923_s20 }
0x209d   :  { %5176 = vrot.lane.b32.xlu1 %v10487_v16, %s8922_s19  ;;  %v5218_v16 = vsel %vm70_vm0, %v10197_v6, %v5131_v29 }
0x209e   :  { %5174 = vrot.lane.b32.xlu0 %v10489_v53, %s8922_s19  ;;  %v5219_v53 = vsel %vm70_vm0, %v10195_v27, %v5133_v7  ;;  %v5226_v11 = vsel %vm236_vm6, %v5218_v16, %v5163_v26  ;;  %v5221_v27 = vsel %vm70_vm0, %v10199_v2, %v5137_v9  ;;  %v10959_v7 = vld [vmem:[#allocation13_spill] sm:$0xff]  ;;  %v10960_v26 = vld [vmem:[#allocation11_spill] sm:$0xff] }
0x209f   :  { %v7634_v3 = vpop.f32.mrb[88].mxu0  ;;  %v5227_v54 = vsel %vm236_vm6, %v5219_v53, %v5165_v20  ;;  %v5229_v0 = vsel %vm236_vm6, %v5221_v27, %v5169_v24  ;;  %v10963_v27 = vld [vmem:[#allocation14_spill] sm:$0xff] }
0x20a0   :  { %v5113_v55 = vpop.f32.mrb[89].mxu0 }
0x20a1   :  { %5208 = vrot.lane.b32.xlu1 %v7634_v3, %s8923_s20 }
0x20a2   :  { %5206 = vrot.lane.b32.xlu0 %v5113_v55, %s8923_s20 }
0x20dc   :  { %v5197_v51 = vpop.permute.xlu1 %5196 }
0x20dd   :  { %v5195_v50 = vpop.permute.xlu0 %5194  ;;  %v5235_v61 = vsel %vm2568_vm2, %v5227_v54, %v5197_v51  ;;  %v10961_v51 = vld [vmem:[#allocation12_spill] sm:$0xff] }
0x20de   :  { %v5234_v10 = vsel %vm2568_vm2, %v5226_v11, %v5195_v50  ;;  %v10962_v11 = vld [vmem:[#allocation15_spill] sm:$0xff] }
0x20df   :  { %7643 = vmatprep.mubr.msk.f32.mxu0 %vm630_vm7, %v5234_v10 }
0x20e0   :  { %7644 = vmatmul.mubr.msk.f32.vlgmr.msra.gmra.mrb[90].mxu0 %vm630_vm7, %v5235_v61  ;;  %v5201_v6 = vpop.permute.xlu1 %5200 }
0x20e1   :  { %v5199_v48 = vpop.permute.xlu0 %5198  ;;  %v5237_v12 = vsel %vm2568_vm2, %v5229_v0, %v5201_v6  ;;  %v10964_v0 = vld [vmem:[#allocation17_spill] sm:$0xff] }
0x20e2   :  { %v5236_v52 = vsel %vm2568_vm2, %v5228_v28, %v5199_v48 }
0x20e3   :  { %7646 = vmatprep.mubr.msk.f32.mxu0 %vm630_vm7, %v5236_v52 }
0x20e4   :  { %7647 = vmatmul.mubr.msk.f32.gmra.mrb[92].mxu0 %vm630_vm7, %v5237_v12  ;;  %v5141_v15 = vpop.permute.xlu1 %5140 }
0x20e5   :  { %v5139_v40 = vpop.permute.xlu0 %5138  ;;  %v5223_v56 = vsel %vm70_vm0, %v10203_v35, %v5141_v15 }
0x20e6   :  { %v5222_v2 = vsel %vm70_vm0, %v10205_v34, %v5139_v40 }
0x20e8   :  { %v5173_v33 = vpop.permute.xlu1 %5172 }
0x20e9   :  { %v5171_v5 = vpop.permute.xlu0 %5170  ;;  %v5231_v14 = vsel %vm236_vm6, %v5223_v56, %v5173_v33 }
0x20ea   :  { %v5230_v39 = vsel %vm236_vm6, %v5222_v2, %v5171_v5 }
0x20ec   :  { %v5145_v44 = vpop.permute.xlu1 %5144 }
0x20ed   :  { %v5143_v60 = vpop.permute.xlu0 %5142  ;;  %v5225_v35 = vsel %vm70_vm0, %v10207_v23, %v5145_v44 }
0x20ee   :  { %v5224_v34 = vsel %vm70_vm0, %v10209_v32, %v5143_v60  ;;  %v10646_v32 = vld [vmem:[%s10899_s3 + $0x8] sm:$0xff] }
0x20ef   :  { %v5378_v23 = vrot.slane %v10646_v32, %v9766_v45 }
0x210b   :  { %v5205_v21 = vpop.permute.xlu1 %5204 }
0x210c   :  { %v5203_v19 = vpop.permute.xlu0 %5202  ;;  %v5239_v30 = vsel %vm2568_vm2, %v5231_v14, %v5205_v21 }
0x210d   :  { %v5238_v1 = vsel %vm2568_vm2, %v5230_v39, %v5203_v19 }
0x210e   :  { %7649 = vmatprep.mubr.msk.f32.mxu0 %vm630_vm7, %v5238_v1 }
0x210f   :  { %v5177_v25 = vpop.permute.xlu1 %5176  ;;  %7650 = vmatmul.mubr.msk.f32.gmra.mrb[94].mxu0 %vm630_vm7, %v5239_v30 }
0x2110   :  { %v5175_v31 = vpop.permute.xlu0 %5174  ;;  %v5233_v62 = vsel %vm236_vm6, %v5225_v35, %v5177_v25 }
0x2111   :  { %v5232_v59 = vsel %vm236_vm6, %v5224_v34, %v5175_v31 }
0x2113   :  { %v5209_v47 = vpop.permute.xlu1 %5208 }
0x2114   :  { %v5207_v13 = vpop.permute.xlu0 %5206  ;;  %v5241_v22 = vsel %vm2568_vm2, %v5233_v62, %v5209_v47  ;;  %v5523_v62 = vld [vmem:[#allocation2 + $0x130] sm:$0xff] }
0x2115   :  { %v5240_v4 = vsel %vm2568_vm2, %v5232_v59, %v5207_v13 }
0x2116   :  { %7652 = vmatprep.mubr.msk.f32.mxu0 %vm630_vm7, %v5240_v4  ;;  %v5524_v4 = vld [vmem:[#allocation2 + $0x138] sm:$0xff] }
0x2117   :  { %7653 = vmatmul.mubr.msk.f32.gmra.mrb[96].mxu0 %vm630_vm7, %v5241_v22  ;;  %v8155_v22 = vpack.c.bf16 %v5524_v4, %v5523_v62 }
0x2119   :  { %8156 = vmatprep.subr.bf16.mxu1 %v8155_v22 }
0x211a   :  { %8158 = vmatpush3.bf16.msra.mxu1 %v8155_v22 }
0x21b3   :  { %v7645_v8 = vpop.f32.mrb[90].mxu0 }
0x21b4   :  { %v5380_v41 = vadd.f32 %v7645_v8, %v5378_v23  ;;  %v5336_v58 = vpop.f32.mrb[91].mxu0  ;;  %v5526_v8 = vld [vmem:[#allocation2 + $0x148] sm:$0xff] }
0x21b5   :  { %v5379_v42 = vadd.f32 %v5378_v23, %v5336_v58 }
0x21b6   :  { %v5388_v18 = vadd.f32 %v5380_v41, %v9959_v46 }
0x21b7   :  { %v5387_v37 = vadd.f32 %v5379_v42, %v9961_v57  ;;  %v7648_v43 = vpop.f32.mrb[92].mxu0 }
0x21b8   :  { %v5346_v38 = vpop.f32.mrb[93].mxu0  ;;  %v5398_v49 = vsel %vm630_vm7, %v5388_v18, 0.0  ;;  %v5382_v3 = vadd.f32 %v7648_v43, %v5378_v23 }
0x21b9   :  { %v5381_v55 = vadd.f32 %v5378_v23, %v5346_v38  ;;  %5399 = vadd.xlane.f32.xlu1 %v5398_v49  ;;  %v5395_v29 = vsel %vm630_vm7, %v5387_v37, 0.0 }
0x21ba   :  { %5396 = vadd.xlane.f32.xlu0 %v5395_v29  ;;  %v5390_v9 = vadd.f32 %v5382_v3, %v10960_v26 }
0x21bb   :  { %v5389_v20 = vadd.f32 %v5381_v55, %v10959_v7 }
0x21bc   :  { %v5404_v46 = vsel %vm630_vm7, %v5390_v9, 0.0 }
0x21bd   :  { %v5401_v36 = vsel %vm630_vm7, %v5389_v20, 0.0 }
0x21be   :  { %5402 = vadd.xlane.f32.xlu0 %v5401_v36 }
0x21c2   :  { %5405 = vadd.xlane.f32.xlu0 %v5404_v46 }
0x21e2   :  { %v7651_v57 = vpop.f32.mrb[94].mxu0 }
0x21e3   :  { %v5384_v24 = vadd.f32 %v7651_v57, %v5378_v23  ;;  %v5356_v17 = vpop.f32.mrb[95].mxu0 }
0x21e4   :  { %v5383_v16 = vadd.f32 %v5378_v23, %v5356_v17 }
0x21e5   :  { %v5392_v53 = vadd.f32 %v5384_v24, %v10961_v51  ;;  %v5668_v51 = vld [vmem:[#allocation2 + $0x150] sm:$0xff] }
0x21e6   :  { %v5391_v50 = vadd.f32 %v5383_v16, %v10962_v11  ;;  %v5670_v11 = vld [vmem:[#allocation2 + $0x160] sm:$0xff] }
0x21e7   :  { %v5410_v54 = vsel %vm630_vm7, %v5392_v53, 0.0 }
0x21e8   :  { %5411 = vadd.xlane.f32.xlu0 %v5410_v54  ;;  %v5407_v10 = vsel %vm630_vm7, %v5391_v50, 0.0  ;;  %v5671_v54 = vld [vmem:[#allocation2 + $0x168] sm:$0xff] }
0x21e9   :  { %5408 = vadd.xlane.f32.xlu1 %v5407_v10  ;;  %v8167_v10 = vpack.c.bf16 %v5671_v54, %v5670_v11 }
0x21ea   :  { %v7654_v61 = vpop.f32.mrb[96].mxu0 }
0x21eb   :  { %v5386_v63 = vadd.f32 %v7654_v61, %v5378_v23  ;;  %v5366_v6 = vpop.f32.mrb[97].mxu0  ;;  %v5672_v61 = vld [vmem:[#allocation2 + $0x170] sm:$0xff] }
0x21ec   :  { %v5385_v28 = vadd.f32 %v5378_v23, %v5366_v6  ;;  %v5525_v23 = vld [vmem:[#allocation2 + $0x140] sm:$0xff] }
0x21ed   :  { %v5394_v48 = vadd.f32 %v5386_v63, %v10963_v27  ;;  %v8159_v41 = vpack.c.bf16 %v5526_v8, %v5525_v23  ;;  %v5673_v63 = vld [vmem:[#allocation2 + $0x178] sm:$0xff] }
0x21ee   :  { %v5393_v52 = vadd.f32 %v5385_v28, %v10964_v0  ;;  %v8171_v6 = vpack.c.bf16 %v5673_v63, %v5672_v61 }
0x21ef   :  { %v5416_v12 = vsel %vm630_vm7, %v5394_v48, 0.0  ;;  %8160 = vmatprep.subr.bf16.mxu1 %v8159_v41 }
0x21f0   :  { %5417 = vadd.xlane.f32.xlu0 %v5416_v12  ;;  %v5413_v15 = vsel %vm630_vm7, %v5393_v52, 0.0  ;;  %8162 = vmatpush3.bf16.msra.mxu1 %v8159_v41 }
0x21f1   :  { %5414 = vadd.xlane.f32.xlu1 %v5413_v15 }
0x2246   :  { %v5400_v40 = vpop.xlane.xlu1 %5399 }
0x2247   :  { %v5420_v33 = vmul.f32 0.03125, %v5400_v40  ;;  %v5397_v5 = vpop.xlane.xlu0 %5396 }
0x2248   :  { %v5419_v44 = vmul.f32 0.03125, %v5397_v5 }
0x2249   :  { %v10666_v60 = vsub.f32 %v5388_v18, %v5420_v33 }
0x224a   :  { %v10668_v2 = vsub.f32 %v5387_v37, %v5419_v44 }
0x224b   :  { %v5403_v21 = vpop.xlane.xlu0 %5402  ;;  %v5436_v56 = vmul.f32 %v10666_v60, %v10666_v60 }
0x224c   :  { %v5421_v39 = vmul.f32 0.03125, %v5403_v21  ;;  %v5435_v19 = vmul.f32 %v10668_v2, %v10668_v2  ;;  %v10709_v21 = vld [vmem:[%s10899_s3 + $0x10] sm:$0xff] }
0x224d   :  { %v5446_v14 = vsel %vm630_vm7, %v5436_v56, 0.0 }
0x224e   :  { %v10675_v1 = vsub.f32 %v5389_v20, %v5421_v39  ;;  %5447 = vadd.xlane.f32.xlu0 %v5446_v14  ;;  %v5443_v30 = vsel %vm630_vm7, %v5435_v19, 0.0  ;;  %v10965_v39 = vld [vmem:[#allocation6_spill] sm:$0xff] }
0x224f   :  { %v5406_v25 = vpop.xlane.xlu0 %5405  ;;  %5444 = vadd.xlane.f32.xlu1 %v5443_v30  ;;  %v5502_v19 = vrot.slane %v10709_v21, %v10965_v39 }
0x2250   :  { %v5422_v31 = vmul.f32 0.03125, %v5406_v25  ;;  %v5437_v34 = vmul.f32 %v10675_v1, %v10675_v1  ;;  %v10966_v25 = vld [vmem:[#allocation7_spill] sm:$0xff] }
0x2252   :  { %v10680_v47 = vsub.f32 %v5390_v9, %v5422_v31  ;;  %v5449_v35 = vsel %vm630_vm7, %v5437_v34, 0.0  ;;  %v5514_v31 = vrot.slane %v10709_v21, %v10966_v25 }
0x2253   :  { %5450 = vadd.xlane.f32.xlu1 %v5449_v35 }
0x2254   :  { %v5438_v59 = vmul.f32 %v10680_v47, %v10680_v47 }
0x2256   :  { %v5452_v13 = vsel %vm630_vm7, %v5438_v59, 0.0 }
0x2257   :  { %5453 = vadd.xlane.f32.xlu0 %v5452_v13 }
0x2275   :  { %v5412_v58 = vpop.xlane.xlu0 %5411 }
0x2276   :  { %v5424_v42 = vmul.f32 0.03125, %v5412_v58  ;;  %v5409_v18 = vpop.xlane.xlu1 %5408 }
0x2277   :  { %v5423_v37 = vmul.f32 0.03125, %v5409_v18 }
0x2278   :  { %v10686_v43 = vsub.f32 %v5392_v53, %v5424_v42  ;;  %v5669_v53 = vld [vmem:[#allocation2 + $0x158] sm:$0xff] }
0x2279   :  { %v10688_v38 = vsub.f32 %v5391_v50, %v5423_v37  ;;  %v8163_v50 = vpack.c.bf16 %v5669_v53, %v5668_v51 }
0x227a   :  { %v5440_v49 = vmul.f32 %v10686_v43, %v10686_v43 }
0x227b   :  { %v5439_v3 = vmul.f32 %v10688_v38, %v10688_v38  ;;  %8164 = vmatprep.subr.bf16.mxu0 %v8163_v50 }
0x227c   :  { %v5458_v55 = vsel %vm630_vm7, %v5440_v49, 0.0  ;;  %8166 = vmatpush3.bf16.msra.mxu0 %v8163_v50 }
0x227d   :  { %5459 = vadd.xlane.f32.xlu0 %v5458_v55  ;;  %v5418_v29 = vpop.xlane.xlu0 %5417  ;;  %v5455_v7 = vsel %vm630_vm7, %v5439_v3, 0.0  ;;  %8168 = vmatprep.subr.bf16.mxu0 %v8167_v10 }
0x227e   :  { %v5426_v20 = vmul.f32 0.03125, %v5418_v29  ;;  %5456 = vadd.xlane.f32.xlu1 %v5455_v7  ;;  %v5415_v26 = vpop.xlane.xlu1 %5414 }
0x227f   :  { %v5425_v9 = vmul.f32 0.03125, %v5415_v26 }
0x2280   :  { %v10696_v36 = vsub.f32 %v5394_v48, %v5426_v20  ;;  %8170 = vmatpush3.bf16.msra.mxu0 %v8167_v10 }
0x2281   :  { %v10698_v46 = vsub.f32 %v5393_v52, %v5425_v9  ;;  %8172 = vmatprep.subr.bf16.mxu0 %v8171_v6 }
0x2282   :  { %v5442_v57 = vmul.f32 %v10696_v36, %v10696_v36 }
0x2283   :  { %v5441_v24 = vmul.f32 %v10698_v46, %v10698_v46 }
0x2284   :  { %v5464_v17 = vsel %vm630_vm7, %v5442_v57, 0.0  ;;  %8174 = vmatpush3.bf16.msra.mxu0 %v8171_v6 }
0x2285   :  { %5465 = vadd.xlane.f32.xlu0 %v5464_v17  ;;  %v5461_v16 = vsel %vm630_vm7, %v5441_v24, 0.0 }
0x2286   :  { %5462 = vadd.xlane.f32.xlu1 %v5461_v16 }
0x22db   :  { %v5448_v28 = vpop.xlane.xlu0 %5447 }
0x22dc   :  { %v5468_v27 = vmul.f32 0.03125, %v5448_v28  ;;  %v5445_v48 = vpop.xlane.xlu1 %5444 }
0x22dd   :  { %v5467_v0 = vmul.f32 0.03125, %v5445_v48  ;;  %v5675_v48 = vld [vmem:[#allocation2 + $0x188] sm:$0xff] }
0x22de   :  { %v5476_v52 = vadd.f32 1e-05, %v5468_v27  ;;  %v5674_v27 = vld [vmem:[#allocation2 + $0x180] sm:$0xff] }
0x22df   :  { %v5475_v12 = vadd.f32 1e-05, %v5467_v0  ;;  %v8175_v0 = vpack.c.bf16 %v5675_v48, %v5674_v27 }
0x22e0   :  { %8847 = vrsqrt.f32 %v5476_v52  ;;  %v5451_v15 = vpop.xlane.xlu1 %5450 }
0x22e1   :  { %8849 = vrsqrt.f32 %v5475_v12  ;;  %v5469_v40 = vmul.f32 0.03125, %v5451_v15  ;;  %8176 = vmatprep.subr.bf16.mxu0 %v8175_v0 }
0x22e2   :  { %8178 = vmatpush3.bf16.msra.mxu0 %v8175_v0 }
0x22e3   :  { %v5477_v33 = vadd.f32 1e-05, %v5469_v40 }
0x22e4   :  { %v5454_v5 = vpop.xlane.xlu0 %5453 }
0x22e5   :  { %8851 = vrsqrt.f32 %v5477_v33  ;;  %v5470_v44 = vmul.f32 0.03125, %v5454_v5 }
0x22e7   :  { %v5478_v56 = vadd.f32 1e-05, %v5470_v44 }
0x22e9   :  { %8853 = vrsqrt.f32 %v5478_v56 }
0x22ea   :  { %v8848_v14 = vpop.eup %8847 }
0x22eb   :  { %v8850_v30 = vpop.eup %8849  ;;  %v5492_v34 = vmul.f32 %v8848_v14, %v10666_v60 }
0x22ec   :  { %v5491_v35 = vmul.f32 %v8850_v30, %v10668_v2 }
0x22ed   :  { %v5504_v59 = vmul.f32 %v5502_v19, %v5492_v34 }
0x22ee   :  { %v5503_v13 = vmul.f32 %v5502_v19, %v5491_v35 }
0x22ef   :  { %v8852_v62 = vpop.eup %8851  ;;  %v10717_v4 = vadd.f32 %v5514_v31, %v5504_v59 }
0x22f0   :  { %v10719_v22 = vadd.f32 %v5514_v31, %v5503_v13  ;;  %v5493_v23 = vmul.f32 %v8852_v62, %v10675_v1 }
0x22f2   :  { %7663 = vmatprep.mubr.msk.f32.mxu1 %vm630_vm7, %v10719_v22  ;;  %v5505_v8 = vmul.f32 %v5502_v19, %v5493_v23 }
0x22f3   :  { %v8854_v41 = vpop.eup %8853  ;;  %7664 = vmatmul.mubr.msk.f32.vlgmr.msra.gmra.mrb[88].mxu1 %vm630_vm7, %v10717_v4 }
0x22f4   :  { %v10726_v60 = vadd.f32 %v5514_v31, %v5505_v8  ;;  %v5494_v2 = vmul.f32 %v8854_v41, %v10680_v47 }
0x22f6   :  { %7666 = vmatprep.mubr.msk.f32.mxu1 %vm630_vm7, %v10726_v60  ;;  %v5506_v58 = vmul.f32 %v5502_v19, %v5494_v2 }
0x22f8   :  { %v10731_v42 = vadd.f32 %v5514_v31, %v5506_v58 }
0x22fa   :  { %7667 = vmatmul.mubr.msk.f32.gmra.mrb[90].mxu1 %vm630_vm7, %v10731_v42 }
0x230a   :  { %v5460_v1 = vpop.xlane.xlu0 %5459 }
0x230b   :  { %v5472_v18 = vmul.f32 0.03125, %v5460_v1  ;;  %v5457_v37 = vpop.xlane.xlu1 %5456 }
0x230c   :  { %v5471_v49 = vmul.f32 0.03125, %v5457_v37  ;;  %v10968_v37 = vld [vmem:[#allocation5_spill] sm:$0xff] }
0x230d   :  { %v5480_v3 = vadd.f32 1e-05, %v5472_v18 }
0x230e   :  { %v5479_v55 = vadd.f32 1e-05, %v5471_v49  ;;  %v10969_v49 = vsub.s32 7, %v10968_v37  ;;  %v5983_v37 = vld [vmem:[#allocation2 + $0x1c0] sm:$0xff] }
0x230f   :  { %8855 = vrsqrt.f32 %v5480_v3 }
0x2310   :  { %8857 = vrsqrt.f32 %v5479_v55  ;;  %v5808_v3 = vrot.slane %v10646_v32, %v10969_v49  ;;  %v5984_v49 = vld [vmem:[#allocation2 + $0x1c8] sm:$0xff] }
0x2312   :  { %v5466_v29 = vpop.xlane.xlu0 %5465 }
0x2313   :  { %v5474_v7 = vmul.f32 0.03125, %v5466_v29  ;;  %v5463_v47 = vpop.xlane.xlu1 %5462 }
0x2314   :  { %v5473_v20 = vmul.f32 0.03125, %v5463_v47 }
0x2315   :  { %v5482_v26 = vadd.f32 1e-05, %v5474_v7 }
0x2316   :  { %v5481_v9 = vadd.f32 1e-05, %v5473_v20 }
0x2317   :  { %8859 = vrsqrt.f32 %v5482_v26 }
0x2318   :  { %8861 = vrsqrt.f32 %v5481_v9 }
0x2319   :  { %v8856_v57 = vpop.eup %8855 }
0x231a   :  { %v8858_v24 = vpop.eup %8857  ;;  %v5496_v17 = vmul.f32 %v8856_v57, %v10686_v43 }
0x231b   :  { %v5495_v16 = vmul.f32 %v8858_v24, %v10688_v38 }
0x231c   :  { %v5508_v51 = vmul.f32 %v5502_v19, %v5496_v17 }
0x231d   :  { %v5507_v53 = vmul.f32 %v5502_v19, %v5495_v16 }
0x231e   :  { %v10737_v11 = vadd.f32 %v5514_v31, %v5508_v51 }
0x231f   :  { %v10739_v50 = vadd.f32 %v5514_v31, %v5507_v53 }
0x2321   :  { %v8860_v54 = vpop.eup %8859  ;;  %7669 = vmatprep.mubr.msk.f32.mxu1 %vm630_vm7, %v10739_v50 }
0x2322   :  { %v8862_v10 = vpop.eup %8861  ;;  %7670 = vmatmul.mubr.msk.f32.gmra.mrb[92].mxu1 %vm630_vm7, %v10737_v11  ;;  %v5498_v61 = vmul.f32 %v8860_v54, %v10696_v36  ;;  %v10967_v36 = vld [vmem:[#allocation9_spill] sm:$0xff] }
0x2323   :  { %v5497_v43 = vmul.f32 %v8862_v10, %v10698_v46  ;;  %v5530_v46 = vrot.slane %v10646_v32, %v10967_v36 }
0x2324   :  { %v5510_v63 = vmul.f32 %v5502_v19, %v5498_v61 }
0x2325   :  { %v5509_v38 = vmul.f32 %v5502_v19, %v5497_v43 }
0x2326   :  { %v10747_v6 = vadd.f32 %v5514_v31, %v5510_v63 }
0x2327   :  { %v10749_v28 = vadd.f32 %v5514_v31, %v5509_v38 }
0x2329   :  { %7672 = vmatprep.mubr.msk.f32.mxu1 %vm630_vm7, %v10749_v28 }
0x232a   :  { %7673 = vmatmul.mubr.msk.f32.gmra.mrb[94].mxu1 %vm630_vm7, %v10747_v6 }
0x23c6   :  { %v7665_v52 = vpop.f32.mrb[88].mxu1 }
0x23c7   :  { %v5627_v12 = vadd.f32 %v7665_v52, %v5530_v46  ;;  %v5621_v15 = vpop.f32.mrb[89].mxu1 }
0x23c8   :  { %v5622_v40 = vadd.f32 %v5621_v15, %v5530_v46 }
0x23c9   :  { %v5661_v5 = vmax.f32 %v5627_v12, 0.0 }
0x23ca   :  { %v5660_v33 = vmax.f32 %v5622_v40, 0.0 }
0x23cc   :  { %7691 = vmatprep.mubr.msk.f32.mxu0 %vm152_vm3, %v5660_v33 }
0x23cd   :  { %v7668_v44 = vpop.f32.mrb[90].mxu1  ;;  %7692 = vmatmul.mubr.msk.f32.vlgmr.msra.gmra.mrb[98].mxu0 %vm152_vm3, %v5661_v5 }
0x23ce   :  { %v5637_v56 = vadd.f32 %v7668_v44, %v5530_v46  ;;  %v5631_v39 = vpop.f32.mrb[91].mxu1 }
0x23cf   :  { %v5632_v19 = vadd.f32 %v5631_v39, %v5530_v46 }
0x23d0   :  { %v5663_v30 = vmax.f32 %v5637_v56, 0.0 }
0x23d1   :  { %v5662_v14 = vmax.f32 %v5632_v19, 0.0 }
0x23d3   :  { %7694 = vmatprep.mubr.msk.f32.mxu0 %vm152_vm3, %v5662_v14 }
0x23d4   :  { %7695 = vmatmul.mubr.msk.f32.gmra.mrb[100].mxu0 %vm152_vm3, %v5663_v30 }
0x23f5   :  { %v7671_v25 = vpop.f32.mrb[92].mxu1 }
0x23f6   :  { %v5647_v31 = vadd.f32 %v7671_v25, %v5530_v46  ;;  %v5641_v34 = vpop.f32.mrb[93].mxu1 }
0x23f7   :  { %v5642_v35 = vadd.f32 %v5641_v34, %v5530_v46 }
0x23f8   :  { %v5665_v13 = vmax.f32 %v5647_v31, 0.0 }
0x23f9   :  { %v5664_v59 = vmax.f32 %v5642_v35, 0.0 }
0x23fb   :  { %7697 = vmatprep.mubr.msk.f32.mxu0 %vm152_vm3, %v5664_v59 }
0x23fc   :  { %7698 = vmatmul.mubr.msk.f32.gmra.mrb[102].mxu0 %vm152_vm3, %v5665_v13 }
0x23fd   :  { %v7674_v62 = vpop.f32.mrb[94].mxu1 }
0x23fe   :  { %v5657_v23 = vadd.f32 %v7674_v62, %v5530_v46  ;;  %v5651_v8 = vpop.f32.mrb[95].mxu1 }
0x23ff   :  { %v5652_v41 = vadd.f32 %v5651_v8, %v5530_v46  ;;  %v5982_v8 = vld [vmem:[#allocation2 + $0x1b8] sm:$0xff] }
0x2400   :  { %v5667_v58 = vmax.f32 %v5657_v23, 0.0  ;;  %v5981_v23 = vld [vmem:[#allocation2 + $0x1b0] sm:$0xff] }
0x2401   :  { %v5666_v2 = vmax.f32 %v5652_v41, 0.0 }
0x2403   :  { %7700 = vmatprep.mubr.msk.f32.mxu0 %vm152_vm3, %v5666_v2 }
0x2404   :  { %7701 = vmatmul.mubr.msk.f32.gmra.mrb[104].mxu0 %vm152_vm3, %v5667_v58  ;;  %v8179_v58 = vpack.c.bf16 %v5982_v8, %v5981_v23 }
0x2406   :  { %8180 = vmatprep.subr.bf16.mxu1 %v8179_v58 }
0x2407   :  { %8182 = vmatpush3.bf16.msra.mxu1 %v8179_v58  ;;  %v5979_v58 = vld [vmem:[#allocation2 + $0x1a0] sm:$0xff] }
0x24a0   :  { %v7693_v1 = vpop.f32.mrb[98].mxu0 }
0x24a1   :  { %v5766_v18 = vpop.f32.mrb[99].mxu0  ;;  %v5810_v29 = vadd.f32 %v7693_v1, %v5808_v3 }
0x24a2   :  { %v5809_v20 = vadd.f32 %v5808_v3, %v5766_v18 }
0x24a3   :  { %v5818_v24 = vadd.f32 %v5810_v29, %v10717_v4 }
0x24a4   :  { %v5817_v16 = vadd.f32 %v5809_v20, %v10719_v22 }
0x24a5   :  { %v5828_v32 = vsel %vm630_vm7, %v5818_v24, 0.0 }
0x24a6   :  { %v5825_v53 = vsel %vm630_vm7, %v5817_v16, 0.0 }
0x24a7   :  { %v7696_v55 = vpop.f32.mrb[100].mxu0 }
0x24a8   :  { %v5812_v7 = vadd.f32 %v7696_v55, %v5808_v3  ;;  %v5776_v47 = vpop.f32.mrb[101].mxu0  ;;  %v8183_v55 = vpack.c.bf16 %v5984_v49, %v5983_v37 }
0x24a9   :  { %v5811_v26 = vadd.f32 %v5808_v3, %v5776_v47 }
0x24aa   :  { %v5820_v9 = vadd.f32 %v5812_v7, %v10731_v42  ;;  %8184 = vmatprep.subr.bf16.mxu1 %v8183_v55 }
0x24ab   :  { %v5819_v57 = vadd.f32 %v5811_v26, %v10726_v60  ;;  %8186 = vmatpush3.bf16.msra.mxu1 %v8183_v55 }
0x24ac   :  { %v5834_v17 = vsel %vm630_vm7, %v5820_v9, 0.0 }
0x24ad   :  { %5835 = vadd.xlane.f32.xlu0 %v5834_v17  ;;  %v5831_v51 = vsel %vm630_vm7, %v5819_v57, 0.0 }
0x24ae   :  { %5832 = vadd.xlane.f32.xlu1 %v5831_v51 }
0x24b1   :  { %5829 = vadd.xlane.f32.xlu0 %v5828_v32 }
0x24b2   :  { %5826 = vadd.xlane.f32.xlu1 %v5825_v53 }
0x24cf   :  { %v7699_v54 = vpop.f32.mrb[102].mxu0 }
0x24d0   :  { %v5814_v42 = vadd.f32 %v7699_v54, %v5808_v3  ;;  %v5786_v10 = vpop.f32.mrb[103].mxu0 }
0x24d1   :  { %v5813_v60 = vadd.f32 %v5808_v3, %v5786_v10 }
0x24d2   :  { %v5822_v4 = vadd.f32 %v5814_v42, %v10737_v11 }
0x24d3   :  { %v5821_v61 = vadd.f32 %v5813_v60, %v10739_v50 }
0x24d4   :  { %v5840_v22 = vsel %vm630_vm7, %v5822_v4, 0.0 }
0x24d5   :  { %5841 = vadd.xlane.f32.xlu0 %v5840_v22  ;;  %v5837_v43 = vsel %vm630_vm7, %v5821_v61, 0.0 }
0x24d6   :  { %5838 = vadd.xlane.f32.xlu1 %v5837_v43 }
0x24d7   :  { %v7702_v63 = vpop.f32.mrb[104].mxu0 }
0x24d8   :  { %v5816_v38 = vadd.f32 %v7702_v63, %v5808_v3  ;;  %v5796_v27 = vpop.f32.mrb[105].mxu0 }
0x24d9   :  { %v5815_v48 = vadd.f32 %v5808_v3, %v5796_v27 }
0x24da   :  { %v5824_v0 = vadd.f32 %v5816_v38, %v10747_v6 }
0x24db   :  { %v5823_v46 = vadd.f32 %v5815_v48, %v10749_v28 }
0x24dc   :  { %v5846_v52 = vsel %vm630_vm7, %v5824_v0, 0.0 }
0x24dd   :  { %5847 = vadd.xlane.f32.xlu0 %v5846_v52  ;;  %v5843_v11 = vsel %vm630_vm7, %v5823_v46, 0.0 }
0x24de   :  { %5844 = vadd.xlane.f32.xlu1 %v5843_v11 }
0x253a   :  { %v5836_v50 = vpop.xlane.xlu0 %5835 }
0x253b   :  { %v5852_v12 = vmul.f32 0.03125, %v5836_v50  ;;  %v5833_v15 = vpop.xlane.xlu1 %5832  ;;  %v10970_v50 = vld [vmem:[#allocation8_spill] sm:$0xff] }
0x253c   :  { %v5851_v40 = vmul.f32 0.03125, %v5833_v15 }
0x253d   :  { %v10784_v33 = vsub.f32 %v5820_v9, %v5852_v12  ;;  %v5977_v9 = vld [vmem:[#allocation2 + $0x190] sm:$0xff]  ;;  %v10826_v12 = vrot.slane %v10709_v21, %v10970_v50 }
0x253e   :  { %v10786_v5 = vsub.f32 %v5819_v57, %v5851_v40  ;;  %v5830_v44 = vpop.xlane.xlu0 %5829  ;;  %v5978_v57 = vld [vmem:[#allocation2 + $0x198] sm:$0xff] }
0x253f   :  { %v5850_v56 = vmul.f32 0.03125, %v5830_v44  ;;  %v5827_v39 = vpop.xlane.xlu1 %5826  ;;  %v5868_v6 = vmul.f32 %v10784_v33, %v10784_v33  ;;  %v10971_v44 = vld [vmem:[#allocation10_spill] sm:$0xff] }
0x2540   :  { %v5849_v28 = vmul.f32 0.03125, %v5827_v39  ;;  %v5867_v19 = vmul.f32 %v10786_v5, %v10786_v5 }
0x2541   :  { %v10792_v14 = vsub.f32 %v5818_v24, %v5850_v56  ;;  %v5882_v30 = vsel %vm630_vm7, %v5868_v6, 0.0  ;;  %v10830_v56 = vrot.slane %v10709_v21, %v10971_v44 }
0x2542   :  { %v10795_v25 = vsub.f32 %v5817_v16, %v5849_v28  ;;  %5883 = vadd.xlane.f32.xlu0 %v5882_v30  ;;  %v5879_v31 = vsel %vm630_vm7, %v5867_v19, 0.0  ;;  %v8187_v16 = vpack.c.bf16 %v5978_v57, %v5977_v9  ;;  %v10972_v28 = vld [vmem:[#allocation16_spill] sm:$0xff]  ;;  %v6149_v9 = vld [vmem:[#allocation2 + $0x1e0] sm:$0xff] }
0x2543   :  { %5880 = vadd.xlane.f32.xlu1 %v5879_v31  ;;  %v5866_v34 = vmul.f32 %v10792_v14, %v10792_v14  ;;  %v10836_v19 = vrot.slane %v10709_v21, %v10972_v28  ;;  %v6150_v57 = vld [vmem:[#allocation2 + $0x1e8] sm:$0xff] }
0x2544   :  { %v5865_v35 = vmul.f32 %v10795_v25, %v10795_v25  ;;  %8188 = vmatprep.subr.bf16.mxu1 %v8187_v16 }
0x2545   :  { %v5876_v59 = vsel %vm630_vm7, %v5866_v34, 0.0 }
0x2546   :  { %5877 = vadd.xlane.f32.xlu0 %v5876_v59  ;;  %v5873_v13 = vsel %vm630_vm7, %v5865_v35, 0.0 }
0x2547   :  { %5874 = vadd.xlane.f32.xlu1 %v5873_v13 }
0x2562   :  { %v5842_v62 = vpop.xlane.xlu0 %5841 }
0x2563   :  { %v5854_v41 = vmul.f32 0.03125, %v5842_v62  ;;  %v5839_v2 = vpop.xlane.xlu1 %5838  ;;  %v10844_v62 = vrot.slane %v10709_v21, %v9766_v45 }
0x2564   :  { %v5853_v1 = vmul.f32 0.03125, %v5839_v2 }
0x2565   :  { %v10804_v18 = vsub.f32 %v5822_v4, %v5854_v41 }
0x2566   :  { %v10806_v3 = vsub.f32 %v5821_v61, %v5853_v1  ;;  %v5980_v1 = vld [vmem:[#allocation2 + $0x1a8] sm:$0xff] }
0x2567   :  { %v5870_v29 = vmul.f32 %v10804_v18, %v10804_v18  ;;  %v8191_v49 = vpack.c.bf16 %v5980_v1, %v5979_v58 }
0x2568   :  { %v5869_v7 = vmul.f32 %v10806_v3, %v10806_v3 }
0x2569   :  { %v5888_v47 = vsel %vm630_vm7, %v5870_v29, 0.0  ;;  %v6147_v29 = vld [vmem:[#allocation2 + $0x1d0] sm:$0xff] }
0x256a   :  { %5889 = vadd.xlane.f32.xlu0 %v5888_v47  ;;  %v5848_v20 = vpop.xlane.xlu0 %5847  ;;  %v5885_v26 = vsel %vm630_vm7, %v5869_v7, 0.0  ;;  %v6148_v7 = vld [vmem:[#allocation2 + $0x1d8] sm:$0xff] }
0x256b   :  { %v5856_v24 = vmul.f32 0.03125, %v5848_v20  ;;  %5886 = vadd.xlane.f32.xlu1 %v5885_v26  ;;  %v5845_v17 = vpop.xlane.xlu1 %5844  ;;  %v8195_v26 = vpack.c.bf16 %v6148_v7, %v6147_v29 }
0x256c   :  { %v5855_v51 = vmul.f32 0.03125, %v5845_v17  ;;  %v8199_v17 = vpack.c.bf16 %v6150_v57, %v6149_v9 }
0x256d   :  { %v10814_v32 = vsub.f32 %v5824_v0, %v5856_v24 }
0x256e   :  { %v10816_v53 = vsub.f32 %v5823_v46, %v5855_v51  ;;  %v6234_v51 = vld [vmem:[#allocation2 + $0x1f0] sm:$0xff] }
0x256f   :  { %v5872_v54 = vmul.f32 %v10814_v32, %v10814_v32 }
0x2570   :  { %v5871_v42 = vmul.f32 %v10816_v53, %v10816_v53 }
0x2571   :  { %v5894_v10 = vsel %vm630_vm7, %v5872_v54, 0.0  ;;  %v6235_v54 = vld [vmem:[#allocation2 + $0x1f8] sm:$0xff] }
0x2572   :  { %5895 = vadd.xlane.f32.xlu0 %v5894_v10  ;;  %v5891_v60 = vsel %vm630_vm7, %v5871_v42, 0.0 }
0x2573   :  { %5892 = vadd.xlane.f32.xlu1 %v5891_v60 }
0x25cf   :  { %v5884_v4 = vpop.xlane.xlu0 %5883 }
0x25d0   :  { %v5900_v61 = vmul.f32 0.03125, %v5884_v4  ;;  %v5881_v22 = vpop.xlane.xlu1 %5880 }
0x25d1   :  { %v5899_v43 = vmul.f32 0.03125, %v5881_v22 }
0x25d2   :  { %v5908_v63 = vadd.f32 1e-05, %v5900_v61 }
0x25d3   :  { %v5907_v38 = vadd.f32 1e-05, %v5899_v43  ;;  %v5878_v27 = vpop.xlane.xlu0 %5877 }
0x25d4   :  { %8863 = vrsqrt.f32 %v5908_v63  ;;  %v5898_v48 = vmul.f32 0.03125, %v5878_v27  ;;  %v5875_v0 = vpop.xlane.xlu1 %5874 }
0x25d5   :  { %8865 = vrsqrt.f32 %v5907_v38  ;;  %v5897_v46 = vmul.f32 0.03125, %v5875_v0 }
0x25d6   :  { %v5906_v52 = vadd.f32 1e-05, %v5898_v48 }
0x25d7   :  { %v5905_v11 = vadd.f32 1e-05, %v5897_v46 }
0x25d8   :  { %8867 = vrsqrt.f32 %v5906_v52 }
0x25d9   :  { %8869 = vrsqrt.f32 %v5905_v11 }
0x25de   :  { %v8864_v15 = vpop.eup %8863 }
0x25df   :  { %v8866_v40 = vpop.eup %8865  ;;  %v5924_v39 = vmul.f32 %v8864_v15, %v10784_v33 }
0x25e0   :  { %v5923_v6 = vmul.f32 %v8866_v40, %v10786_v5 }
0x25e1   :  { %v5936_v30 = vmul.f32 %v10826_v12, %v5924_v39 }
0x25e2   :  { %v8868_v31 = vpop.eup %8867  ;;  %v5935_v34 = vmul.f32 %v10826_v12, %v5923_v6 }
0x25e3   :  { %v8870_v35 = vpop.eup %8869  ;;  %v5948_v59 = vadd.f32 %v10830_v56, %v5936_v30  ;;  %v5922_v13 = vmul.f32 %v8868_v31, %v10792_v14  ;;  %v6236_v31 = vld [vmem:[#allocation2 + $0x200] sm:$0xff] }
0x25e4   :  { %v5921_v33 = vmul.f32 %v8870_v35, %v10795_v25  ;;  %v5947_v5 = vadd.f32 %v10830_v56, %v5935_v34  ;;  %v6237_v34 = vld [vmem:[#allocation2 + $0x208] sm:$0xff] }
0x25e5   :  { %v5960_v23 = vmul.f32 %v10836_v19, %v5948_v59  ;;  %v5934_v8 = vmul.f32 %v10826_v12, %v5922_v13 }
0x25e6   :  { %v5959_v41 = vmul.f32 %v10836_v19, %v5947_v5  ;;  %v5933_v2 = vmul.f32 %v10826_v12, %v5921_v33  ;;  %v8207_v5 = vpack.c.bf16 %v6237_v34, %v6236_v31 }
0x25e7   :  { %v5946_v14 = vadd.f32 %v10830_v56, %v5934_v8  ;;  %v5972_v25 = vadd.f32 %v10844_v62, %v5960_v23 }
0x25e8   :  { %v5971_v37 = vadd.f32 %v10844_v62, %v5959_v41  ;;  %v5945_v45 = vadd.f32 %v10830_v56, %v5933_v2 }
0x25e9   :  { %v5958_v20 = vmul.f32 %v10836_v19, %v5946_v14 }
0x25ea   :  { %7711 = vmatprep.mubr.msk.f32.mxu1 %vm630_vm7, %v5971_v37  ;;  %v5957_v55 = vmul.f32 %v10836_v19, %v5945_v45 }
0x25eb   :  { %7712 = vmatmul.mubr.msk.f32.vlgmr.msra.gmra.mrb[96].mxu1 %vm630_vm7, %v5972_v25  ;;  %v5970_v24 = vadd.f32 %v10844_v62, %v5958_v20 }
0x25ec   :  { %8190 = vmatpush3.bf16.msra.mxu1 %v8187_v16  ;;  %v5969_v47 = vadd.f32 %v10844_v62, %v5957_v55  ;;  %v8203_v16 = vpack.c.bf16 %v6235_v54, %v6234_v51 }
0x25ed   :  { %8192 = vmatprep.subr.bf16.mxu1 %v8191_v49 }
0x25ee   :  { %7722 = vmatprep.mubr.msk.f32.mxu1 %vm630_vm7, %v5969_v47 }
0x25f0   :  { %8194 = vmatpush3.bf16.msra.mxu1 %v8191_v49 }
0x25f1   :  { %8196 = vmatprep.subr.bf16.mxu1 %v8195_v26 }
0x25f3   :  { %7723 = vmatmul.mubr.msk.f32.vlgmr.msra.gmra.mrb[96].mxu1 %vm630_vm7, %v5970_v24 }
0x25f4   :  { %8198 = vmatpush3.bf16.msra.mxu1 %v8195_v26 }
0x25f5   :  { %8200 = vmatprep.subr.bf16.mxu1 %v8199_v17 }
0x25f7   :  { %v5890_v42 = vpop.xlane.xlu0 %5889 }
0x25f8   :  { %v5902_v10 = vmul.f32 0.03125, %v5890_v42  ;;  %v5887_v60 = vpop.xlane.xlu1 %5886  ;;  %8202 = vmatpush3.bf16.msra.mxu1 %v8199_v17 }
0x25f9   :  { %v5901_v4 = vmul.f32 0.03125, %v5887_v60  ;;  %8204 = vmatprep.subr.bf16.mxu1 %v8203_v16 }
0x25fa   :  { %v5910_v61 = vadd.f32 1e-05, %v5902_v10 }
0x25fb   :  { %v5909_v22 = vadd.f32 1e-05, %v5901_v4 }
0x25fc   :  { %8871 = vrsqrt.f32 %v5910_v61 }
0x25fd   :  { %8873 = vrsqrt.f32 %v5909_v22 }
0x25ff   :  { %v5896_v43 = vpop.xlane.xlu0 %5895 }
0x2600   :  { %v5904_v63 = vmul.f32 0.03125, %v5896_v43  ;;  %v5893_v38 = vpop.xlane.xlu1 %5892 }
0x2601   :  { %v5903_v27 = vmul.f32 0.03125, %v5893_v38 }
0x2602   :  { %v5912_v48 = vadd.f32 1e-05, %v5904_v63 }
0x2603   :  { %v5911_v0 = vadd.f32 1e-05, %v5903_v27 }
0x2604   :  { %8875 = vrsqrt.f32 %v5912_v48 }
0x2605   :  { %8877 = vrsqrt.f32 %v5911_v0 }
0x2606   :  { %v8872_v46 = vpop.eup %8871 }
0x2607   :  { %v8874_v52 = vpop.eup %8873  ;;  %v5926_v11 = vmul.f32 %v8872_v46, %v10804_v18 }
0x2608   :  { %v5925_v50 = vmul.f32 %v8874_v52, %v10806_v3 }
0x2609   :  { %v5938_v15 = vmul.f32 %v10826_v12, %v5926_v11 }
0x260a   :  { %v5937_v40 = vmul.f32 %v10826_v12, %v5925_v50 }
0x260b   :  { %v5950_v44 = vadd.f32 %v10830_v56, %v5938_v15 }
0x260c   :  { %v5949_v39 = vadd.f32 %v10830_v56, %v5937_v40 }
0x260d   :  { %v5962_v6 = vmul.f32 %v10836_v19, %v5950_v44 }
0x260e   :  { %v8876_v28 = vpop.eup %8875  ;;  %v5961_v30 = vmul.f32 %v10836_v19, %v5949_v39 }
0x260f   :  { %v8878_v35 = vpop.eup %8877  ;;  %v5928_v18 = vmul.f32 %v8876_v28, %v10814_v32  ;;  %v5974_v33 = vadd.f32 %v10844_v62, %v5962_v6 }
0x2610   :  { %v5927_v3 = vmul.f32 %v8878_v35, %v10816_v53  ;;  %v5973_v59 = vadd.f32 %v10844_v62, %v5961_v30 }
0x2611   :  { %v5940_v13 = vmul.f32 %v10826_v12, %v5928_v18 }
0x2612   :  { %7733 = vmatprep.mubr.msk.f32.mxu1 %vm630_vm7, %v5973_v59  ;;  %v5939_v23 = vmul.f32 %v10826_v12, %v5927_v3  ;;  %v6324_v12 = vrot.slane %v10709_v21, %v10967_v36 }
0x2613   :  { %v5952_v8 = vadd.f32 %v10830_v56, %v5940_v13  ;;  %7734 = vmatmul.mubr.msk.f32.vlgmr.msra.gmra.mrb[96].mxu1 %vm630_vm7, %v5974_v33 }
0x2614   :  { %8206 = vmatpush3.bf16.msra.mxu1 %v8203_v16  ;;  %v5951_v32 = vadd.f32 %v10830_v56, %v5939_v23 }
0x2615   :  { %8208 = vmatprep.subr.bf16.mxu1 %v8207_v5  ;;  %v5964_v53 = vmul.f32 %v10836_v19, %v5952_v8 }
0x2616   :  { %v5963_v41 = vmul.f32 %v10836_v19, %v5951_v32 }
0x2617   :  { %v5976_v58 = vadd.f32 %v10844_v62, %v5964_v53 }
0x2618   :  { %8210 = vmatpush3.bf16.msra.mxu1 %v8207_v5  ;;  %v5975_v2 = vadd.f32 %v10844_v62, %v5963_v41 }
0x261a   :  { %7744 = vmatprep.mubr.msk.f32.mxu1 %vm630_vm7, %v5975_v2 }
0x261b   :  { %7745 = vmatmul.mubr.msk.f32.vlgmr.msra.gmra.mrb[96].mxu1 %vm630_vm7, %v5976_v58 }
0x26ee   :  { %v7746_v1 = vpop.f32.mrb[96].mxu1 }
0x26ef   :  { %v6326_v14 = vadd.f32 %v7746_v1, %v6324_v12  ;;  %v6310_v56 = vpop.f32.mrb[97].mxu1 }
0x26f0   :  { %v6325_v37 = vadd.f32 %v6324_v12, %v6310_v56 }
0x26f1   :  { %6328 = vst [vmem:[%s10900_s4 + $0x8] sm:$0xff] %v6326_v14 }
0x26f2   :  { %6327 = vst [vmem:[%s10900_s4] sm:$0xff] %v6325_v37 }
0x26f3   :  { %6333 = vsyncpa [#allocation3], 1 }

</bundles_post_ra>
